<compile_context>
chip_gen: v5e
topology: v5e:2x2
jax: 0.10.0
libtpu: 0.0.40
codegen_flags: <defaults>
</compile_context>

<pallas_src>
import functools

import jax
import jax.numpy as jnp
from jax.experimental import pallas as pl
from jax.experimental.pallas import tpu as pltpu

GN_EPS = 1e-5


# ------------------------------ kernel ------------------------------
def _make_double_conv_kernel(H, W, Cin, Cmid, Cout, G):
    def kernel(x_ref, b1_ref, s1_ref, tg1_ref, be1_ref,
               b2_ref, s2_ref, tg2_ref, be2_ref,
               o_ref, xpad_ref, ypad_ref):

        def conv_gn_relu(pad_ref, b_ref, s_ref, tg_ref, be_ref, C):
            # pad_ref: (H+2, (W+2)*Cprev) f32 zero-padded activations (VMEM)
            # b_ref:   (3, (W+2)*Cprev, W*C) bf16 banded conv weights
            acc = jnp.zeros((H, W * C), jnp.float32)
            for dy in range(3):
                acc = acc + jnp.dot(
                    pad_ref[dy:dy + H, :].astype(jnp.bfloat16), b_ref[dy],
                    preferred_element_type=jnp.float32)

            # GroupNorm over (channels-in-group, H, W) for this sample.
            inv_cnt = 1.0 / float(H * W * (C // G))
            ssum = jnp.sum(acc, axis=0, keepdims=True)           # (1, W*C)
            ssq = jnp.sum(acc * acc, axis=0, keepdims=True)      # (1, W*C)
            gstats = jnp.dot(jnp.concatenate([ssum, ssq], axis=0), s_ref[...],
                             preferred_element_type=jnp.float32)     # (2, G)
            g_mean = gstats[0:1, :] * inv_cnt
            g_var = gstats[1:2, :] * inv_cnt - g_mean * g_mean   # biased var
            g_inv = jax.lax.rsqrt(g_var + GN_EPS)
            # tg has gamma folded in: row0 -> gamma*inv_std per lane,
            # row1 -> gamma*inv_std*mean per lane.
            lanes = jnp.dot(jnp.concatenate([g_inv, g_mean * g_inv], axis=0),
                            tg_ref[...], preferred_element_type=jnp.float32)
            shift = be_ref[...] - lanes[1:2, :]                  # (1, W*C)
            # Single scale + shift + ReLU over the full tile.
            return jnp.maximum(acc * lanes[0:1, :] + shift, 0.0)

        # ---- block 1: zero-pad the input inside VMEM (tiny), conv+GN+ReLU ----
        xpad_ref[...] = jnp.zeros_like(xpad_ref)
        xpad_ref[1:H + 1, 0:W * Cin] = x_ref[...]
        y1 = conv_gn_relu(xpad_ref, b1_ref, s1_ref, tg1_ref, be1_ref, Cmid)

        # ---- block 2: intermediate never leaves VMEM.  Only the pad border is
        # zeroed (interior rows/lanes are fully overwritten right below); done
        # every iteration so it is correct under megacore grid sharding.
        ypad_ref[0:1, :] = jnp.zeros((1, (W + 2) * Cmid), jnp.float32)
        ypad_ref[H + 1:H + 2, :] = jnp.zeros((1, (W + 2) * Cmid), jnp.float32)
        ypad_ref[:, W * Cmid:(W + 2) * Cmid] = jnp.zeros((H + 2, 2 * Cmid),
                                                         jnp.float32)
        ypad_ref[1:H + 1, 0:W * Cmid] = y1
        y2 = conv_gn_relu(ypad_ref, b2_ref, s2_ref, tg2_ref, be2_ref, Cout)

        o_ref[...] = y2.astype(o_ref.dtype)

    return kernel


# --------------------------- wrapper helpers ---------------------------
def _band_weights(w_oihw, W, dtype=jnp.bfloat16):
    """Fold a 3x3 conv weight (OIHW) into 3 banded matmul weights.

    B[dy][(x+dx-1)*Cin + ci, x*Cout + co] = w[co, ci, dy, dx]; taps that fall
    outside [0, W) only hit zeroed pad lanes, so they are simply omitted.
    """
    Cout, Cin = w_oihw.shape[0], w_oihw.shape[1]
    w = jnp.transpose(w_oihw, (2, 3, 1, 0)).astype(jnp.float32)  # (3,3,Cin,Cout)
    bands = []
    for dy in range(3):
        b = jnp.zeros(((W + 2) * Cin, W * Cout), jnp.float32)
        for dx in range(3):
            sel = jnp.eye(W + 2, W, k=1 - dx, dtype=jnp.float32)  # sel[x+dx-1, x]=1
            b = b + jnp.einsum("rc,io->rico", sel, w[dy, dx]).reshape(
                (W + 2) * Cin, W * Cout)
        bands.append(b)
    return jnp.stack(bands).astype(dtype)          # (3, (W+2)*Cin, W*Cout)


def _gn_maps(C, W, G, gamma, beta):
    """GroupNorm helper matrices in lane space.

    sel:  (W*C, G)  one-hot lane->group selector (for the sum/sum-sq reduce)
    tg:   (G, W*C)  group->lane broadcaster with gamma folded in
    be:   (1, W*C)  beta broadcast to lanes
    """
    cpg = C // G
    ch = jnp.arange(W * C) % C                     # channel of each lane
    sel = (ch[:, None] // cpg == jnp.arange(G)[None, :]).astype(jnp.float32)
    gamma_lane = jnp.tile(gamma.astype(jnp.float32), W)          # (W*C,)
    tg = jnp.transpose(sel) * gamma_lane[None, :]                # (G, W*C)
    be = jnp.tile(beta.astype(jnp.float32), W).reshape(1, W * C)
    return sel, tg, be


def _full_block(shape):
    return pl.BlockSpec(shape, lambda n: (0,) * len(shape))


@functools.partial(jax.jit, static_argnames=("group_num",))
def double_conv_pallas(x_nchw, w1, g1, b1, w2, g2, b2, group_num):
    """DoubleConv forward. x_nchw: (N, Cin, H, W); conv weights in OIHW."""
    N, Cin, H, W = x_nchw.shape
    Cmid, Cout = w1.shape[0], w2.shape[0]
    assert Cmid % group_num == 0 and Cout % group_num == 0

    # NCHW -> channels-last, flattened to lane-dense 2D (H, W*Cin) per sample.
    x2d = jnp.transpose(x_nchw, (0, 2, 3, 1)).reshape(N, H, W * Cin)

    # Parameter prep (folds under jit; with static weights precompute once at
    # module init to drop these tiny XLA ops from the per-call path).
    band1 = _band_weights(w1, W)
    band2 = _band_weights(w2, W)
    sel1, tg1, be1 = _gn_maps(Cmid, W, group_num, g1, b1)
    sel2, tg2, be2 = _gn_maps(Cout, W, group_num, g2, b2)

    kernel = _make_double_conv_kernel(H, W, Cin, Cmid, Cout, group_num)
    out2d = pl.pallas_call(
        kernel,
        out_shape=jax.ShapeDtypeStruct((N, H, W * Cout), jnp.float32),
        grid=(N,),
        in_specs=[
            pl.BlockSpec((pl.Squeezed(), H, W * Cin), lambda n: (n, 0, 0)),
            _full_block(band1.shape), _full_block(sel1.shape),
            _full_block(tg1.shape), _full_block(be1.shape),
            _full_block(band2.shape), _full_block(sel2.shape),
            _full_block(tg2.shape), _full_block(be2.shape),
        ],
        out_specs=pl.BlockSpec((pl.Squeezed(), H, W * Cout), lambda n: (n, 0, 0)),
        scratch_shapes=[
            pltpu.VMEM((H + 2, (W + 2) * Cin), jnp.float32),   # padded input
            pltpu.VMEM((H + 2, (W + 2) * Cmid), jnp.float32),  # padded intermediate
        ],
        compiler_params=pltpu.CompilerParams(
            dimension_semantics=("parallel",)),
    )(x2d, band1, sel1, tg1, be1, band2, sel2, tg2, be2)

    # (N, H, W*Cout) -> (N, Cout, H, W)
    return jnp.transpose(out2d.reshape(N, H, W, Cout), (0, 3, 1, 2))


# ----------------------- pure-JAX reference (for checking) -----------------------
def _ref_block(x_nchw, w_oihw, gamma, beta, group_num):
    y = jax.lax.conv_general_dilated(
        x_nchw, w_oihw, window_strides=(1, 1), padding="SAME",
        dimension_numbers=("NCHW", "OIHW", "NCHW"))
    N, C, H, W = y.shape
    yg = y.reshape(N, group_num, C // group_num, H, W)
    mean = yg.mean(axis=(2, 3, 4), keepdims=True)
    var = yg.var(axis=(2, 3, 4), keepdims=True)
    yn = ((yg - mean) / jnp.sqrt(var + GN_EPS)).reshape(N, C, H, W)
    yn = yn * gamma.reshape(1, C, 1, 1) + beta.reshape(1, C, 1, 1)
    return jnp.maximum(yn, 0.0)


def double_conv_ref(x, w1, g1, b1, w2, g2, b2, group_num):
    return _ref_block(_ref_block(x, w1, g1, b1, group_num),
                      w2, g2, b2, group_num)


if __name__ == "__main__":
    # DoubleConv(in_channels=4, out_channels=32, mid_channels=None, group_num=16)
    in_channels, mid_channels, out_channels, group_num = 4, 32, 32, 16
    N, H, W = 2, 16, 16

    key = jax.random.PRNGKey(0)
    kx, kw1, kw2, kg1, kb1, kg2, kb2 = jax.random.split(key, 7)
    x = jax.random.normal(kx, (N, in_channels, H, W), jnp.float32)

    # Conv weights (OIHW, no bias); GroupNorm affine params perturbed from the
    # default ones/zeros so the affine fold is actually exercised.
    w1 = 0.1 * jax.random.normal(kw1, (mid_channels, in_channels, 3, 3), jnp.float32)
    w2 = 0.1 * jax.random.normal(kw2, (out_channels, mid_channels, 3, 3), jnp.float32)
    g1 = 1.0 + 0.2 * jax.random.normal(kg1, (mid_channels,), jnp.float32)
    b1 = 0.2 * jax.random.normal(kb1, (mid_channels,), jnp.float32)
    g2 = 1.0 + 0.2 * jax.random.normal(kg2, (out_channels,), jnp.float32)
    b2 = 0.2 * jax.random.normal(kb2, (out_channels,), jnp.float32)

    out = double_conv_pallas(x, w1, g1, b1, w2, g2, b2, group_num)
    out = jax.block_until_ready(out)

    ref = double_conv_ref(x, w1, g1, b1, w2, g2, b2, group_num)
    assert out.shape == (N, out_channels, H, W)
    # bf16 matmul operands (f32 accumulation) -> relaxed tolerance vs f32 ref.
    assert jnp.allclose(out, ref, rtol=5e-2, atol=5e-2), \
        f"max err {jnp.max(jnp.abs(out - ref))}"
    print("KERNEL_OK")
</pallas_src>

<mosaic_0001>
module attributes {stable_mosaic.version = 11 : i64} {
  func.func @kernel(%arg0: i32, %arg1: memref<1x16x64xf32, #tpu.memory_space<vmem>>, %arg2: memref<3x72x512xbf16, #tpu.memory_space<vmem>>, %arg3: memref<512x16xf32, #tpu.memory_space<vmem>>, %arg4: memref<16x512xf32, #tpu.memory_space<vmem>>, %arg5: memref<1x512xf32, #tpu.memory_space<vmem>>, %arg6: memref<3x576x512xbf16, #tpu.memory_space<vmem>>, %arg7: memref<512x16xf32, #tpu.memory_space<vmem>>, %arg8: memref<16x512xf32, #tpu.memory_space<vmem>>, %arg9: memref<1x512xf32, #tpu.memory_space<vmem>>, %arg10: memref<1x16x512xf32, #tpu.memory_space<vmem>>, %arg11: memref<18x72xf32, #tpu.memory_space<vmem>>, %arg12: memref<18x576xf32, #tpu.memory_space<vmem>>) attributes {dimension_semantics = [#tpu.dimension_semantics<parallel>], iteration_bounds = array<i64: 2>, scalar_prefetch = 0 : i64, scratch_operands = 2 : i64, tpu.core_type = #tpu.core_type<tc>, window_params = [{transform_indices = @transform_0, window_bounds = array<i64: 1, 16, 64>}, {pipeline_mode = #tpu.pipeline_mode<synchronous>, transform_indices = @transform_1, window_bounds = array<i64: 3, 72, 512>}, {pipeline_mode = #tpu.pipeline_mode<synchronous>, transform_indices = @transform_2, window_bounds = array<i64: 512, 16>}, {pipeline_mode = #tpu.pipeline_mode<synchronous>, transform_indices = @transform_3, window_bounds = array<i64: 16, 512>}, {pipeline_mode = #tpu.pipeline_mode<synchronous>, transform_indices = @transform_4, window_bounds = array<i64: 1, 512>}, {pipeline_mode = #tpu.pipeline_mode<synchronous>, transform_indices = @transform_5, window_bounds = array<i64: 3, 576, 512>}, {pipeline_mode = #tpu.pipeline_mode<synchronous>, transform_indices = @transform_6, window_bounds = array<i64: 512, 16>}, {pipeline_mode = #tpu.pipeline_mode<synchronous>, transform_indices = @transform_7, window_bounds = array<i64: 16, 512>}, {pipeline_mode = #tpu.pipeline_mode<synchronous>, transform_indices = @transform_8, window_bounds = array<i64: 1, 512>}, {transform_indices = @transform_9, window_bounds = array<i64: 1, 16, 512>}]} {
    %cst = arith.constant 0.000000e+00 : f32
    %0 = vector.broadcast %cst : f32 to vector<18x72xf32>
    %c0 = arith.constant 0 : index
    %c0_0 = arith.constant 0 : index
    %1 = vector.load %arg11[%c0, %c0_0] : memref<18x72xf32, #tpu.memory_space<vmem>>, vector<18x72xf32>
    tpu.vector_store %arg11[%c0, %c0_0], %0 {strides = array<i32>} : memref<18x72xf32, #tpu.memory_space<vmem>>, vector<18x72xf32>,
    %c0_1 = arith.constant 0 : index
    %c0_2 = arith.constant 0 : index
    %c0_3 = arith.constant 0 : index
    %2 = vector.load %arg1[%c0_1, %c0_2, %c0_3] : memref<1x16x64xf32, #tpu.memory_space<vmem>>, vector<1x16x64xf32>
    %3 = vector.shape_cast %2 : vector<1x16x64xf32> to vector<16x64xf32>
    %c1 = arith.constant 1 : index
    %c0_4 = arith.constant 0 : index
    %4 = vector.load %arg11[%c1, %c0_4] : memref<18x72xf32, #tpu.memory_space<vmem>>, vector<16x64xf32>
    tpu.vector_store %arg11[%c1, %c0_4], %3 {strides = array<i32>} : memref<18x72xf32, #tpu.memory_space<vmem>>, vector<16x64xf32>,
    %cst_5 = arith.constant 0.000000e+00 : f32
    %5 = vector.broadcast %cst_5 : f32 to vector<16x512xf32>
    %c0_6 = arith.constant 0 : index
    %c0_7 = arith.constant 0 : index
    %6 = vector.load %arg11[%c0_6, %c0_7] : memref<18x72xf32, #tpu.memory_space<vmem>>, vector<16x72xf32>
    %7 = arith.truncf %6 : vector<16x72xf32> to vector<16x72xbf16>
    %c0_8 = arith.constant 0 : index
    %c0_9 = arith.constant 0 : index
    %c0_10 = arith.constant 0 : index
    %8 = vector.load %arg2[%c0_8, %c0_9, %c0_10] : memref<3x72x512xbf16, #tpu.memory_space<vmem>>, vector<1x72x512xbf16>
    %9 = vector.shape_cast %8 : vector<1x72x512xbf16> to vector<72x512xbf16>
    %cst_11 = arith.constant dense<0.000000e+00> : vector<16x512xf32>
    %10 = tpu.matmul %7, %9, %cst_11 {dimension_numbers = #tpu.dot_dimension_numbers<[1], [0], [0], [1], [0, 0, 1, 1], [], []>} : vector<16x72xbf16>, vector<72x512xbf16>, vector<16x512xf32> -> vector<16x512xf32>
    %11 = arith.addf %5, %10 : vector<16x512xf32>
    %c1_12 = arith.constant 1 : index
    %c0_13 = arith.constant 0 : index
    %12 = vector.load %arg11[%c1_12, %c0_13] : memref<18x72xf32, #tpu.memory_space<vmem>>, vector<16x72xf32>
    %13 = arith.truncf %12 : vector<16x72xf32> to vector<16x72xbf16>
    %c1_14 = arith.constant 1 : index
    %c0_15 = arith.constant 0 : index
    %c0_16 = arith.constant 0 : index
    %14 = vector.load %arg2[%c1_14, %c0_15, %c0_16] : memref<3x72x512xbf16, #tpu.memory_space<vmem>>, vector<1x72x512xbf16>
    %15 = vector.shape_cast %14 : vector<1x72x512xbf16> to vector<72x512xbf16>
    %cst_17 = arith.constant dense<0.000000e+00> : vector<16x512xf32>
    %16 = tpu.matmul %13, %15, %cst_17 {dimension_numbers = #tpu.dot_dimension_numbers<[1], [0], [0], [1], [0, 0, 1, 1], [], []>} : vector<16x72xbf16>, vector<72x512xbf16>, vector<16x512xf32> -> vector<16x512xf32>
    %17 = arith.addf %11, %16 : vector<16x512xf32>
    %c2 = arith.constant 2 : index
    %c0_18 = arith.constant 0 : index
    %18 = vector.load %arg11[%c2, %c0_18] : memref<18x72xf32, #tpu.memory_space<vmem>>, vector<16x72xf32>
    %19 = arith.truncf %18 : vector<16x72xf32> to vector<16x72xbf16>
    %c2_19 = arith.constant 2 : index
    %c0_20 = arith.constant 0 : index
    %c0_21 = arith.constant 0 : index
    %20 = vector.load %arg2[%c2_19, %c0_20, %c0_21] : memref<3x72x512xbf16, #tpu.memory_space<vmem>>, vector<1x72x512xbf16>
    %21 = vector.shape_cast %20 : vector<1x72x512xbf16> to vector<72x512xbf16>
    %cst_22 = arith.constant dense<0.000000e+00> : vector<16x512xf32>
    %22 = tpu.matmul %19, %21, %cst_22 {dimension_numbers = #tpu.dot_dimension_numbers<[1], [0], [0], [1], [0, 0, 1, 1], [], []>} : vector<16x72xbf16>, vector<72x512xbf16>, vector<16x512xf32> -> vector<16x512xf32>
    %23 = arith.addf %17, %22 : vector<16x512xf32>
    %cst_23 = arith.constant dense<0.000000e+00> : vector<512xf32>
    %24 = vector.multi_reduction <add>, %23, %cst_23 [0] : vector<16x512xf32> to vector<512xf32>
    %25 = vector.shape_cast %24 : vector<512xf32> to vector<1x512xf32>
    %26 = arith.mulf %23, %23 : vector<16x512xf32>
    %cst_24 = arith.constant dense<0.000000e+00> : vector<512xf32>
    %27 = vector.multi_reduction <add>, %26, %cst_24 [0] : vector<16x512xf32> to vector<512xf32>
    %28 = vector.shape_cast %27 : vector<512xf32> to vector<1x512xf32>
    %29 = tpu.concatenate %25, %28 in 0 : vector<1x512xf32>, vector<1x512xf32> -> vector<2x512xf32>
    %c0_25 = arith.constant 0 : index
    %c0_26 = arith.constant 0 : index
    %30 = vector.load %arg3[%c0_25, %c0_26] : memref<512x16xf32, #tpu.memory_space<vmem>>, vector<512x16xf32>
    %cst_27 = arith.constant dense<0.000000e+00> : vector<2x16xf32>
    %31 = tpu.matmul %29, %30, %cst_27 {dimension_numbers = #tpu.dot_dimension_numbers<[1], [0], [0], [1], [0, 0, 1, 1], [], []>} : vector<2x512xf32>, vector<512x16xf32>, vector<2x16xf32> -> vector<2x16xf32>
    %32 = vector.extract_strided_slice %31 {offsets = [0, 0], sizes = [1, 16], strides = [1, 1]} : vector<2x16xf32> to vector<1x16xf32>
    %cst_28 = arith.constant 0.001953125 : f32
    %33 = vector.broadcast %cst_28 : f32 to vector<1x16xf32>
    %34 = arith.mulf %32, %33 : vector<1x16xf32>
    %35 = vector.extract_strided_slice %31 {offsets = [1, 0], sizes = [1, 16], strides = [1, 1]} : vector<2x16xf32> to vector<1x16xf32>
    %cst_29 = arith.constant 0.001953125 : f32
    %36 = vector.broadcast %cst_29 : f32 to vector<1x16xf32>
    %37 = arith.mulf %35, %36 : vector<1x16xf32>
    %38 = arith.mulf %34, %34 : vector<1x16xf32>
    %39 = arith.subf %37, %38 : vector<1x16xf32>
    %cst_30 = arith.constant 9.99999974E-6 : f32
    %40 = vector.broadcast %cst_30 : f32 to vector<1x16xf32>
    %41 = arith.addf %39, %40 : vector<1x16xf32>
    %42 = math.rsqrt %41 : vector<1x16xf32>
    %43 = arith.mulf %34, %42 : vector<1x16xf32>
    %44 = tpu.concatenate %42, %43 in 0 : vector<1x16xf32>, vector<1x16xf32> -> vector<2x16xf32>
    %c0_31 = arith.constant 0 : index
    %c0_32 = arith.constant 0 : index
    %45 = vector.load %arg4[%c0_31, %c0_32] : memref<16x512xf32, #tpu.memory_space<vmem>>, vector<16x512xf32>
    %cst_33 = arith.constant dense<0.000000e+00> : vector<2x512xf32>
    %46 = tpu.matmul %44, %45, %cst_33 {dimension_numbers = #tpu.dot_dimension_numbers<[1], [0], [0], [1], [0, 0, 1, 1], [], []>} : vector<2x16xf32>, vector<16x512xf32>, vector<2x512xf32> -> vector<2x512xf32>
    %c0_34 = arith.constant 0 : index
    %c0_35 = arith.constant 0 : index
    %47 = vector.load %arg5[%c0_34, %c0_35] : memref<1x512xf32, #tpu.memory_space<vmem>>, vector<1x512xf32>
    %48 = vector.extract_strided_slice %46 {offsets = [1, 0], sizes = [1, 512], strides = [1, 1]} : vector<2x512xf32> to vector<1x512xf32>
    %49 = arith.subf %47, %48 : vector<1x512xf32>
    %50 = vector.extract_strided_slice %46 {offsets = [0, 0], sizes = [1, 512], strides = [1, 1]} : vector<2x512xf32> to vector<1x512xf32>
    %51 = vector.broadcast %50 : vector<1x512xf32> to vector<16x512xf32>
    %52 = arith.mulf %23, %51 : vector<16x512xf32>
    %53 = vector.broadcast %49 : vector<1x512xf32> to vector<16x512xf32>
    %54 = arith.addf %52, %53 : vector<16x512xf32>
    %cst_36 = arith.constant 0.000000e+00 : f32
    %55 = vector.broadcast %cst_36 : f32 to vector<16x512xf32>
    %56 = arith.maximumf %54, %55 : vector<16x512xf32>
    %cst_37 = arith.constant 0.000000e+00 : f32
    %57 = vector.broadcast %cst_37 : f32 to vector<1x576xf32>
    %c0_38 = arith.constant 0 : index
    %c0_39 = arith.constant 0 : index
    %58 = vector.load %arg12[%c0_38, %c0_39] : memref<18x576xf32, #tpu.memory_space<vmem>>, vector<1x576xf32>
    tpu.vector_store %arg12[%c0_38, %c0_39], %57 {strides = array<i32>} : memref<18x576xf32, #tpu.memory_space<vmem>>, vector<1x576xf32>,
    %cst_40 = arith.constant 0.000000e+00 : f32
    %59 = vector.broadcast %cst_40 : f32 to vector<1x576xf32>
    %c17 = arith.constant 17 : index
    %c0_41 = arith.constant 0 : index
    %60 = vector.load %arg12[%c17, %c0_41] : memref<18x576xf32, #tpu.memory_space<vmem>>, vector<1x576xf32>
    tpu.vector_store %arg12[%c17, %c0_41], %59 {strides = array<i32>} : memref<18x576xf32, #tpu.memory_space<vmem>>, vector<1x576xf32>,
    %cst_42 = arith.constant 0.000000e+00 : f32
    %61 = vector.broadcast %cst_42 : f32 to vector<18x64xf32>
    %c0_43 = arith.constant 0 : index
    %c512 = arith.constant 512 : index
    %62 = vector.load %arg12[%c0_43, %c512] : memref<18x576xf32, #tpu.memory_space<vmem>>, vector<18x64xf32>
    tpu.vector_store %arg12[%c0_43, %c512], %61 {strides = array<i32>} : memref<18x576xf32, #tpu.memory_space<vmem>>, vector<18x64xf32>,
    %c1_44 = arith.constant 1 : index
    %c0_45 = arith.constant 0 : index
    %63 = vector.load %arg12[%c1_44, %c0_45] : memref<18x576xf32, #tpu.memory_space<vmem>>, vector<16x512xf32>
    tpu.vector_store %arg12[%c1_44, %c0_45], %56 {strides = array<i32>} : memref<18x576xf32, #tpu.memory_space<vmem>>, vector<16x512xf32>,
    %cst_46 = arith.constant 0.000000e+00 : f32
    %64 = vector.broadcast %cst_46 : f32 to vector<16x512xf32>
    %c0_47 = arith.constant 0 : index
    %c0_48 = arith.constant 0 : index
    %65 = vector.load %arg12[%c0_47, %c0_48] : memref<18x576xf32, #tpu.memory_space<vmem>>, vector<16x576xf32>
    %66 = arith.truncf %65 : vector<16x576xf32> to vector<16x576xbf16>
    %c0_49 = arith.constant 0 : index
    %c0_50 = arith.constant 0 : index
    %c0_51 = arith.constant 0 : index
    %67 = vector.load %arg6[%c0_49, %c0_50, %c0_51] : memref<3x576x512xbf16, #tpu.memory_space<vmem>>, vector<1x576x512xbf16>
    %68 = vector.shape_cast %67 : vector<1x576x512xbf16> to vector<576x512xbf16>
    %cst_52 = arith.constant dense<0.000000e+00> : vector<16x512xf32>
    %69 = tpu.matmul %66, %68, %cst_52 {dimension_numbers = #tpu.dot_dimension_numbers<[1], [0], [0], [1], [0, 0, 1, 1], [], []>} : vector<16x576xbf16>, vector<576x512xbf16>, vector<16x512xf32> -> vector<16x512xf32>
    %70 = arith.addf %64, %69 : vector<16x512xf32>
    %c1_53 = arith.constant 1 : index
    %c0_54 = arith.constant 0 : index
    %71 = vector.load %arg12[%c1_53, %c0_54] : memref<18x576xf32, #tpu.memory_space<vmem>>, vector<16x576xf32>
    %72 = arith.truncf %71 : vector<16x576xf32> to vector<16x576xbf16>
    %c1_55 = arith.constant 1 : index
    %c0_56 = arith.constant 0 : index
    %c0_57 = arith.constant 0 : index
    %73 = vector.load %arg6[%c1_55, %c0_56, %c0_57] : memref<3x576x512xbf16, #tpu.memory_space<vmem>>, vector<1x576x512xbf16>
    %74 = vector.shape_cast %73 : vector<1x576x512xbf16> to vector<576x512xbf16>
    %cst_58 = arith.constant dense<0.000000e+00> : vector<16x512xf32>
    %75 = tpu.matmul %72, %74, %cst_58 {dimension_numbers = #tpu.dot_dimension_numbers<[1], [0], [0], [1], [0, 0, 1, 1], [], []>} : vector<16x576xbf16>, vector<576x512xbf16>, vector<16x512xf32> -> vector<16x512xf32>
    %76 = arith.addf %70, %75 : vector<16x512xf32>
    %c2_59 = arith.constant 2 : index
    %c0_60 = arith.constant 0 : index
    %77 = vector.load %arg12[%c2_59, %c0_60] : memref<18x576xf32, #tpu.memory_space<vmem>>, vector<16x576xf32>
    %78 = arith.truncf %77 : vector<16x576xf32> to vector<16x576xbf16>
    %c2_61 = arith.constant 2 : index
    %c0_62 = arith.constant 0 : index
    %c0_63 = arith.constant 0 : index
    %79 = vector.load %arg6[%c2_61, %c0_62, %c0_63] : memref<3x576x512xbf16, #tpu.memory_space<vmem>>, vector<1x576x512xbf16>
    %80 = vector.shape_cast %79 : vector<1x576x512xbf16> to vector<576x512xbf16>
    %cst_64 = arith.constant dense<0.000000e+00> : vector<16x512xf32>
    %81 = tpu.matmul %78, %80, %cst_64 {dimension_numbers = #tpu.dot_dimension_numbers<[1], [0], [0], [1], [0, 0, 1, 1], [], []>} : vector<16x576xbf16>, vector<576x512xbf16>, vector<16x512xf32> -> vector<16x512xf32>
    %82 = arith.addf %76, %81 : vector<16x512xf32>
    %cst_65 = arith.constant dense<0.000000e+00> : vector<512xf32>
    %83 = vector.multi_reduction <add>, %82, %cst_65 [0] : vector<16x512xf32> to vector<512xf32>
    %84 = vector.shape_cast %83 : vector<512xf32> to vector<1x512xf32>
    %85 = arith.mulf %82, %82 : vector<16x512xf32>
    %cst_66 = arith.constant dense<0.000000e+00> : vector<512xf32>
    %86 = vector.multi_reduction <add>, %85, %cst_66 [0] : vector<16x512xf32> to vector<512xf32>
    %87 = vector.shape_cast %86 : vector<512xf32> to vector<1x512xf32>
    %88 = tpu.concatenate %84, %87 in 0 : vector<1x512xf32>, vector<1x512xf32> -> vector<2x512xf32>
    %c0_67 = arith.constant 0 : index
    %c0_68 = arith.constant 0 : index
    %89 = vector.load %arg7[%c0_67, %c0_68] : memref<512x16xf32, #tpu.memory_space<vmem>>, vector<512x16xf32>
    %cst_69 = arith.constant dense<0.000000e+00> : vector<2x16xf32>
    %90 = tpu.matmul %88, %89, %cst_69 {dimension_numbers = #tpu.dot_dimension_numbers<[1], [0], [0], [1], [0, 0, 1, 1], [], []>} : vector<2x512xf32>, vector<512x16xf32>, vector<2x16xf32> -> vector<2x16xf32>
    %91 = vector.extract_strided_slice %90 {offsets = [0, 0], sizes = [1, 16], strides = [1, 1]} : vector<2x16xf32> to vector<1x16xf32>
    %cst_70 = arith.constant 0.001953125 : f32
    %92 = vector.broadcast %cst_70 : f32 to vector<1x16xf32>
    %93 = arith.mulf %91, %92 : vector<1x16xf32>
    %94 = vector.extract_strided_slice %90 {offsets = [1, 0], sizes = [1, 16], strides = [1, 1]} : vector<2x16xf32> to vector<1x16xf32>
    %cst_71 = arith.constant 0.001953125 : f32
    %95 = vector.broadcast %cst_71 : f32 to vector<1x16xf32>
    %96 = arith.mulf %94, %95 : vector<1x16xf32>
    %97 = arith.mulf %93, %93 : vector<1x16xf32>
    %98 = arith.subf %96, %97 : vector<1x16xf32>
    %cst_72 = arith.constant 9.99999974E-6 : f32
    %99 = vector.broadcast %cst_72 : f32 to vector<1x16xf32>
    %100 = arith.addf %98, %99 : vector<1x16xf32>
    %101 = math.rsqrt %100 : vector<1x16xf32>
    %102 = arith.mulf %93, %101 : vector<1x16xf32>
    %103 = tpu.concatenate %101, %102 in 0 : vector<1x16xf32>, vector<1x16xf32> -> vector<2x16xf32>
    %c0_73 = arith.constant 0 : index
    %c0_74 = arith.constant 0 : index
    %104 = vector.load %arg8[%c0_73, %c0_74] : memref<16x512xf32, #tpu.memory_space<vmem>>, vector<16x512xf32>
    %cst_75 = arith.constant dense<0.000000e+00> : vector<2x512xf32>
    %105 = tpu.matmul %103, %104, %cst_75 {dimension_numbers = #tpu.dot_dimension_numbers<[1], [0], [0], [1], [0, 0, 1, 1], [], []>} : vector<2x16xf32>, vector<16x512xf32>, vector<2x512xf32> -> vector<2x512xf32>
    %c0_76 = arith.constant 0 : index
    %c0_77 = arith.constant 0 : index
    %106 = vector.load %arg9[%c0_76, %c0_77] : memref<1x512xf32, #tpu.memory_space<vmem>>, vector<1x512xf32>
    %107 = vector.extract_strided_slice %105 {offsets = [1, 0], sizes = [1, 512], strides = [1, 1]} : vector<2x512xf32> to vector<1x512xf32>
    %108 = arith.subf %106, %107 : vector<1x512xf32>
    %109 = vector.extract_strided_slice %105 {offsets = [0, 0], sizes = [1, 512], strides = [1, 1]} : vector<2x512xf32> to vector<1x512xf32>
    %110 = vector.broadcast %109 : vector<1x512xf32> to vector<16x512xf32>
    %111 = arith.mulf %82, %110 : vector<16x512xf32>
    %112 = vector.broadcast %108 : vector<1x512xf32> to vector<16x512xf32>
    %113 = arith.addf %111, %112 : vector<16x512xf32>
    %cst_78 = arith.constant 0.000000e+00 : f32
    %114 = vector.broadcast %cst_78 : f32 to vector<16x512xf32>
    %115 = arith.maximumf %113, %114 : vector<16x512xf32>
    %c0_79 = arith.constant 0 : index
    %c0_80 = arith.constant 0 : index
    %c0_81 = arith.constant 0 : index
    %116 = vector.load %arg10[%c0_79, %c0_80, %c0_81] : memref<1x16x512xf32, #tpu.memory_space<vmem>>, vector<1x16x512xf32>
    %117 = vector.shape_cast %116 : vector<1x16x512xf32> to vector<16x512xf32>
    %118 = vector.shape_cast %115 : vector<16x512xf32> to vector<1x16x512xf32>
    tpu.vector_store %arg10[%c0_79, %c0_80, %c0_81], %118 {strides = array<i32>} : memref<1x16x512xf32, #tpu.memory_space<vmem>>, vector<1x16x512xf32>,
    return
  }
  func.func @transform_0(%arg0: i32) -> (i32, i32, i32) {
    %c0_i32 = arith.constant 0 : i32
    %c0_i32_0 = arith.constant 0 : i32
    %c0_i32_1 = arith.constant 0 : i32
    return %arg0, %c0_i32, %c0_i32_0 : i32, i32, i32
  }
  func.func @transform_1(%arg0: i32) -> (i32, i32, i32) {
    %c0_i32 = arith.constant 0 : i32
    %c0_i32_0 = arith.constant 0 : i32
    %c0_i32_1 = arith.constant 0 : i32
    %c0_i32_2 = arith.constant 0 : i32
    return %c0_i32, %c0_i32_0, %c0_i32_1 : i32, i32, i32
  }
  func.func @transform_2(%arg0: i32) -> (i32, i32) {
    %c0_i32 = arith.constant 0 : i32
    %c0_i32_0 = arith.constant 0 : i32
    %c0_i32_1 = arith.constant 0 : i32
    return %c0_i32, %c0_i32_0 : i32, i32
  }
  func.func @transform_3(%arg0: i32) -> (i32, i32) {
    %c0_i32 = arith.constant 0 : i32
    %c0_i32_0 = arith.constant 0 : i32
    %c0_i32_1 = arith.constant 0 : i32
    return %c0_i32, %c0_i32_0 : i32, i32
  }
  func.func @transform_4(%arg0: i32) -> (i32, i32) {
    %c0_i32 = arith.constant 0 : i32
    %c0_i32_0 = arith.constant 0 : i32
    %c0_i32_1 = arith.constant 0 : i32
    return %c0_i32, %c0_i32_0 : i32, i32
  }
  func.func @transform_5(%arg0: i32) -> (i32, i32, i32) {
    %c0_i32 = arith.constant 0 : i32
    %c0_i32_0 = arith.constant 0 : i32
    %c0_i32_1 = arith.constant 0 : i32
    %c0_i32_2 = arith.constant 0 : i32
    return %c0_i32, %c0_i32_0, %c0_i32_1 : i32, i32, i32
  }
  func.func @transform_6(%arg0: i32) -> (i32, i32) {
    %c0_i32 = arith.constant 0 : i32
    %c0_i32_0 = arith.constant 0 : i32
    %c0_i32_1 = arith.constant 0 : i32
    return %c0_i32, %c0_i32_0 : i32, i32
  }
  func.func @transform_7(%arg0: i32) -> (i32, i32) {
    %c0_i32 = arith.constant 0 : i32
    %c0_i32_0 = arith.constant 0 : i32
    %c0_i32_1 = arith.constant 0 : i32
    return %c0_i32, %c0_i32_0 : i32, i32
  }
  func.func @transform_8(%arg0: i32) -> (i32, i32) {
    %c0_i32 = arith.constant 0 : i32
    %c0_i32_0 = arith.constant 0 : i32
    %c0_i32_1 = arith.constant 0 : i32
    return %c0_i32, %c0_i32_0 : i32, i32
  }
  func.func @transform_9(%arg0: i32) -> (i32, i32, i32) {
    %c0_i32 = arith.constant 0 : i32
    %c0_i32_0 = arith.constant 0 : i32
    %c0_i32_1 = arith.constant 0 : i32
    return %arg0, %c0_i32, %c0_i32_0 : i32, i32, i32
  }
}

</mosaic_0001>

<bundles_post_ra>
// kernel: tile.33
= control target key start
LH: loop header
LB: loop body
LE: loop exit
PB: predicated region body
PF: predicated region fallthrough
CT: control target
= control target key end

     0   :  { %s28_s0 = inlined_call_operand.vmem [shape: f32[32], index: 0, kind: input, shape index: {}]   ;;  %s29_s1 = inlined_call_operand.vmem [shape: f32[16,32], index: 1, kind: output, shape index: {}]  }
   0x1   :  { %v4_v0 = vld [vmem:[%s28_s0] ss:$0 sm:$0xff] }
   0x2   :  { %5 = vst [vmem:[%s29_s1] sm:$0xff] %v4_v0 }
   0x3   :  { %8 = vst [vmem:[%s29_s1 + $0x8] sm:$0xff] %v4_v0 }

// kernel: mul.13
= control target key start
LH: loop header
LB: loop body
LE: loop exit
PB: predicated region body
PF: predicated region fallthrough
CT: control target
= control target key end

     0   :  { %s35_s8 = smov 96   ;;  %s36_s11 = smov 32   ;;  %vm3_vm0 = vcmask 261120   ;;  %vm9_vm1 = vcmask 1048320   ;;  %vm15_vm2 = vcmask 785920   ;;  %vm21_vm3 = vcmask 523520   ;;  %s63_s0 = inlined_call_operand.vmem [shape: f32[16,32], index: 0, kind: input, shape index: {}]   ;;  %s64_s1 = inlined_call_operand.vmem [shape: f32[512], index: 1, kind: output, shape index: {}]  }
   0x1   :  { %v29_v0 = vld [vmem:[%s63_s0 + $0x3] ss:$4 sm:$0xf]   ;;  %v31_v1 = vld [vmem:[%s63_s0 + $0x1] ss:$4 sm:$0xf]  }
   0x2   :  { %7 = vrot.lane.b32.xlu0 %v29_v0, %s35_s8  ;;  %19 = vrot.lane.b32.xlu1 %v31_v1, %s36_s11  ;;  %v30_v2 = vld [vmem:[%s63_s0 + $0x2] ss:$4 sm:$0xf]   ;;  %s37_s14 = smov 64  }
   0x3   :  { %v2_v3 = vld [vmem:[%s63_s0] ss:$4 sm:$0xf]  }
   0x4   :  { %4 = vst.msk [vmem:[#allocation0] sm:$0xf] %vm3_vm0, %v2_v3  }
   0xa   :  { %13 = vrot.lane.b32.xlu0 %v30_v2, %s37_s14 }
  0x74   :  { %v8_v4 = vpop.permute.xlu0 %7   ;;  %v20_v5 = vpop.permute.xlu1 %19  }
  0x75   :  { %10 = vst.msk [vmem:[#allocation0] sm:$0xf] %vm9_vm1, %v8_v4  }
  0x7c   :  { %v14_v6 = vpop.permute.xlu0 %13  }
  0x7d   :  { %16 = vst.msk [vmem:[#allocation0] sm:$0xf] %vm15_vm2, %v14_v6  }
  0x7e   :  { %22 = vst.msk [vmem:[#allocation0] sm:$0xf] %vm21_vm3, %v20_v5  }
  0x85   :  { %v25_v7 = vld [vmem:[#allocation0] sm:$0xf] }
  0x86   :  { %28 = vst [vmem:[%s64_s1] sm:$0xf] %v25_v7 }

// kernel: tile.29
= control target key start
LH: loop header
LB: loop body
LE: loop exit
PB: predicated region body
PF: predicated region fallthrough
CT: control target
= control target key end

     0   :  { %s56_s8 = smov 96   ;;  %s57_s11 = smov 32   ;;  %vm3_vm0 = vcmask 261120   ;;  %vm9_vm1 = vcmask 1048320   ;;  %vm15_vm2 = vcmask 785920   ;;  %vm21_vm3 = vcmask 523520   ;;  %s93_s0 = inlined_call_operand.vmem [shape: f32[16,32], index: 0, kind: input, shape index: {}]   ;;  %s94_s1 = inlined_call_operand.vmem [shape: f32[1,512], index: 1, kind: output, shape index: {}]  }
   0x1   :  { %v47_v0 = vld [vmem:[%s93_s0 + $0x3] ss:$4 sm:$0xf]   ;;  %v49_v1 = vld [vmem:[%s93_s0 + $0x1] ss:$4 sm:$0xf]  }
   0x2   :  { %7 = vrot.lane.b32.xlu0 %v47_v0, %s56_s8  ;;  %19 = vrot.lane.b32.xlu1 %v49_v1, %s57_s11  ;;  %v48_v2 = vld [vmem:[%s93_s0 + $0x2] ss:$4 sm:$0xf]   ;;  %s58_s14 = smov 64  }
   0x3   :  { %v2_v3 = vld [vmem:[%s93_s0] ss:$4 sm:$0xf]  }
   0x4   :  { %4 = vst.msk [vmem:[#allocation0] ss:$8 sm:$0xf] %vm3_vm0, %v2_v3  }
   0xa   :  { %13 = vrot.lane.b32.xlu0 %v48_v2, %s58_s14 }
  0x74   :  { %v8_v4 = vpop.permute.xlu0 %7   ;;  %v20_v5 = vpop.permute.xlu1 %19  }
  0x75   :  { %10 = vst.msk [vmem:[#allocation0] ss:$8 sm:$0xf] %vm9_vm1, %v8_v4  }
  0x7c   :  { %v14_v6 = vpop.permute.xlu0 %13  }
  0x7d   :  { %16 = vst.msk [vmem:[#allocation0] ss:$8 sm:$0xf] %vm15_vm2, %v14_v6  }
  0x7e   :  { %22 = vst.msk [vmem:[#allocation0] ss:$8 sm:$0xf] %vm21_vm3, %v20_v5  }
  0x85   :  { %v25_v7 = vld [vmem:[#allocation0] sm:$0x1]  ;;  %v30_v8 = vld [vmem:[#allocation0 + $0x8] sm:$0x1]  ;;  %v36_v9 = vld [vmem:[#allocation0 + $0x10] sm:$0x1] }
  0x86   :  { %28 = vst [vmem:[%s94_s1] sm:$0x1] %v25_v7  ;;  %v42_v10 = vld [vmem:[#allocation0 + $0x18] sm:$0x1] }
  0x87   :  { %50 = vst [vmem:[%s94_s1 + $0x1] sm:$0x1] %v30_v8 }
  0x88   :  { %51 = vst [vmem:[%s94_s1 + $0x2] sm:$0x1] %v36_v9 }
  0x89   :  { %52 = vst [vmem:[%s94_s1 + $0x3] sm:$0x1] %v42_v10 }

// kernel: double_conv_pallas.1
= control target key start
LH: loop header
LB: loop body
LE: loop exit
PB: predicated region body
PF: predicated region fallthrough
CT: control target
= control target key end

     0   :  { %s8231_s30 = smov 0   ;;  %s12068_s0 = inlined_call_operand.vmem [shape: f32[2,16,64], index: 0, kind: input, shape index: {}]   ;;  %s12069_s1 = inlined_call_operand.vmem [shape: bf16[3,72,512], index: 1, kind: input, shape index: {}]   ;;  %s12070_s2 = inlined_call_operand.vmem [shape: f32[512,16], index: 2, kind: input, shape index: {}, may-alias: {2,6}]   ;;  %s12071_s3 = inlined_call_operand.vmem [shape: f32[16,512], index: 3, kind: input, shape index: {}]   ;;  %s12072_s4 = inlined_call_operand.vmem [shape: f32[1,512], index: 4, kind: input, shape index: {}]   ;;  %s12073_s5 = inlined_call_operand.vmem [shape: bf16[3,576,512], index: 5, kind: input, shape index: {}]   ;;  %s12074_s6 = inlined_call_operand.vmem [shape: f32[512,16], index: 6, kind: input, shape index: {}, may-alias: {2,6}]   ;;  %s12075_s7 = inlined_call_operand.vmem [shape: f32[16,512], index: 7, kind: input, shape index: {}]   ;;  %s12076_s8 = inlined_call_operand.vmem [shape: f32[1,512], index: 8, kind: input, shape index: {}]   ;;  %s12077_s9 = inlined_call_operand.vmem [shape: f32[2,16,512], index: 9, kind: output, shape index: {}]  }
   0x1 LB: > { %s5380_s10 = sadd.s32 4294967295, %s8178_s30   ;;  %p5384_p0 = scmp.ge.s32.totalorder %s8178_s30, 1  ;;  %s8178_s30 = sphi %s8231_s30, %s19_s30  }
   0x2   : > { %p287_p1 = scmp.lt.s32.totalorder %s8178_s30, 3 }
   0x4   : > { %p288_p2 = pnand %p5384_p0, %p287_p1 }
   0x5   : > { %p8281_p3 = scmp.lt.s32.totalorder (!%p288_p2), %s5380_s10, 1 }
   0x6   : > { %291 = sbr.rel (%p288_p2) target bundleno = 1454 (0x5ae), region = 56 }
   0xb   : > { %v5405_v0 = vld [vmem:[%s12069_s1 + $0x110] sm:$0xff]  ;;  %v5406_v1 = vld [vmem:[%s12069_s1 + $0x118] sm:$0xff]  ;;  %vm480_vm0 = vcmask 1043456   ;;  %v7699_v7 = vld [vmem:[%s12069_s1 + $0xfc] sm:$0xf0]  ;;  %s12082_s10 = smov (!%p8281_p3, %s5380_s10), 1 }
   0xc   : > { %v437_v2 = vunpack.c.l.b16 %v5405_v0  ;;  %v438_v3 = vunpack.c.h.b16 %v5405_v0  ;;  %v439_v4 = vunpack.c.l.b16 %v5406_v1  ;;  %v440_v5 = vunpack.c.h.b16 %v5406_v1  ;;  %v5457_v6 = vld [vmem:[%s12069_s1 + $0xf0] sm:$0xf]  ;;  %v7697_v12 = vld [vmem:[%s12069_s1 + $0xf4] sm:$0xf]  ;;  %v5459_v13 = vld [vmem:[%s12069_s1 + $0x100] sm:$0xf0] }
   0xd   : > { %v5465_v14 = vld [vmem:[%s12069_s1 + $0xf8] sm:$0xf]  ;;  %v7700_v15 = vld [vmem:[%s12069_s1 + $0x104] sm:$0xf0]  ;;  %v7698_v16 = vld [vmem:[%s12069_s1 + $0xfc] sm:$0xf]  ;;  %v5458_v22 = vor.u32 %v7699_v7, %v5457_v6  ;;  %v5462_v23 = vor.u32 %v7697_v12, %v5459_v13 }
   0xe   : > { %v457_v8 = vpack.c.b16 %v437_v2, %v437_v2  ;;  %v458_v9 = vpack.c.b16 %v438_v3, %v438_v3  ;;  %v459_v10 = vpack.c.b16 %v439_v4, %v439_v4  ;;  %v460_v11 = vpack.c.b16 %v440_v5, %v440_v5  ;;  %v5467_v17 = vld [vmem:[%s12069_s1 + $0x108] sm:$0xf0]  ;;  %v5441_v24 = vld [vmem:[%s12069_s1 + $0xd0] sm:$0xf]  ;;  %v7695_v25 = vld [vmem:[%s12069_s1 + $0xdc] sm:$0xf0] }
   0xf   : > { %v5466_v26 = vor.u32 %v7700_v15, %v5465_v14  ;;  %v5470_v27 = vor.u32 %v7698_v16, %v5467_v17  ;;  %v7693_v28 = vld [vmem:[%s12069_s1 + $0xd4] sm:$0xf]  ;;  %v5443_v29 = vld [vmem:[%s12069_s1 + $0xe0] sm:$0xf0]  ;;  %v5449_v30 = vld [vmem:[%s12069_s1 + $0xd8] sm:$0xf]  ;;  %v5442_v36 = vor.u32 %v7695_v25, %v5441_v24 }
  0x10   : > { %v482_v18 = vsel %vm480_vm0, %v457_v8, 0  ;;  %v485_v19 = vsel %vm480_vm0, %v458_v9, 0  ;;  %v488_v20 = vsel %vm480_vm0, %v459_v10, 0  ;;  %v491_v21 = vsel %vm480_vm0, %v460_v11, 0  ;;  %v7696_v31 = vld [vmem:[%s12069_s1 + $0xe4] sm:$0xf0] }
  0x11   : > { %496 = vmatpush.bf16.msra.mxu0 %v482_v18  ;;  %510 = vmatpush.bf16.msra.mxu1 %v485_v19  ;;  %v7694_v32 = vld [vmem:[%s12069_s1 + $0xdc] sm:$0xf]  ;;  %v5451_v33 = vld [vmem:[%s12069_s1 + $0xe8] sm:$0xf0]  ;;  %v5425_v34 = vld [vmem:[%s12069_s1 + $0xb0] sm:$0xf]  ;;  %v5446_v37 = vor.u32 %v7693_v28, %v5443_v29  ;;  %v5450_v41 = vor.u32 %v7696_v31, %v5449_v30 }
  0x12   : > { %524 = vmatpush.bf16.msra.mxu2 %v488_v20  ;;  %538 = vmatpush.bf16.msra.mxu3 %v491_v21  ;;  %v7691_v35 = vld [vmem:[%s12069_s1 + $0xbc] sm:$0xf0]  ;;  %v7689_v38 = vld [vmem:[%s12069_s1 + $0xb4] sm:$0xf]  ;;  %v5427_v39 = vld [vmem:[%s12069_s1 + $0xc0] sm:$0xf0]  ;;  %v5454_v42 = vor.u32 %v7694_v32, %v5451_v33 }
  0x13   : > { %v5433_v40 = vld [vmem:[%s12069_s1 + $0xb8] sm:$0xf]  ;;  %v7692_v43 = vld [vmem:[%s12069_s1 + $0xc4] sm:$0xf0]  ;;  %v7690_v44 = vld [vmem:[%s12069_s1 + $0xbc] sm:$0xf]  ;;  %v5426_v50 = vor.u32 %v7691_v35, %v5425_v34  ;;  %v5430_v51 = vor.u32 %v7689_v38, %v5427_v39 }
  0x14   : > { %v5435_v45 = vld [vmem:[%s12069_s1 + $0xc8] sm:$0xf0]  ;;  %v5409_v46 = vld [vmem:[%s12069_s1 + $0x90] sm:$0xf]  ;;  %v7687_v47 = vld [vmem:[%s12069_s1 + $0x9c] sm:$0xf0]  ;;  %v5434_v60 = vor.u32 %v7692_v43, %v5433_v40 }
  0x15   : > { %497 = vmatpush.bf16.msra.mxu0 %v5458_v22  ;;  %511 = vmatpush.bf16.msra.mxu1 %v5462_v23  ;;  %v363_v48 = vld [vmem:[%s12069_s1 + $0x80] sm:$0xff]  ;;  %v364_v49 = vld [vmem:[%s12069_s1 + $0x88] sm:$0xff]  ;;  %vm334_vm1 = vcmask 588800   ;;  %v7685_v52 = vld [vmem:[%s12069_s1 + $0x94] sm:$0xf]  ;;  %v8180_v56 = vmov 0.0   ;;  %v5438_v61 = vor.u32 %v7690_v44, %v5435_v45  ;;  %v5410_v3 = vor.u32 %v7687_v47, %v5409_v46 }
  0x16   : > { %525 = vmatpush.bf16.msra.mxu2 %v5466_v26  ;;  %539 = vmatpush.bf16.msra.mxu3 %v5470_v27  ;;  %v5411_v53 = vld [vmem:[%s12069_s1 + $0xa0] sm:$0xf0]  ;;  %v599_v54 = vunpack.c.l.b16 %v363_v48  ;;  %v600_v55 = vunpack.c.h.b16 %v363_v48  ;;  %335 = vst.msk [vmem:[#allocation2] sm:$0xff] %vm334_vm1, %v8180_v56  ;;  %v5417_v57 = vld [vmem:[%s12069_s1 + $0x98] sm:$0xf]  ;;  %v601_v58 = vunpack.c.l.b16 %v364_v49  ;;  %v602_v59 = vunpack.c.h.b16 %v364_v49  ;;  %s7667_s22 = sshll.u32 %s12082_s10, 4 }
  0x17   : > { %336 = vst.msk [vmem:[#allocation2 + $0x8] sm:$0xff] %vm334_vm1, %v8180_v56  ;;  %vm337_vm2 = vcmask 582656   ;;  %vm341_vm3 = vcmask 523264   ;;  %v7688_v62 = vld [vmem:[%s12069_s1 + $0xa4] sm:$0xf0]  ;;  %s327_s29 = scalar_lea.vmem %s12068_s0, %s7667_s22  ;;  %v5414_v6 = vor.u32 %v7685_v52, %v5411_v53  ;;  %v5559_v30 = vld [vmem:[%s12069_s1 + $0x1a0] sm:$0xff] }
  0x18   : > { %v7686_v63 = vld [vmem:[%s12069_s1 + $0x9c] sm:$0xf]  ;;  %338 = vst.msk [vmem:[#allocation2 + $0x10] sm:$0x3] %vm337_vm2, %v8180_v56  ;;  %v5419_v0 = vld [vmem:[%s12069_s1 + $0xa8] sm:$0xf0]  ;;  %v619_v4 = vpack.c.b16 %v599_v54, %v599_v54  ;;  %v620_v5 = vpack.c.b16 %v600_v55, %v600_v55  ;;  %v621_v7 = vpack.c.b16 %v601_v58, %v601_v58  ;;  %v622_v8 = vpack.c.b16 %v602_v59, %v602_v59 }
  0x19   : > { %498 = vmatpush.bf16.msra.mxu0 %v5442_v36  ;;  %512 = vmatpush.bf16.msra.mxu1 %v5446_v37  ;;  %v339_v1 = vld [vmem:[%s327_s29] sm:$0xff]  ;;  %v340_v2 = vld [vmem:[%s327_s29 + $0x8] sm:$0xff]  ;;  %1291 = vst.msk [vmem:[#allocation3 + $0x48] sm:$0xff] %vm341_vm3, %v8180_v56  ;;  %v5418_v9 = vor.u32 %v7688_v62, %v5417_v57  ;;  %v5422_v10 = vor.u32 %v7686_v63, %v5419_v0  ;;  %v7683_v16 = vld [vmem:[%s12069_s1 + $0x6c] sm:$0xf0]  ;;  %v782_v44 = vunpack.c.l.b16 %v5559_v30  ;;  %vm965_vm4 = vcmask 1040384  }
  0x1a   : > { %526 = vmatpush.bf16.msra.mxu2 %v5450_v41  ;;  %540 = vmatpush.bf16.msra.mxu3 %v5454_v42  ;;  %342 = vst.msk [vmem:[#allocation2 + $0x1] sm:$0xff] %vm341_vm3, %v339_v1  ;;  %v643_v11 = vsel %vm480_vm0, %v619_v4, 0  ;;  %v646_v12 = vsel %vm480_vm0, %v620_v5, 0  ;;  %v5525_v13 = vld [vmem:[%s12069_s1 + $0x60] sm:$0xf]  ;;  %v649_v14 = vsel %vm480_vm0, %v621_v7, 0 }
  0x1b   : > { %343 = vst.msk [vmem:[#allocation2 + $0x9] sm:$0xff] %vm341_vm3, %v340_v2  ;;  %v652_v15 = vsel %vm480_vm0, %v622_v8, 0  ;;  %v7681_v17 = vld [vmem:[%s12069_s1 + $0x64] sm:$0xf]  ;;  %v5527_v18 = vld [vmem:[%s12069_s1 + $0x70] sm:$0xf0]  ;;  %v5526_v26 = vor.u32 %v7683_v16, %v5525_v13 }
  0x1c   : > { %v5533_v19 = vld [vmem:[%s12069_s1 + $0x68] sm:$0xf]  ;;  %v7684_v20 = vld [vmem:[%s12069_s1 + $0x74] sm:$0xf0]  ;;  %v7682_v22 = vld [vmem:[%s12069_s1 + $0x6c] sm:$0xf]  ;;  %v5530_v27 = vor.u32 %v7681_v17, %v5527_v18 }
  0x1d   : > { %499 = vmatpush.bf16.msra.mxu0 %v5426_v50  ;;  %513 = vmatpush.bf16.msra.mxu1 %v5430_v51  ;;  %v5535_v23 = vld [vmem:[%s12069_s1 + $0x78] sm:$0xf0]  ;;  %v5509_v28 = vld [vmem:[%s12069_s1 + $0x40] sm:$0xf]  ;;  %v7679_v29 = vld [vmem:[%s12069_s1 + $0x4c] sm:$0xf0]  ;;  %v5534_v31 = vor.u32 %v7684_v20, %v5533_v19  ;;  %v783_v50 = vunpack.c.h.b16 %v5559_v30 }
  0x1e   : > { %527 = vmatpush.bf16.msra.mxu2 %v5434_v60  ;;  %541 = vmatpush.bf16.msra.mxu3 %v5438_v61  ;;  %v5538_v32 = vor.u32 %v7682_v22, %v5535_v23  ;;  %v7677_v33 = vld [vmem:[%s12069_s1 + $0x44] sm:$0xf]  ;;  %v5511_v34 = vld [vmem:[%s12069_s1 + $0x50] sm:$0xf0]  ;;  %v5517_v35 = vld [vmem:[%s12069_s1 + $0x48] sm:$0xf]  ;;  %v5510_v40 = vor.u32 %v7679_v29, %v5509_v28  ;;  %v802_v61 = vpack.c.b16 %v782_v44, %v782_v44 }
  0x1f   : > { %v7680_v36 = vld [vmem:[%s12069_s1 + $0x54] sm:$0xf0]  ;;  %v7678_v37 = vld [vmem:[%s12069_s1 + $0x4c] sm:$0xf]  ;;  %v5519_v38 = vld [vmem:[%s12069_s1 + $0x58] sm:$0xf0]  ;;  %v5514_v41 = vor.u32 %v7677_v33, %v5511_v34 }
  0x20   : > { %v5560_v39 = vld [vmem:[%s12069_s1 + $0x1a8] sm:$0xff]  ;;  %v5493_v42 = vld [vmem:[%s12069_s1 + $0x20] sm:$0xf]  ;;  %v7675_v43 = vld [vmem:[%s12069_s1 + $0x2c] sm:$0xf0]  ;;  %v5518_v45 = vor.u32 %v7680_v36, %v5517_v35  ;;  %v5522_v46 = vor.u32 %v7678_v37, %v5519_v38  ;;  %v826_v13 = vsel %vm480_vm0, %v802_v61, 0 }
  0x21   : > { %500 = vmatpush.bf16.msra.mxu0 %v5410_v3  ;;  %514 = vmatpush.bf16.msra.mxu1 %v5414_v6  ;;  %v365_v21 = vld [vmem:[#allocation2 + $0x1] sm:$0xff]  ;;  %v7673_v47 = vld [vmem:[%s12069_s1 + $0x24] sm:$0xf]  ;;  %v5495_v48 = vld [vmem:[%s12069_s1 + $0x30] sm:$0xf0]  ;;  %v784_v54 = vunpack.c.l.b16 %v5560_v39  ;;  %v785_v55 = vunpack.c.h.b16 %v5560_v39  ;;  %v5494_v57 = vor.u32 %v7675_v43, %v5493_v42  ;;  %v803_v3 = vpack.c.b16 %v783_v50, %v783_v50  ;;  %s7668_s19 = sshll.u32 %s12082_s10, 6 }
  0x22   : > { %528 = vmatpush.bf16.msra.mxu2 %v5418_v9  ;;  %542 = vmatpush.bf16.msra.mxu3 %v5422_v10  ;;  %v366_v24 = vld [vmem:[#allocation2 + $0x9] sm:$0xff]  ;;  %v5501_v49 = vld [vmem:[%s12069_s1 + $0x28] sm:$0xf]  ;;  %v7674_v52 = vld [vmem:[%s12069_s1 + $0x2c] sm:$0xf]  ;;  %v5498_v58 = vor.u32 %v7673_v47, %v5495_v48  ;;  %vm1147_vm8 = vcmask 130048   ;;  %s332_s21 = scalar_lea.vmem %s12077_s9, %s7668_s19 }
  0x23   : > { %v367_v25 = vpack.c.bf16 %v366_v24, %v365_v21  ;;  %v7676_v51 = vld [vmem:[%s12069_s1 + $0x34] sm:$0xf0]  ;;  %v5503_v53 = vld [vmem:[%s12069_s1 + $0x38] sm:$0xf0]  ;;  %v5477_v59 = vld [vmem:[%s12069_s1] sm:$0xf]  ;;  %v804_v7 = vpack.c.b16 %v784_v54, %v784_v54  ;;  %v805_v8 = vpack.c.b16 %v785_v55, %v785_v55 }
  0x24   : > { %v7671_v60 = vld [vmem:[%s12069_s1 + $0xc] sm:$0xf0]  ;;  %v5502_v62 = vor.u32 %v7676_v51, %v5501_v49  ;;  %v5506_v63 = vor.u32 %v7674_v52, %v5503_v53  ;;  %v7669_v0 = vld [vmem:[%s12069_s1 + $0x4] sm:$0xf]  ;;  %v5479_v1 = vld [vmem:[%s12069_s1 + $0x10] sm:$0xf0] }
  0x25   : > { %657 = vmatpush.bf16.msrb.mxu0 %v643_v11  ;;  %671 = vmatpush.bf16.msrb.mxu1 %v646_v12  ;;  %v5485_v2 = vld [vmem:[%s12069_s1 + $0x8] sm:$0xf]  ;;  %v7672_v4 = vld [vmem:[%s12069_s1 + $0x14] sm:$0xf0]  ;;  %v7670_v5 = vld [vmem:[%s12069_s1 + $0xc] sm:$0xf]  ;;  %v5478_v9 = vor.u32 %v7671_v60, %v5477_v59  ;;  %v5482_v10 = vor.u32 %v7669_v0, %v5479_v1 }
  0x26   : > { %685 = vmatpush.bf16.msrb.mxu2 %v649_v14  ;;  %699 = vmatpush.bf16.msrb.mxu3 %v652_v15  ;;  %v5487_v6 = vld [vmem:[%s12069_s1 + $0x18] sm:$0xf0]  ;;  %v5486_v11 = vor.u32 %v7672_v4, %v5485_v2  ;;  %v829_v14 = vsel %vm480_vm0, %v803_v3, 0  ;;  %v344_v15 = vld [vmem:[#allocation2] sm:$0xff]  ;;  %v345_v16 = vld [vmem:[#allocation2 + $0x8] sm:$0xff]  ;;  %v832_v17 = vsel %vm480_vm0, %v804_v7, 0 }
  0x27   : > { %5473 = vmatmul.msk.bf16.vlgmr.msra.gmra.mxu2 %vm334_vm1, %v367_v25  ;;  %5474 = vmatmul.msk.bf16.vlgmr.msra.gmra.mxu3 %vm334_vm1, %v367_v25  ;;  %v5490_v12 = vor.u32 %v7670_v5, %v5487_v6  ;;  %v835_v18 = vsel %vm480_vm0, %v805_v8, 0  ;;  %v5611_v19 = vld [vmem:[%s12069_s1 + $0x180] sm:$0xf]  ;;  %v7715_v20 = vld [vmem:[%s12069_s1 + $0x18c] sm:$0xf0]  ;;  %v346_v24 = vpack.c.bf16 %v345_v16, %v344_v15  ;;  %v985_v8 = vld [vmem:[%s12070_s2 + $0x78] sm:$0xff] }
  0x28   : > { %5471 = vmatmul.msk.bf16.vlgmr.msra.gmra.mxu0 %vm334_vm1, %v367_v25  ;;  %5472 = vmatmul.msk.bf16.vlgmr.msra.gmra.mxu1 %vm334_vm1, %v367_v25  ;;  %v7713_v21 = vld [vmem:[%s12069_s1 + $0x184] sm:$0xf]  ;;  %v5613_v22 = vld [vmem:[%s12069_s1 + $0x190] sm:$0xf0]  ;;  %v5619_v23 = vld [vmem:[%s12069_s1 + $0x188] sm:$0xf]  ;;  %v5612_v28 = vor.u32 %v7715_v20, %v5611_v19 }
  0x29   : > { %658 = vmatpush.bf16.msrb.mxu0 %v5526_v26  ;;  %672 = vmatpush.bf16.msrb.mxu1 %v5530_v27  ;;  %v7716_v25 = vld [vmem:[%s12069_s1 + $0x194] sm:$0xf0]  ;;  %v7714_v26 = vld [vmem:[%s12069_s1 + $0x18c] sm:$0xf]  ;;  %v5621_v27 = vld [vmem:[%s12069_s1 + $0x198] sm:$0xf0]  ;;  %v5616_v29 = vor.u32 %v7713_v21, %v5613_v22 }
  0x2a   : > { %686 = vmatpush.bf16.msrb.mxu2 %v5534_v31  ;;  %700 = vmatpush.bf16.msrb.mxu3 %v5538_v32  ;;  %v5595_v30 = vld [vmem:[%s12069_s1 + $0x160] sm:$0xf]  ;;  %v7711_v31 = vld [vmem:[%s12069_s1 + $0x16c] sm:$0xf0]  ;;  %v5620_v32 = vor.u32 %v7716_v25, %v5619_v23  ;;  %v5624_v33 = vor.u32 %v7714_v26, %v5621_v27  ;;  %v7709_v34 = vld [vmem:[%s12069_s1 + $0x164] sm:$0xf] }
  0x2b   : > { %v5597_v35 = vld [vmem:[%s12069_s1 + $0x170] sm:$0xf0]  ;;  %v5603_v36 = vld [vmem:[%s12069_s1 + $0x168] sm:$0xf]  ;;  %v7712_v37 = vld [vmem:[%s12069_s1 + $0x174] sm:$0xf0] }
  0x2c   : > { %v7710_v38 = vld [vmem:[%s12069_s1 + $0x16c] sm:$0xf]  ;;  %v5605_v39 = vld [vmem:[%s12069_s1 + $0x178] sm:$0xf0]  ;;  %v5579_v42 = vld [vmem:[%s12069_s1 + $0x140] sm:$0xf]  ;;  %v5604_v44 = vor.u32 %v7712_v37, %v5603_v36 }
  0x2d   : > { %659 = vmatpush.bf16.msrb.mxu0 %v5510_v40  ;;  %673 = vmatpush.bf16.msrb.mxu1 %v5514_v41  ;;  %v5596_v40 = vor.u32 %v7711_v31, %v5595_v30  ;;  %v5600_v41 = vor.u32 %v7709_v34, %v5597_v35  ;;  %v7707_v43 = vld [vmem:[%s12069_s1 + $0x14c] sm:$0xf0]  ;;  %v5581_v47 = vld [vmem:[%s12069_s1 + $0x150] sm:$0xf0]  ;;  %v5587_v48 = vld [vmem:[%s12069_s1 + $0x148] sm:$0xf] }
  0x2e   : > { %687 = vmatpush.bf16.msrb.mxu2 %v5518_v45  ;;  %701 = vmatpush.bf16.msrb.mxu3 %v5522_v46  ;;  %v5608_v45 = vor.u32 %v7710_v38, %v5605_v39  ;;  %v7705_v46 = vld [vmem:[%s12069_s1 + $0x144] sm:$0xf]  ;;  %v7708_v49 = vld [vmem:[%s12069_s1 + $0x154] sm:$0xf0]  ;;  %v7706_v50 = vld [vmem:[%s12069_s1 + $0x14c] sm:$0xf]  ;;  %v5580_v52 = vor.u32 %v7707_v43, %v5579_v42 }
  0x2f   : > { %v5589_v51 = vld [vmem:[%s12069_s1 + $0x158] sm:$0xf0]  ;;  %v5584_v53 = vor.u32 %v7705_v46, %v5581_v47  ;;  %v5563_v54 = vld [vmem:[%s12069_s1 + $0x120] sm:$0xf]  ;;  %v7703_v55 = vld [vmem:[%s12069_s1 + $0x12c] sm:$0xf0] }
  0x30   : > { %v7701_v59 = vld [vmem:[%s12069_s1 + $0x124] sm:$0xf]  ;;  %v5565_v60 = vld [vmem:[%s12069_s1 + $0x130] sm:$0xf0]  ;;  %v5571_v61 = vld [vmem:[%s12069_s1 + $0x128] sm:$0xf]  ;;  %v5564_v1 = vor.u32 %v7703_v55, %v5563_v54 }
  0x31   : > { %660 = vmatpush.bf16.msrb.mxu0 %v5494_v57  ;;  %674 = vmatpush.bf16.msrb.mxu1 %v5498_v58  ;;  %v5588_v57 = vor.u32 %v7708_v49, %v5587_v48  ;;  %v5592_v58 = vor.u32 %v7706_v50, %v5589_v51  ;;  %v5573_v0 = vld [vmem:[%s12069_s1 + $0x138] sm:$0xf0]  ;;  %v5568_v2 = vor.u32 %v7701_v59, %v5565_v60  ;;  %v710_v3 = vld [vmem:[#allocation2 + $0x2] sm:$0xff]  ;;  %v711_v4 = vld [vmem:[#allocation2 + $0xa] sm:$0xff]  ;;  %vm1662_vm9 = vsmask.f32 7424 }
  0x32   : > { %688 = vmatpush.bf16.msrb.mxu2 %v5502_v62  ;;  %702 = vmatpush.bf16.msrb.mxu3 %v5506_v63  ;;  %v7704_v62 = vld [vmem:[%s12069_s1 + $0x134] sm:$0xf0]  ;;  %v7702_v63 = vld [vmem:[%s12069_s1 + $0x12c] sm:$0xf]  ;;  %v712_v7 = vpack.c.bf16 %v711_v4, %v710_v3  ;;  %v998_v19 = vld [vmem:[%s12070_s2 + $0xe0] sm:$0xff]  ;;  %vm1292_vm11 = vcmask 517120  }
  0x33   : > { %v5572_v5 = vor.u32 %v7704_v62, %v5571_v61  ;;  %v5576_v6 = vor.u32 %v7702_v63, %v5573_v0  ;;  %v999_v15 = vld [vmem:[%s12070_s2 + $0xe8] sm:$0xff]  ;;  %v1017_v20 = vld [vmem:[%s12070_s2 + $0x178] sm:$0xff]  ;;  %v1032_v25 = vld [vmem:[%s12070_s2 + $0x1f0] sm:$0xff]  ;;  %vm3908_vm12 = vcmask 1046528  }
  0x34   : > { %v1033_v21 = vld [vmem:[%s12070_s2 + $0x1f8] sm:$0xff]  ;;  %v1015_v30 = vld [vmem:[%s12070_s2 + $0x168] sm:$0xff]  ;;  %v1014_v34 = vld [vmem:[%s12070_s2 + $0x160] sm:$0xff] }
  0x35   : > { %661 = vmatpush.bf16.msrb.mxu0 %v5478_v9  ;;  %675 = vmatpush.bf16.msrb.mxu1 %v5482_v10  ;;  %v1001_v9 = vld [vmem:[%s12070_s2 + $0xf8] sm:$0xff]  ;;  %v1031_v31 = vld [vmem:[%s12070_s2 + $0x1e8] sm:$0xff]  ;;  %v1030_v35 = vld [vmem:[%s12070_s2 + $0x1e0] sm:$0xff] }
  0x36   : > { %689 = vmatpush.bf16.msrb.mxu2 %v5486_v11  ;;  %703 = vmatpush.bf16.msrb.mxu3 %v5490_v12  ;;  %v984_v12 = vld [vmem:[%s12070_s2 + $0x70] sm:$0xff]  ;;  %v981_v22 = vld [vmem:[%s12070_s2 + $0x58] sm:$0xff]  ;;  %v978_v36 = vld [vmem:[%s12070_s2 + $0x40] sm:$0xff] }
  0x37   : > { %v997_v23 = vld [vmem:[%s12070_s2 + $0xd8] sm:$0xff]  ;;  %v994_v37 = vld [vmem:[%s12070_s2 + $0xc0] sm:$0xff]  ;;  %v976_v48 = vld [vmem:[%s12070_s2 + $0x30] sm:$0xff] }
  0x38   : > { %5539 = vmatmul.msk.bf16.vlgmr.msrb.gmra.mxu0 %vm334_vm1, %v346_v24  ;;  %5540 = vmatmul.msk.bf16.vlgmr.msrb.gmra.mxu1 %vm334_vm1, %v346_v24  ;;  %v1013_v38 = vld [vmem:[%s12070_s2 + $0x158] sm:$0xff]  ;;  %v992_v49 = vld [vmem:[%s12070_s2 + $0xb0] sm:$0xff]  ;;  %v1011_v50 = vld [vmem:[%s12070_s2 + $0x148] sm:$0xff] }
  0x39   : > { %840 = vmatpush.bf16.msra.mxu0 %v826_v13  ;;  %854 = vmatpush.bf16.msra.mxu1 %v829_v14  ;;  %v1000_v13 = vld [vmem:[%s12070_s2 + $0xf0] sm:$0xff]  ;;  %v983_v14 = vld [vmem:[%s12070_s2 + $0x68] sm:$0xff]  ;;  %v977_v42 = vld [vmem:[%s12070_s2 + $0x38] sm:$0xff] }
  0x3a   : > { %868 = vmatpush.bf16.msra.mxu2 %v832_v17  ;;  %882 = vmatpush.bf16.msra.mxu3 %v835_v18  ;;  %v982_v18 = vld [vmem:[%s12070_s2 + $0x60] sm:$0xff]  ;;  %v993_v43 = vld [vmem:[%s12070_s2 + $0xb8] sm:$0xff]  ;;  %v1027_v51 = vld [vmem:[%s12070_s2 + $0x1c8] sm:$0xff] }
  0x3b   : > { %5541 = vmatmul.msk.bf16.vlgmr.msrb.gmra.mxu2 %vm334_vm1, %v346_v24  ;;  %5542 = vmatmul.msk.bf16.vlgmr.msrb.gmra.mxu3 %vm334_vm1, %v346_v24  ;;  %v1016_v24 = vld [vmem:[%s12070_s2 + $0x170] sm:$0xff]  ;;  %v1010_v54 = vld [vmem:[%s12070_s2 + $0x140] sm:$0xff]  ;;  %v1009_v59 = vld [vmem:[%s12070_s2 + $0x138] sm:$0xff] }
  0x3c   : > { %v1026_v55 = vld [vmem:[%s12070_s2 + $0x1c0] sm:$0xff]  ;;  %v1025_v60 = vld [vmem:[%s12070_s2 + $0x1b8] sm:$0xff]  ;;  %v1008_v63 = vld [vmem:[%s12070_s2 + $0x130] sm:$0xff] }
  0x3d   : > { %841 = vmatpush.bf16.msra.mxu0 %v5612_v28  ;;  %855 = vmatpush.bf16.msra.mxu1 %v5616_v29  ;;  %v980_v28 = vld [vmem:[%s12070_s2 + $0x50] sm:$0xff]  ;;  %v973_v61 = vld [vmem:[%s12070_s2 + $0x18] sm:$0xff] }
  0x3e   : > { %869 = vmatpush.bf16.msra.mxu2 %v5620_v32  ;;  %883 = vmatpush.bf16.msra.mxu3 %v5624_v33  ;;  %v996_v29 = vld [vmem:[%s12070_s2 + $0xd0] sm:$0xff]  ;;  %v979_v32 = vld [vmem:[%s12070_s2 + $0x48] sm:$0xff]  ;;  %v989_v62 = vld [vmem:[%s12070_s2 + $0x98] sm:$0xff] }
  0x3f   : > { %v995_v33 = vld [vmem:[%s12070_s2 + $0xc8] sm:$0xff] }
  0x41   : > { %842 = vmatpush.bf16.msra.mxu0 %v5596_v40  ;;  %856 = vmatpush.bf16.msra.mxu1 %v5600_v41  ;;  %v1029_v41 = vld [vmem:[%s12070_s2 + $0x1d8] sm:$0xff] }
  0x42   : > { %870 = vmatpush.bf16.msra.mxu2 %v5604_v44  ;;  %884 = vmatpush.bf16.msra.mxu3 %v5608_v45  ;;  %v1012_v44 = vld [vmem:[%s12070_s2 + $0x150] sm:$0xff] }
  0x43   : > { %v1028_v45 = vld [vmem:[%s12070_s2 + $0x1d0] sm:$0xff] }
  0x45   : > { %843 = vmatpush.bf16.msra.mxu0 %v5580_v52  ;;  %857 = vmatpush.bf16.msra.mxu1 %v5584_v53  ;;  %v975_v52 = vld [vmem:[%s12070_s2 + $0x28] sm:$0xff] }
  0x46   : > { %871 = vmatpush.bf16.msra.mxu2 %v5588_v57  ;;  %885 = vmatpush.bf16.msra.mxu3 %v5592_v58  ;;  %v991_v53 = vld [vmem:[%s12070_s2 + $0xa8] sm:$0xff]  ;;  %v974_v57 = vld [vmem:[%s12070_s2 + $0x20] sm:$0xff] }
  0x47   : > { %v990_v58 = vld [vmem:[%s12070_s2 + $0xa0] sm:$0xff] }
  0x49   : > { %844 = vmatpush.bf16.msra.mxu0 %v5564_v1  ;;  %858 = vmatpush.bf16.msra.mxu1 %v5568_v2  ;;  %v1024_v2 = vld [vmem:[%s12070_s2 + $0x1b0] sm:$0xff] }
  0x4a   : > { %872 = vmatpush.bf16.msra.mxu2 %v5572_v5  ;;  %886 = vmatpush.bf16.msra.mxu3 %v5576_v6  ;;  %v972_v5 = vld [vmem:[%s12070_s2 + $0x10] sm:$0xff] }
  0x4b   : > { %v988_v6 = vld [vmem:[%s12070_s2 + $0x90] sm:$0xff] }
  0x4c   : > { %5625 = vmatmul.msk.bf16.vlgmr.msra.gmra.mxu0 %vm334_vm1, %v712_v7  ;;  %5626 = vmatmul.msk.bf16.vlgmr.msra.gmra.mxu1 %vm334_vm1, %v712_v7 }
  0x4d   : > { %5627 = vmatmul.msk.bf16.vlgmr.msra.gmra.mxu2 %vm334_vm1, %v712_v7  ;;  %5628 = vmatmul.msk.bf16.vlgmr.msra.gmra.mxu3 %vm334_vm1, %v712_v7  ;;  %v1007_v7 = vld [vmem:[%s12070_s2 + $0x128] sm:$0xff] }
  0x4e   : > { %1034 = vmatpush.msrb.mxu0 %v985_v8  ;;  %1054 = vmatpush.msrb.mxu1 %v1001_v9  ;;  %v1023_v8 = vld [vmem:[%s12070_s2 + $0x1a8] sm:$0xff] }
  0x4f   : > { %1074 = vmatpush.msrb.mxu2 %v1017_v20  ;;  %1094 = vmatpush.msrb.mxu3 %v1033_v21  ;;  %v971_v9 = vld [vmem:[%s12070_s2 + $0x8] sm:$0xff]  ;;  %v1021_v20 = vld [vmem:[%s12070_s2 + $0x198] sm:$0xff]  ;;  %v1004_v21 = vld [vmem:[%s12070_s2 + $0x110] sm:$0xff] }
  0x50   : > { %1035 = vmatpush.msrb.mxu0 %v984_v12  ;;  %1055 = vmatpush.msrb.mxu1 %v1000_v13  ;;  %v987_v12 = vld [vmem:[%s12070_s2 + $0x88] sm:$0xff]  ;;  %v1006_v13 = vld [vmem:[%s12070_s2 + $0x120] sm:$0xff] }
  0x51   : > { %1075 = vmatpush.msrb.mxu2 %v1016_v24  ;;  %1095 = vmatpush.msrb.mxu3 %v1032_v25  ;;  %v1003_v25 = vld [vmem:[%s12070_s2 + $0x108] sm:$0xff] }
  0x52   : > { %1036 = vmatpush.msrb.mxu0 %v983_v14  ;;  %1056 = vmatpush.msrb.mxu1 %v999_v15  ;;  %v1022_v14 = vld [vmem:[%s12070_s2 + $0x1a0] sm:$0xff] }
  0x53   : > { %1076 = vmatpush.msrb.mxu2 %v1015_v30  ;;  %1096 = vmatpush.msrb.mxu3 %v1031_v31  ;;  %v970_v15 = vld [vmem:[%s12070_s2] sm:$0xff] }
  0x54   : > { %1037 = vmatpush.msrb.mxu0 %v982_v18  ;;  %1057 = vmatpush.msrb.mxu1 %v998_v19  ;;  %v986_v18 = vld [vmem:[%s12070_s2 + $0x80] sm:$0xff]  ;;  %v1005_v19 = vld [vmem:[%s12070_s2 + $0x118] sm:$0xff] }
  0x55   : > { %1077 = vmatpush.msrb.mxu2 %v1014_v34  ;;  %1097 = vmatpush.msrb.mxu3 %v1030_v35  ;;  %v1002_v31 = vld [vmem:[%s12070_s2 + $0x100] sm:$0xff] }
  0x56   : > { %1038 = vmatpush.msrb.mxu0 %v981_v22  ;;  %1058 = vmatpush.msrb.mxu1 %v997_v23  ;;  %v1020_v22 = vld [vmem:[%s12070_s2 + $0x190] sm:$0xff] }
  0x57   : > { %1078 = vmatpush.msrb.mxu2 %v1013_v38  ;;  %1098 = vmatpush.msrb.mxu3 %v1029_v41 }
  0x58   : > { %1039 = vmatpush.msrb.mxu0 %v980_v28  ;;  %1059 = vmatpush.msrb.mxu1 %v996_v29  ;;  %v1019_v28 = vld [vmem:[%s12070_s2 + $0x188] sm:$0xff] }
  0x59   : > { %1079 = vmatpush.msrb.mxu2 %v1012_v44  ;;  %1099 = vmatpush.msrb.mxu3 %v1028_v45 }
  0x5a   : > { %1040 = vmatpush.msrb.mxu0 %v979_v32  ;;  %1060 = vmatpush.msrb.mxu1 %v995_v33  ;;  %v1018_v32 = vld [vmem:[%s12070_s2 + $0x180] sm:$0xff] }
  0x5b   : > { %1080 = vmatpush.msrb.mxu2 %v1011_v50  ;;  %1100 = vmatpush.msrb.mxu3 %v1027_v51 }
  0x5c   : > { %1041 = vmatpush.msrb.mxu0 %v978_v36  ;;  %1061 = vmatpush.msrb.mxu1 %v994_v37 }
  0x5d   : > { %1081 = vmatpush.msrb.mxu2 %v1010_v54  ;;  %1101 = vmatpush.msrb.mxu3 %v1026_v55 }
  0x5e   : > { %1042 = vmatpush.msrb.mxu0 %v977_v42  ;;  %1062 = vmatpush.msrb.mxu1 %v993_v43 }
  0x5f   : > { %1082 = vmatpush.msrb.mxu2 %v1009_v59  ;;  %1102 = vmatpush.msrb.mxu3 %v1025_v60 }
  0x60   : > { %1043 = vmatpush.msrb.mxu0 %v976_v48  ;;  %1063 = vmatpush.msrb.mxu1 %v992_v49 }
  0x61   : > { %1083 = vmatpush.msrb.mxu2 %v1008_v63  ;;  %1103 = vmatpush.msrb.mxu3 %v1024_v2 }
  0x62   : > { %1044 = vmatpush.msrb.mxu0 %v975_v52  ;;  %1064 = vmatpush.msrb.mxu1 %v991_v53 }
  0x63   : > { %1084 = vmatpush.msrb.mxu2 %v1007_v7  ;;  %1104 = vmatpush.msrb.mxu3 %v1023_v8 }
  0x64   : > { %1045 = vmatpush.msrb.mxu0 %v974_v57  ;;  %1065 = vmatpush.msrb.mxu1 %v990_v58 }
  0x65   : > { %1085 = vmatpush.msrb.mxu2 %v1006_v13  ;;  %1105 = vmatpush.msrb.mxu3 %v1022_v14 }
  0x66   : > { %1046 = vmatpush.msrb.mxu0 %v973_v61  ;;  %1066 = vmatpush.msrb.mxu1 %v989_v62 }
  0x67   : > { %1086 = vmatpush.msrb.mxu2 %v1005_v19  ;;  %1106 = vmatpush.msrb.mxu3 %v1021_v20 }
  0x68   : > { %1047 = vmatpush.msrb.mxu0 %v972_v5  ;;  %1067 = vmatpush.msrb.mxu1 %v988_v6 }
  0x69   : > { %1087 = vmatpush.msrb.mxu2 %v1004_v21  ;;  %1107 = vmatpush.msrb.mxu3 %v1020_v22 }
  0x6a   : > { %1048 = vmatpush.msrb.mxu0 %v971_v9  ;;  %1068 = vmatpush.msrb.mxu1 %v987_v12 }
  0x6b   : > { %1088 = vmatpush.msrb.mxu2 %v1003_v25  ;;  %1108 = vmatpush.msrb.mxu3 %v1019_v28 }
  0x6c   : > { %1049 = vmatpush.msrb.mxu0 %v970_v15  ;;  %1069 = vmatpush.msrb.mxu1 %v986_v18 }
  0x6d   : > { %1089 = vmatpush.msrb.mxu2 %v1002_v31  ;;  %1109 = vmatpush.msrb.mxu3 %v1018_v32 }
  0xa5   : > { %v8600_v10 = vpop.f32.mrf.mxu0  ;;  %v8602_v11 = vpop.f32.mrf.mxu1 }
  0xaa   : > { %v8616_v16 = vpop.f32.mrf.mxu2  ;;  %v8618_v17 = vpop.f32.mrf.mxu3 }
  0xad   : > { %v8644_v26 = vpop.f32.mrf.mxu0  ;;  %v8646_v27 = vpop.f32.mrf.mxu1 }
  0xb2   : > { %v8681_v39 = vpop.f32.mrf.mxu2  ;;  %v8683_v40 = vpop.f32.mrf.mxu3 }
  0xb5   : > { %v8700_v46 = vpop.f32.mrf.mxu0  ;;  %v8702_v47 = vpop.f32.mrf.mxu1 }
  0xb6   : > { %v664_v33 = vadd.f32 %v8700_v46, %v8600_v10  ;;  %v678_v34 = vadd.f32 %v8702_v47, %v8602_v11 }
  0xbd   : > { %v665_v3 = vpop.f32.mrf.mxu0  ;;  %v679_v4 = vpop.f32.mrf.mxu1 }
  0xbe   : > { %v691_v0 = vpop.f32.mrf.mxu2  ;;  %v705_v1 = vpop.f32.mrf.mxu3  ;;  %v666_v37 = vadd.f32 %v665_v3, %v8644_v26  ;;  %v680_v38 = vadd.f32 %v679_v4, %v8646_v27 }
  0xbf   : > { %v692_v10 = vadd.f32 %v691_v0, %v8616_v16  ;;  %v706_v11 = vadd.f32 %v705_v1, %v8618_v17 }
  0xc6   : > { %v693_v23 = vpop.f32.mrf.mxu2  ;;  %v707_v24 = vpop.f32.mrf.mxu3 }
  0xc7   : > { %v694_v55 = vadd.f32 %v693_v23, %v8681_v39  ;;  %v708_v57 = vadd.f32 %v707_v24, %v8683_v40 }
  0xc9   : > { %v846_v29 = vpop.f32.mrf.mxu0  ;;  %v860_v30 = vpop.f32.mrf.mxu1 }
  0xca   : > { %v8810_v35 = vadd.f32 %v846_v29, %v664_v33  ;;  %v8812_v36 = vadd.f32 %v860_v30, %v678_v34 }
  0xcc   : > { %v929_v46 = vmul.f32 %v8810_v35, %v8810_v35  ;;  %v930_v26 = vmul.f32 %v8812_v36, %v8812_v36 }
  0xd0   : > { %v874_v41 = vpop.f32.mrf.mxu2  ;;  %v888_v42 = vpop.f32.mrf.mxu3 }
  0xd1   : > { %v848_v43 = vpop.f32.mrf.mxu0  ;;  %v862_v44 = vpop.f32.mrf.mxu1  ;;  %v8834_v50 = vadd.f32 %v874_v41, %v692_v10  ;;  %v8836_v17 = vadd.f32 %v888_v42, %v706_v11 }
  0xd2   : > { %v8816_v45 = vadd.f32 %v848_v43, %v666_v37  ;;  %v8818_v48 = vadd.f32 %v862_v44, %v680_v38 }
  0xd3   : > { %v931_v0 = vmul.f32 %v8834_v50, %v8834_v50  ;;  %v932_v1 = vmul.f32 %v8836_v17, %v8836_v17 }
  0xd4   : > { %v901_v27 = vadd.f32 %v8816_v45, %v8810_v35  ;;  %v933_v47 = vmul.f32 %v8816_v45, %v8816_v45  ;;  %v908_v49 = vadd.f32 %v8818_v48, %v8812_v36  ;;  %v934_v16 = vmul.f32 %v8818_v48, %v8818_v48 }
  0xd6   : > { %v902_v51 = vrot.slane %v901_v27, 4  ;;  %v937_v52 = vadd.f32 %v933_v47, %v929_v46  ;;  %v909_v53 = vrot.slane %v908_v49, 4  ;;  %v944_v54 = vadd.f32 %v934_v16, %v930_v26 }
  0xd8   : > { %v903_v58 = vadd.f32 %v902_v51, %v901_v27  ;;  %v938_v59 = vrot.slane %v937_v52, 4  ;;  %v910_v60 = vadd.f32 %v909_v53, %v908_v49  ;;  %v945_v61 = vrot.slane %v944_v54, 4  ;;  %v876_v62 = vpop.f32.mrf.mxu2  ;;  %v890_v63 = vpop.f32.mrf.mxu3 }
  0xd9   : > { %v8844_v2 = vadd.f32 %v876_v62, %v694_v55  ;;  %v8846_v3 = vadd.f32 %v890_v63, %v708_v57 }
  0xda   : > { %v904_v4 = vrot.slane %v903_v58, 2  ;;  %v939_v39 = vadd.f32 %v938_v59, %v937_v52  ;;  %v911_v5 = vrot.slane %v910_v60, 2  ;;  %v946_v40 = vadd.f32 %v945_v61, %v944_v54 }
  0xdb   : > { %v915_v6 = vadd.f32 %v8844_v2, %v8834_v50  ;;  %v935_v7 = vmul.f32 %v8844_v2, %v8844_v2  ;;  %v922_v8 = vadd.f32 %v8846_v3, %v8836_v17  ;;  %v936_v9 = vmul.f32 %v8846_v3, %v8846_v3 }
  0xdc   : > { %v905_v12 = vadd.f32 %v904_v4, %v903_v58  ;;  %v940_v13 = vrot.slane %v939_v39, 2  ;;  %v912_v14 = vadd.f32 %v911_v5, %v910_v60  ;;  %v947_v15 = vrot.slane %v946_v40, 2 }
  0xdd   : > { %v916_v18 = vrot.slane %v915_v6, 4  ;;  %v951_v19 = vadd.f32 %v935_v7, %v931_v0  ;;  %v923_v20 = vrot.slane %v922_v8, 4  ;;  %v958_v21 = vadd.f32 %v936_v9, %v932_v1  ;;  %v1144_v7 = vld [vmem:[%s12071_s3 + $0x28] sm:$0xff] }
  0xde   : > { %v906_v22 = vrot.slane %v905_v12, 1  ;;  %v941_v23 = vadd.f32 %v940_v13, %v939_v39  ;;  %v913_v24 = vrot.slane %v912_v14, 1  ;;  %v948_v25 = vadd.f32 %v947_v15, %v946_v40  ;;  %1185 = vmatpush.msra.mxu1 %v1144_v7  ;;  %v1139_v13 = vld [vmem:[%s12071_s3] sm:$0xff]  ;;  %v1141_v15 = vld [vmem:[%s12071_s3 + $0x10] sm:$0xff] }
  0xdf   : > { %v917_v28 = vadd.f32 %v916_v18, %v915_v6  ;;  %v952_v29 = vrot.slane %v951_v19, 4  ;;  %v924_v30 = vadd.f32 %v923_v20, %v922_v8  ;;  %v959_v31 = vrot.slane %v958_v21, 4  ;;  %v1143_v6 = vld [vmem:[%s12071_s3 + $0x20] sm:$0xff]  ;;  %v1145_v8 = vld [vmem:[%s12071_s3 + $0x30] sm:$0xff]  ;;  %v1142_v18 = vld [vmem:[%s12071_s3 + $0x18] sm:$0xff] }
  0xe0   : > { %v942_v32 = vrot.slane %v941_v23, 1  ;;  %v949_v33 = vrot.slane %v948_v25, 1  ;;  %v907_v42 = vadd.f32 %v906_v22, %v905_v12  ;;  %v914_v44 = vadd.f32 %v913_v24, %v912_v14  ;;  %1165 = vmatpush.msra.mxu0 %v1143_v6  ;;  %v1146_v12 = vld [vmem:[%s12071_s3 + $0x38] sm:$0xff]  ;;  %v1140_v14 = vld [vmem:[%s12071_s3 + $0x8] sm:$0xff]  ;;  %1205 = vmatpush.msra.mxu2 %v1145_v8  ;;  %v7955_v22 = vld [vmem:[%s12073_s5 + $0x76c] sm:$0xf0] }
  0xe1   : > { %v918_v34 = vrot.slane %v917_v28, 2  ;;  %v953_v37 = vadd.f32 %v952_v29, %v951_v19  ;;  %v925_v38 = vrot.slane %v924_v30, 2  ;;  %v960_v41 = vadd.f32 %v959_v31, %v958_v21  ;;  %1225 = vmatpush.msra.mxu3 %v1146_v12  ;;  %1186 = vmatpush.msra.mxu1 %v1140_v14  ;;  %v6147_v21 = vld [vmem:[%s12073_s5 + $0x760] sm:$0xf]  ;;  %v7923_v31 = vld [vmem:[%s12073_s5 + $0x66c] sm:$0xf0] }
  0xe2   : > { %v943_v43 = vadd.f32 %v942_v32, %v941_v23  ;;  %v950_v10 = vadd.f32 %v949_v33, %v948_v25  ;;  %1166 = vmatpush.msra.mxu0 %v1139_v13  ;;  %1206 = vmatpush.msra.mxu2 %v1141_v15  ;;  %v6148_v23 = vor.u32 %v7955_v22, %v6147_v21  ;;  %v6275_v24 = vld [vmem:[%s12073_s5 + $0x860] sm:$0xf]  ;;  %v7987_v25 = vld [vmem:[%s12073_s5 + $0x86c] sm:$0xf0] }
  0xe3   : > { %v919_v11 = vadd.f32 %v918_v34, %v917_v28  ;;  %v954_v46 = vrot.slane %v953_v37, 2  ;;  %v926_v26 = vadd.f32 %v925_v38, %v924_v30  ;;  %v961_v27 = vrot.slane %v960_v41, 2  ;;  %1226 = vmatpush.msra.mxu3 %v1142_v18  ;;  %v6019_v28 = vld [vmem:[%s12073_s5 + $0x660] sm:$0xf]  ;;  %v7951_v33 = vld [vmem:[%s12073_s5 + $0x74c] sm:$0xf0] }
  0xe4   : > { %v966_v47 = vsel %vm965_vm4, %v907_v42, %v943_v43  ;;  %v967_v49 = vsel %vm965_vm4, %v914_v44, %v950_v10  ;;  %v6276_v30 = vor.u32 %v7987_v25, %v6275_v24  ;;  %v6131_v32 = vld [vmem:[%s12073_s5 + $0x740] sm:$0xf]  ;;  %v6020_v34 = vor.u32 %v7923_v31, %v6019_v28  ;;  %v7919_v10 = vld [vmem:[%s12073_s5 + $0x64c] sm:$0xf0] }
  0xe5   : > { %1050 = vmatmul.f32.vlgmr.msrb.gmra.mxu0 %v966_v47  ;;  %1070 = vmatmul.f32.vlgmr.msrb.gmra.mxu1 %v967_v49  ;;  %v920_v16 = vrot.slane %v919_v11, 1  ;;  %v955_v51 = vadd.f32 %v954_v46, %v953_v37  ;;  %v927_v52 = vrot.slane %v926_v26, 1  ;;  %v962_v53 = vadd.f32 %v961_v27, %v960_v41  ;;  %v6259_v38 = vld [vmem:[%s12073_s5 + $0x840] sm:$0xf]  ;;  %v7983_v41 = vld [vmem:[%s12073_s5 + $0x84c] sm:$0xf0] }
  0xe6   : > { %v6132_v37 = vor.u32 %v7951_v33, %v6131_v32  ;;  %v6003_v42 = vld [vmem:[%s12073_s5 + $0x640] sm:$0xf]  ;;  %v6260_v44 = vor.u32 %v7983_v41, %v6259_v38  ;;  %2464 = vmatpush.bf16.msrb.mxu1 %v6020_v34  ;;  %v7979_v47 = vld [vmem:[%s12073_s5 + $0x82c] sm:$0xf0] }
  0xe7   : > { %v956_v54 = vrot.slane %v955_v51, 1  ;;  %v963_v55 = vrot.slane %v962_v53, 1  ;;  %v921_v57 = vadd.f32 %v920_v16, %v919_v11  ;;  %v928_v59 = vadd.f32 %v927_v52, %v926_v26  ;;  %v6115_v11 = vld [vmem:[%s12073_s5 + $0x720] sm:$0xf]  ;;  %v7947_v26 = vld [vmem:[%s12073_s5 + $0x72c] sm:$0xf0] }
  0xe8   : > { %v6004_v46 = vor.u32 %v7919_v10, %v6003_v42  ;;  %v6243_v27 = vld [vmem:[%s12073_s5 + $0x820] sm:$0xf]  ;;  %v7915_v16 = vld [vmem:[%s12073_s5 + $0x62c] sm:$0xf0] }
  0xe9   : > { %v957_v58 = vadd.f32 %v956_v54, %v955_v51  ;;  %v964_v60 = vadd.f32 %v963_v55, %v962_v53  ;;  %v5987_v49 = vld [vmem:[%s12073_s5 + $0x620] sm:$0xf]  ;;  %v6116_v51 = vor.u32 %v7947_v26, %v6115_v11  ;;  %v6244_v52 = vor.u32 %v7979_v47, %v6243_v27  ;;  %v7943_v54 = vld [vmem:[%s12073_s5 + $0x70c] sm:$0xf0] }
  0xea   : > { %v6099_v53 = vld [vmem:[%s12073_s5 + $0x700] sm:$0xf]  ;;  %2465 = vmatpush.bf16.msrb.mxu1 %v6004_v46  ;;  %v5988_v55 = vor.u32 %v7915_v16, %v5987_v49  ;;  %v7891_v14 = vld [vmem:[%s12073_s5 + $0x56c] sm:$0xf0] }
  0xeb   : > { %v968_v61 = vsel %vm965_vm4, %v921_v57, %v957_v58  ;;  %v969_v62 = vsel %vm965_vm4, %v928_v59, %v964_v60  ;;  %v6227_v57 = vld [vmem:[%s12073_s5 + $0x800] sm:$0xf]  ;;  %v7975_v58 = vld [vmem:[%s12073_s5 + $0x80c] sm:$0xf0]  ;;  %v6100_v59 = vor.u32 %v7943_v54, %v6099_v53 }
  0xec   : > { %1090 = vmatmul.f32.vlgmr.msrb.gmra.mxu2 %v968_v61  ;;  %1110 = vmatmul.f32.vlgmr.msrb.gmra.mxu3 %v969_v62  ;;  %v6228_v61 = vor.u32 %v7975_v58, %v6227_v57  ;;  %v5971_v8 = vld [vmem:[%s12073_s5 + $0x600] sm:$0xf]  ;;  %v7971_v21 = vld [vmem:[%s12073_s5 + $0x7ec] sm:$0xf0] }
  0xed   : > { %2478 = vmatpush.bf16.msrb.mxu2 %v6148_v23  ;;  %2492 = vmatpush.bf16.msrb.mxu3 %v6276_v30  ;;  %v5891_v13 = vld [vmem:[%s12073_s5 + $0x560] sm:$0xf]  ;;  %v7907_v25 = vld [vmem:[%s12073_s5 + $0x5ec] sm:$0xf0] }
  0xee   : > { %2466 = vmatpush.bf16.msrb.mxu1 %v5988_v55  ;;  %v6083_v15 = vld [vmem:[%s12073_s5 + $0x6e0] sm:$0xf]  ;;  %v5892_v18 = vor.u32 %v7891_v14, %v5891_v13  ;;  %v7887_v30 = vld [vmem:[%s12073_s5 + $0x54c] sm:$0xf0]  ;;  %v7889_v14 = vld [vmem:[%s12073_s5 + $0x564] sm:$0xf] }
  0xef   : > { %v5955_v24 = vld [vmem:[%s12073_s5 + $0x5e0] sm:$0xf]  ;;  %v7935_v33 = vld [vmem:[%s12073_s5 + $0x6cc] sm:$0xf0] }
  0xf0   : > { %2450 = vmatpush.bf16.msrb.mxu0 %v5892_v18  ;;  %v5956_v28 = vor.u32 %v7907_v25, %v5955_v24  ;;  %v6067_v31 = vld [vmem:[%s12073_s5 + $0x6c0] sm:$0xf]  ;;  %v7883_v11 = vld [vmem:[%s12073_s5 + $0x52c] sm:$0xf0]  ;;  %v5893_v18 = vld [vmem:[%s12073_s5 + $0x570] sm:$0xf0] }
  0xf1   : > { %2479 = vmatpush.bf16.msrb.mxu2 %v6132_v37  ;;  %2493 = vmatpush.bf16.msrb.mxu3 %v6260_v44  ;;  %v6195_v34 = vld [vmem:[%s12073_s5 + $0x7c0] sm:$0xf]  ;;  %v7967_v37 = vld [vmem:[%s12073_s5 + $0x7cc] sm:$0xf0]  ;;  %v6068_v38 = vor.u32 %v7935_v33, %v6067_v31  ;;  %v6133_v24 = vld [vmem:[%s12073_s5 + $0x750] sm:$0xf0] }
  0xf2   : > { %v6196_v41 = vor.u32 %v7967_v37, %v6195_v34  ;;  %v5939_v42 = vld [vmem:[%s12073_s5 + $0x5c0] sm:$0xf]  ;;  %v7931_v27 = vld [vmem:[%s12073_s5 + $0x6ac] sm:$0xf0]  ;;  %v7913_v33 = vld [vmem:[%s12073_s5 + $0x624] sm:$0xf] }
  0xf3   : > { %v5859_v10 = vld [vmem:[%s12073_s5 + $0x520] sm:$0xf]  ;;  %v7963_v49 = vld [vmem:[%s12073_s5 + $0x7ac] sm:$0xf0]  ;;  %v5989_v34 = vld [vmem:[%s12073_s5 + $0x630] sm:$0xf0] }
  0xf4   : > { %v6051_v46 = vld [vmem:[%s12073_s5 + $0x6a0] sm:$0xf]  ;;  %v5860_v26 = vor.u32 %v7883_v11, %v5859_v10  ;;  %v7899_v53 = vld [vmem:[%s12073_s5 + $0x5ac] sm:$0xf0] }
  0xf5   : > { %2480 = vmatpush.bf16.msrb.mxu2 %v6116_v51  ;;  %2494 = vmatpush.bf16.msrb.mxu3 %v6244_v52  ;;  %v6179_v47 = vld [vmem:[%s12073_s5 + $0x7a0] sm:$0xf]  ;;  %v6052_v16 = vor.u32 %v7931_v27, %v6051_v46  ;;  %v7879_v57 = vld [vmem:[%s12073_s5 + $0x50c] sm:$0xf0]  ;;  %v5861_v27 = vld [vmem:[%s12073_s5 + $0x530] sm:$0xf0] }
  0xf6   : > { %v6180_v51 = vor.u32 %v7963_v49, %v6179_v47  ;;  %v5923_v52 = vld [vmem:[%s12073_s5 + $0x5a0] sm:$0xf]  ;;  %v7875_v13 = vld [vmem:[%s12073_s5 + $0x4ec] sm:$0xf0]  ;;  %v7909_v47 = vld [vmem:[%s12073_s5 + $0x604] sm:$0xf] }
  0xf7   : > { %v5924_v54 = vor.u32 %v7899_v53, %v5923_v52  ;;  %v5843_v55 = vld [vmem:[%s12073_s5 + $0x500] sm:$0xf]  ;;  %v7867_v46 = vld [vmem:[%s12073_s5 + $0x4ac] sm:$0xf0]  ;;  %v7941_v52 = vld [vmem:[%s12073_s5 + $0x704] sm:$0xf] }
  0xf8   : > { %v6035_v58 = vld [vmem:[%s12073_s5 + $0x680] sm:$0xf]  ;;  %v6101_v53 = vld [vmem:[%s12073_s5 + $0x710] sm:$0xf0] }
  0xf9   : > { %2481 = vmatpush.bf16.msrb.mxu2 %v6100_v59  ;;  %2495 = vmatpush.bf16.msrb.mxu3 %v6228_v61  ;;  %v5844_v59 = vor.u32 %v7879_v57, %v5843_v55  ;;  %v6163_v61 = vld [vmem:[%s12073_s5 + $0x780] sm:$0xf]  ;;  %v6104_v57 = vor.u32 %v7941_v52, %v6101_v53 }
  0xfa   : > { %v5795_v11 = vld [vmem:[%s12073_s5 + $0x4a0] sm:$0xf] }
  0xfb   : > { %v5796_v49 = vor.u32 %v7867_v46, %v5795_v11  ;;  %v6053_v11 = vld [vmem:[%s12073_s5 + $0x6b0] sm:$0xf0]  ;;  %v7865_v46 = vld [vmem:[%s12073_s5 + $0x4a4] sm:$0xf]  ;;  %v6291_v52 = vld [vmem:[%s12073_s5 + $0x880] sm:$0xf] }
 0x162   : > { %v1051_v63 = vpop.f32.mrf.mxu0  ;;  %v1071_v0 = vpop.f32.mrf.mxu1 }
 0x163   : > { %v1072_v1 = vadd.f32 %v1071_v0, %v1051_v63 }
 0x16f   : > { %v1091_v4 = vpop.f32.mrf.mxu2  ;;  %v1111_v5 = vpop.f32.mrf.mxu3 }
 0x170   : > { %v1092_v39 = vadd.f32 %v1091_v4, %v1072_v1 }
 0x172   : > { %v1112_v40 = vadd.f32 %v1111_v5, %v1092_v39 }
 0x174   : > { %v8869_v9 = vmul.f32 0.001953125, %v1112_v40 }
 0x176   : > { %v1115_v19 = vmul.f32 %v8869_v9, %v8869_v9 }
 0x178   : > { %v1117_v20 = vrot.slane %v1115_v19, 7  ;;  %v7939_v19 = vld [vmem:[%s12073_s5 + $0x6ec] sm:$0xf0] }
 0x179   : > { %v6084_v22 = vor.u32 %v7939_v19, %v6083_v15  ;;  %v7917_v19 = vld [vmem:[%s12073_s5 + $0x644] sm:$0xf] }
 0x17a   : > { %v1119_v29 = vsub.f32 %v8869_v9, %v1117_v20  ;;  %v6211_v20 = vld [vmem:[%s12073_s5 + $0x7e0] sm:$0xf] }
 0x17b   : > { %v6212_v23 = vor.u32 %v7971_v21, %v6211_v20  ;;  %2482 = vmatpush.bf16.msrb.mxu2 %v6084_v22  ;;  %v6005_v20 = vld [vmem:[%s12073_s5 + $0x650] sm:$0xf0]  ;;  %v5896_v21 = vor.u32 %v7889_v14, %v5893_v18  ;;  %v7873_v14 = vld [vmem:[%s12073_s5 + $0x4e4] sm:$0xf] }
 0x17c   : > { %v1120_v43 = vadd.f32 1e-05, %v1119_v29  ;;  %v5875_v29 = vld [vmem:[%s12073_s5 + $0x540] sm:$0xf]  ;;  %v6008_v22 = vor.u32 %v7917_v19, %v6005_v20 }
 0x17d   : > { %2496 = vmatpush.bf16.msrb.mxu3 %v6212_v23  ;;  %v5876_v32 = vor.u32 %v7887_v30, %v5875_v29  ;;  %v7949_v23 = vld [vmem:[%s12073_s5 + $0x744] sm:$0xf]  ;;  %v7871_v29 = vld [vmem:[%s12073_s5 + $0x4cc] sm:$0xf0] }
 0x17e   : > { %8158 = vrsqrt.f32 %v1120_v43  ;;  %vm1127_vm6 = vweird.f32 %v1120_v43  ;;  %v6136_v25 = vor.u32 %v7949_v23, %v6133_v24  ;;  %v7885_v30 = vld [vmem:[%s12073_s5 + $0x544] sm:$0xf]  ;;  %v1231_v24 = vld [vmem:[%s12072_s4] sm:$0xf] }
 0x17f   : > { %2451 = vmatpush.bf16.msrb.mxu0 %v5876_v32  ;;  %2483 = vmatpush.bf16.msrb.mxu2 %v6068_v38  ;;  %v5877_v32 = vld [vmem:[%s12073_s5 + $0x550] sm:$0xf0]  ;;  %v7901_v23 = vld [vmem:[%s12073_s5 + $0x5c4] sm:$0xf] }
 0x181   : > { %2497 = vmatpush.bf16.msrb.mxu3 %v6196_v41  ;;  %v5880_v41 = vor.u32 %v7885_v30, %v5877_v32  ;;  %v6069_v30 = vld [vmem:[%s12073_s5 + $0x6d0] sm:$0xf0] }
 0x183   : > { %2452 = vmatpush.bf16.msrb.mxu0 %v5860_v26  ;;  %2484 = vmatpush.bf16.msrb.mxu2 %v6052_v16  ;;  %v7881_v26 = vld [vmem:[%s12073_s5 + $0x524] sm:$0xf] }
 0x184   : > { %v8159_v60 = vpop.eup %8158  ;;  %v5864_v16 = vor.u32 %v7881_v26, %v5861_v27 }
 0x185   : > { %v1122_v62 = vmul.f32 %v8159_v60, %v1120_v43  ;;  %vm1128_vm5 = vweird.f32 %v8159_v60  ;;  %v7903_v43 = vld [vmem:[%s12073_s5 + $0x5cc] sm:$0xf0]  ;;  %2498 = vmatpush.bf16.msrb.mxu3 %v6180_v51  ;;  %v5973_v51 = vld [vmem:[%s12073_s5 + $0x610] sm:$0xf0] }
 0x186   : > { %vm1129_vm7 = vmor %vm1127_vm6, %vm1128_vm5  ;;  %v5940_v44 = vor.u32 %v7903_v43, %v5939_v42  ;;  %v5992_v42 = vor.u32 %v7913_v33, %v5989_v34  ;;  %v7945_v43 = vld [vmem:[%s12073_s5 + $0x724] sm:$0xf]  ;;  %v5976_v55 = vor.u32 %v7909_v47, %v5973_v51  ;;  %v5813_v34 = vld [vmem:[%s12073_s5 + $0x4d0] sm:$0xf0] }
 0x187   : > { %v1123_v63 = vmul.f32 %v8159_v60, %v1122_v62  ;;  %v7959_v62 = vld [vmem:[%s12073_s5 + $0x78c] sm:$0xf0]  ;;  %2453 = vmatpush.bf16.msrb.mxu0 %v5844_v59  ;;  %v7869_v33 = vld [vmem:[%s12073_s5 + $0x4c4] sm:$0xf]  ;;  %v5797_v51 = vld [vmem:[%s12073_s5 + $0x4b0] sm:$0xf0] }
 0x188   : > { %v7863_v59 = vld [vmem:[%s12073_s5 + $0x48c] sm:$0xf0] }
 0x189   : > { %v1124_v0 = vmul.f32 0.5, %v1123_v63 }
 0x18b   : > { %v1125_v1 = vsub.f32 1.5, %v1124_v0  ;;  %v6164_v0 = vor.u32 %v7959_v62, %v6163_v61 }
 0x18d   : > { %v1126_v4 = vmul.f32 %v8159_v60, %v1125_v1  ;;  %v7921_v1 = vld [vmem:[%s12073_s5 + $0x664] sm:$0xf]  ;;  %2499 = vmatpush.bf16.msrb.mxu3 %v6164_v0  ;;  %v5845_v0 = vld [vmem:[%s12073_s5 + $0x510] sm:$0xf0] }
 0x18f   : > { %v1130_v39 = vsel %vm1129_vm7, %v8159_v60, %v1126_v4  ;;  %v7927_v60 = vld [vmem:[%s12073_s5 + $0x68c] sm:$0xf0]  ;;  %v6021_v4 = vld [vmem:[%s12073_s5 + $0x670] sm:$0xf0] }
 0x190   : > { %v1132_v5 = vrot.slane %v1130_v39, 1  ;;  %v6036_v63 = vor.u32 %v7927_v60, %v6035_v58  ;;  %v7953_v39 = vld [vmem:[%s12073_s5 + $0x764] sm:$0xf]  ;;  %v5779_v58 = vld [vmem:[%s12073_s5 + $0x480] sm:$0xf] }
 0x191   : > { %v7877_v60 = vld [vmem:[%s12073_s5 + $0x504] sm:$0xf] }
 0x192   : > { %v1134_v40 = vmul.f32 %v1132_v5, %v8869_v9  ;;  %v7911_v9 = vld [vmem:[%s12073_s5 + $0x60c] sm:$0xf0]  ;;  %2485 = vmatpush.bf16.msrb.mxu2 %v6036_v63  ;;  %v5780_v63 = vor.u32 %v7863_v59, %v5779_v58  ;;  %v7925_v59 = vld [vmem:[%s12073_s5 + $0x684] sm:$0xf] }
 0x193   : > { %v5972_v12 = vor.u32 %v7911_v9, %v5971_v8 }
 0x194   : > { %v1136_v6 = vrot.slane %v1134_v40, 7  ;;  %v6149_v40 = vld [vmem:[%s12073_s5 + $0x770] sm:$0xf0] }
 0x195   : > { %2467 = vmatpush.bf16.msrb.mxu1 %v5972_v12  ;;  %v6152_v8 = vor.u32 %v7953_v39, %v6149_v40  ;;  %v5827_v12 = vld [vmem:[%s12073_s5 + $0x4e0] sm:$0xf]  ;;  %v5848_v40 = vor.u32 %v7877_v60, %v5845_v0  ;;  %v6037_v60 = vld [vmem:[%s12073_s5 + $0x690] sm:$0xf0] }
 0x196   : > { %v1138_v7 = vsel %vm965_vm4, %v1132_v5, %v1136_v6  ;;  %v6024_v5 = vor.u32 %v7921_v1, %v6021_v4  ;;  %v5907_v6 = vld [vmem:[%s12073_s5 + $0x580] sm:$0xf]  ;;  %v5828_v15 = vor.u32 %v7875_v13, %v5827_v12  ;;  %v8003_v4 = vld [vmem:[%s12073_s5 + $0x8ec] sm:$0xf0]  ;;  %v7937_v12 = vld [vmem:[%s12073_s5 + $0x6e4] sm:$0xf] }
 0x197   : > { %5629 = vmatmul.msk.f32.vlgmr.msra.gmra.mxu0 %vm1147_vm8, %v1138_v7  ;;  %5630 = vmatmul.msk.f32.vlgmr.msra.gmra.mxu1 %vm1147_vm8, %v1138_v7  ;;  %v6339_v1 = vld [vmem:[%s12073_s5 + $0x8e0] sm:$0xf]  ;;  %v6085_v13 = vld [vmem:[%s12073_s5 + $0x6f0] sm:$0xf0] }
 0x198   : > { %5631 = vmatmul.msk.f32.vlgmr.msra.gmra.mxu2 %vm1147_vm8, %v1138_v7  ;;  %5632 = vmatmul.msk.f32.vlgmr.msra.gmra.mxu3 %vm1147_vm8, %v1138_v7  ;;  %v7895_v7 = vld [vmem:[%s12073_s5 + $0x58c] sm:$0xf0]  ;;  %v6088_v19 = vor.u32 %v7937_v12, %v6085_v13 }
 0x199   : > { %2468 = vmatpush.bf16.msrb.mxu1 %v5956_v28  ;;  %v5908_v9 = vor.u32 %v7895_v7, %v5907_v6  ;;  %2534 = vmatpush.bf16.msra.mxu2 %v6024_v5  ;;  %v5811_v28 = vld [vmem:[%s12073_s5 + $0x4c0] sm:$0xf]  ;;  %v6340_v6 = vor.u32 %v8003_v4, %v6339_v1  ;;  %v7905_v7 = vld [vmem:[%s12073_s5 + $0x5e4] sm:$0xf] }
 0x19a   : > { %2548 = vmatpush.bf16.msra.mxu3 %v6152_v8  ;;  %2454 = vmatpush.bf16.msrb.mxu0 %v5828_v15  ;;  %v5812_v31 = vor.u32 %v7871_v29, %v5811_v28  ;;  %v5829_v15 = vld [vmem:[%s12073_s5 + $0x4f0] sm:$0xf0]  ;;  %v7933_v29 = vld [vmem:[%s12073_s5 + $0x6c4] sm:$0xf] }
 0x19b   : > { %v5832_v20 = vor.u32 %v7873_v14, %v5829_v15  ;;  %v5941_v28 = vld [vmem:[%s12073_s5 + $0x5d0] sm:$0xf0]  ;;  %v6072_v32 = vor.u32 %v7933_v29, %v6069_v30 }
 0x19d   : > { %2469 = vmatpush.bf16.msrb.mxu1 %v5940_v44  ;;  %2535 = vmatpush.bf16.msra.mxu2 %v6008_v22  ;;  %v6117_v44 = vld [vmem:[%s12073_s5 + $0x730] sm:$0xf0]  ;;  %v7999_v22 = vld [vmem:[%s12073_s5 + $0x8cc] sm:$0xf0] }
 0x19e   : > { %2549 = vmatpush.bf16.msra.mxu3 %v6136_v25  ;;  %2455 = vmatpush.bf16.msrb.mxu0 %v5812_v31  ;;  %v6120_v10 = vor.u32 %v7945_v43, %v6117_v44  ;;  %v5944_v31 = vor.u32 %v7901_v23, %v5941_v28  ;;  %v5816_v43 = vor.u32 %v7869_v33, %v5813_v34  ;;  %v5781_v23 = vld [vmem:[%s12073_s5 + $0x490] sm:$0xf0] }
 0x1a1   : > { %2470 = vmatpush.bf16.msrb.mxu1 %v5924_v54  ;;  %2536 = vmatpush.bf16.msra.mxu2 %v5992_v42  ;;  %v5925_v42 = vld [vmem:[%s12073_s5 + $0x5b0] sm:$0xf0] }
 0x1a2   : > { %2550 = vmatpush.bf16.msra.mxu3 %v6120_v10  ;;  %2456 = vmatpush.bf16.msrb.mxu0 %v5796_v49  ;;  %v7929_v10 = vld [vmem:[%s12073_s5 + $0x6a4] sm:$0xf] }
 0x1a5   : > { %2471 = vmatpush.bf16.msrb.mxu1 %v5908_v9  ;;  %2537 = vmatpush.bf16.msra.mxu2 %v5976_v55  ;;  %v5957_v9 = vld [vmem:[%s12073_s5 + $0x5f0] sm:$0xf0]  ;;  %v6056_v55 = vor.u32 %v7929_v10, %v6053_v11 }
 0x1a6   : > { %2551 = vmatpush.bf16.msra.mxu3 %v6104_v57  ;;  %2457 = vmatpush.bf16.msrb.mxu0 %v5780_v63  ;;  %v5960_v18 = vor.u32 %v7905_v7, %v5957_v9  ;;  %v5800_v57 = vor.u32 %v7865_v46, %v5797_v51 }
 0x1a9   : > { %2520 = vmatpush.bf16.msra.mxu1 %v5896_v21  ;;  %v6323_v21 = vld [vmem:[%s12073_s5 + $0x8c0] sm:$0xf]  ;;  %2538 = vmatpush.bf16.msra.mxu2 %v5960_v18 }
 0x1aa   : > { %2510 = vmatpush.bf16.msra.mxu0 %v6340_v6  ;;  %v6324_v25 = vor.u32 %v7999_v22, %v6323_v21  ;;  %2552 = vmatpush.bf16.msra.mxu3 %v6088_v19  ;;  %v6040_v6 = vor.u32 %v7925_v59, %v6037_v60 }
 0x1ad   : > { %2521 = vmatpush.bf16.msra.mxu1 %v5880_v41  ;;  %v7897_v41 = vld [vmem:[%s12073_s5 + $0x5a4] sm:$0xf]  ;;  %2539 = vmatpush.bf16.msra.mxu2 %v5944_v31 }
 0x1ae   : > { %2511 = vmatpush.bf16.msra.mxu0 %v6324_v25  ;;  %2553 = vmatpush.bf16.msra.mxu3 %v6072_v32 }
 0x1b1   : > { %2522 = vmatpush.bf16.msra.mxu1 %v5864_v16 }
 0x1b2   : > { %2554 = vmatpush.bf16.msra.mxu3 %v6056_v55 }
 0x1b5   : > { %2523 = vmatpush.bf16.msra.mxu1 %v5848_v40 }
 0x1b6   : > { %2555 = vmatpush.bf16.msra.mxu3 %v6040_v6  ;;  %v7892_v6 = vld [vmem:[%s12073_s5 + $0x574] sm:$0xf0] }
 0x1b9   : > { %2524 = vmatpush.bf16.msra.mxu1 %v5832_v20 }
 0x1bd   : > { %2525 = vmatpush.bf16.msra.mxu1 %v5816_v43 }
 0x1c1   : > { %2526 = vmatpush.bf16.msra.mxu1 %v5800_v57 }
 0x214   : > { %v9117_v37 = vpop.f32.mrf.mxu0  ;;  %v9119_v38 = vpop.f32.mrf.mxu1 }
 0x215   : > { %1236 = vst [vmem:[#allocation1] sm:$0xff] %v9117_v37  ;;  %v1244_v54 = vperm.slane %v9117_v37, 0  ;;  %v1245_v39 = vperm.slane %v9119_v38, 0  ;;  %v6307_v37 = vld [vmem:[%s12073_s5 + $0x8a0] sm:$0xf] }
 0x216   : > { %1237 = vst [vmem:[#allocation1 + $0x9] sm:$0xff] %v9119_v38  ;;  %v7995_v38 = vld [vmem:[%s12073_s5 + $0x8ac] sm:$0xf0] }
 0x217   : > { %v6308_v44 = vor.u32 %v7995_v38, %v6307_v37  ;;  %v1248_v26 = vmul.f32 %v1244_v54, %v8810_v35  ;;  %v1252_v27 = vmul.f32 %v1244_v54, %v8816_v45  ;;  %v1249_v47 = vmul.f32 %v1245_v39, %v8812_v36  ;;  %v7991_v36 = vld [vmem:[%s12073_s5 + $0x88c] sm:$0xf0]  ;;  %v5909_v54 = vld [vmem:[%s12073_s5 + $0x590] sm:$0xf0] }
 0x218   : > { %v1253_v49 = vmul.f32 %v1245_v39, %v8818_v48  ;;  %v5928_v45 = vor.u32 %v7897_v41, %v5925_v42  ;;  %v7893_v48 = vld [vmem:[%s12073_s5 + $0x584] sm:$0xf]  ;;  %v6292_v58 = vor.u32 %v7991_v36, %v6291_v52 }
 0x219   : > { %2512 = vmatpush.bf16.msra.mxu0 %v6308_v44  ;;  %v5912_v40 = vor.u32 %v7893_v48, %v5909_v54  ;;  %v7985_v54 = vld [vmem:[%s12073_s5 + $0x864] sm:$0xf] }
 0x21a   : > { %2540 = vmatpush.bf16.msra.mxu2 %v5928_v45 }
 0x21b   : > { %v9163_v61 = vpop.f32.mrf.mxu2  ;;  %v9165_v62 = vpop.f32.mrf.mxu3 }
 0x21c   : > { %1238 = vst [vmem:[#allocation1 + $0x12] sm:$0xff] %v9163_v61  ;;  %v1246_v5 = vperm.slane %v9163_v61, 0  ;;  %v1247_v8 = vperm.slane %v9165_v62, 0 }
 0x21d   : > { %1239 = vst [vmem:[#allocation1 + $0x1b] sm:$0xff] %v9165_v62  ;;  %2513 = vmatpush.bf16.msra.mxu0 %v6292_v58 }
 0x21e   : > { %v1250_v53 = vmul.f32 %v1246_v5, %v8834_v50  ;;  %v1251_v50 = vmul.f32 %v1247_v8, %v8836_v17  ;;  %v1254_v17 = vmul.f32 %v1246_v5, %v8844_v2  ;;  %v1255_v39 = vmul.f32 %v1247_v8, %v8846_v3  ;;  %v7861_v3 = vld [vmem:[%s12073_s5 + $0x484] sm:$0xf]  ;;  %2541 = vmatpush.bf16.msra.mxu2 %v5912_v40  ;;  %v5899_v40 = vld [vmem:[%s12073_s5 + $0x568] sm:$0xf] }
 0x21f   : > { %v5784_v34 = vor.u32 %v7861_v3, %v5781_v23 }
 0x221   : > { %2527 = vmatpush.bf16.msra.mxu1 %v5784_v34 }
 0x224   : > { %v1241_v16 = vld [vmem:[#allocation1 + $0x1] ss:$9 sm:$0xff] }
 0x225   : > { %v1243_v35 = vsub.f32 %v1231_v24, %v1241_v16 }
 0x227   : > { %v1257_v63 = vperm.slane %v1243_v35, 0  ;;  %v1258_v0 = vperm.slane %v1243_v35, 1  ;;  %v1259_v1 = vperm.slane %v1243_v35, 2  ;;  %v1260_v4 = vperm.slane %v1243_v35, 3  ;;  %v6309_v35 = vld [vmem:[%s12073_s5 + $0x8b0] sm:$0xf0] }
 0x229   : > { %v1265_v7 = vadd.f32 %v1257_v63, %v1248_v26  ;;  %v1266_v9 = vadd.f32 %v1258_v0, %v1249_v47  ;;  %v1267_v12 = vadd.f32 %v1259_v1, %v1250_v53  ;;  %v1268_v13 = vadd.f32 %v1260_v4, %v1251_v50  ;;  %v6277_v50 = vld [vmem:[%s12073_s5 + $0x870] sm:$0xf0] }
 0x22a   : > { %v1269_v14 = vadd.f32 %v1257_v63, %v1252_v27  ;;  %v1270_v15 = vadd.f32 %v1258_v0, %v1253_v49  ;;  %v1271_v18 = vadd.f32 %v1259_v1, %v1254_v17  ;;  %v1272_v19 = vadd.f32 %v1260_v4, %v1255_v39  ;;  %v8001_v63 = vld [vmem:[%s12073_s5 + $0x8e4] sm:$0xf]  ;;  %v6341_v0 = vld [vmem:[%s12073_s5 + $0x8f0] sm:$0xf0] }
 0x22b   : > { %v1273_v20 = vmax.f32 %v1265_v7, 0.0  ;;  %v1274_v21 = vmax.f32 %v1266_v9, 0.0  ;;  %v1275_v61 = vmax.f32 %v1267_v12, 0.0  ;;  %v1276_v2 = vmax.f32 %v1268_v13, 0.0 }
 0x22c   : > { %v1277_v62 = vmax.f32 %v1269_v14, 0.0  ;;  %v1278_v5 = vmax.f32 %v1270_v15, 0.0  ;;  %v1279_v8 = vmax.f32 %v1271_v18, 0.0  ;;  %v1280_v22 = vmax.f32 %v1272_v19, 0.0  ;;  %v6027_v14 = vld [vmem:[%s12073_s5 + $0x668] sm:$0xf] }
 0x22d   : > { %v1302_v24 = vrot.slane %v1273_v20, 7  ;;  %v1303_v25 = vrot.slane %v1274_v21, 7  ;;  %v1304_v28 = vrot.slane %v1275_v61, 7  ;;  %v1305_v29 = vrot.slane %v1276_v2, 7  ;;  %v7924_v15 = vld [vmem:[%s12073_s5 + $0x674] sm:$0xf0] }
 0x22e   : > { %v1306_v30 = vrot.slane %v1277_v62, 7  ;;  %v1308_v31 = vrot.slane %v1278_v5, 7  ;;  %v1310_v32 = vrot.slane %v1279_v8, 7  ;;  %v1312_v33 = vrot.slane %v1280_v22, 7  ;;  %v7981_v5 = vld [vmem:[%s12073_s5 + $0x844] sm:$0xf] }
 0x22f   : > { %1326 = vst [vmem:[#allocation3] sm:$0xfe] %v1302_v24  ;;  %v1281_v26 = vlaneseq  ;;  %v6280_v62 = vor.u32 %v7985_v54, %v6277_v50  ;;  %v6261_v8 = vld [vmem:[%s12073_s5 + $0x850] sm:$0xf0]  ;;  %v7884_v54 = vld [vmem:[%s12073_s5 + $0x534] sm:$0xf0] }
 0x230   : > { %v1307_v37 = vsel %vm965_vm4, %v1302_v24, %v1306_v30  ;;  %1327 = vst [vmem:[#allocation3 + $0x8] sm:$0xfe] %v1303_v25  ;;  %v1309_v38 = vsel %vm965_vm4, %v1303_v25, %v1308_v31  ;;  %v1311_v41 = vsel %vm965_vm4, %v1304_v28, %v1310_v32  ;;  %v1313_v42 = vsel %vm965_vm4, %v1305_v29, %v1312_v33  ;;  %v5995_v50 = vld [vmem:[%s12073_s5 + $0x628] sm:$0xf] }
 0x231   : > { %1328 = vst [vmem:[#allocation3 + $0x10] sm:$0xfe] %v1304_v28  ;;  %vm9294_vm10 = vcmp.lt.s32.totalorder %v1281_v26, 576  ;;  %v6344_v25 = vor.u32 %v8001_v63, %v6341_v0  ;;  %v1347_v28 = vld [vmem:[#allocation3 + $0x48] sm:$0xff]  ;;  %v7973_v0 = vld [vmem:[%s12073_s5 + $0x804] sm:$0xf] }
 0x232   : > { %1329 = vst [vmem:[#allocation3 + $0x18] sm:$0xfe] %v1305_v29 }
 0x233   : > { %1330 = vst [vmem:[#allocation3 + $0x28] sm:$0xff] %v1307_v37 }
 0x234   : > { %1331 = vst [vmem:[#allocation3 + $0x30] sm:$0xff] %v1309_v38 }
 0x235   : > { %1332 = vst [vmem:[#allocation3 + $0x38] sm:$0xff] %v1311_v41 }
 0x236   : > { %1333 = vst [vmem:[#allocation3 + $0x40] sm:$0xff] %v1313_v42  ;;  %v1497_v43 = vld [vmem:[#allocation3] sm:$0xfe] }
 0x237   : > { %1334 = vst [vmem:[#allocation3 + $0x50] sm:$0x1] %v1306_v30  ;;  %v1507_v44 = vpack.c.bf16 %v1307_v37, %v1497_v43  ;;  %v1498_v10 = vld [vmem:[#allocation3 + $0x8] sm:$0xfe] }
 0x238   : > { %1335 = vst [vmem:[#allocation3 + $0x58] sm:$0x1] %v1308_v31  ;;  %v1508_v11 = vpack.c.bf16 %v1309_v38, %v1498_v10  ;;  %v1499_v46 = vld [vmem:[#allocation3 + $0x10] sm:$0xfe]  ;;  %v5900_v31 = vor.u32 %v7892_v6, %v5899_v40  ;;  %v6028_v38 = vor.u32 %v7924_v15, %v6027_v14  ;;  %v6011_v10 = vld [vmem:[%s12073_s5 + $0x648] sm:$0xf] }
 0x239   : > { %1336 = vst [vmem:[#allocation3 + $0x60] sm:$0x1] %v1310_v32  ;;  %v1666_v27 = vshll.u32 %v1507_v44, 16  ;;  %v1509_v47 = vpack.c.bf16 %v1311_v41, %v1499_v46  ;;  %v1500_v49 = vld [vmem:[#allocation3 + $0x18] sm:$0xfe]  ;;  %v1664_v57 = vshrl.u32 %v1507_v44, 16  ;;  %v6264_v44 = vor.u32 %v7981_v5, %v6261_v8 }
 0x23a   : > { %1337 = vst [vmem:[#allocation3 + $0x68] sm:$0x1] %v1312_v33  ;;  %v1678_v16 = vshll.u32 %v1508_v11, 16  ;;  %v1510_v51 = vpack.c.bf16 %v1313_v42, %v1500_v49  ;;  %v1676_v59 = vshrl.u32 %v1508_v11, 16  ;;  %v7997_v32 = vld [vmem:[%s12073_s5 + $0x8c4] sm:$0xf] }
 0x23b   : > { %v1690_v52 = vshll.u32 %v1509_v47, 16  ;;  %v1668_v45 = vrot.slane %v1666_v27, 1  ;;  %1286 = vst.msk [vmem:[#allocation3] ss:$8 sm:$0x10] %vm9294_vm10, %v8180_v56  ;;  %v1688_v17 = vshrl.u32 %v1509_v47, 16 }
 0x23c   : > { %v1702_v53 = vshll.u32 %v1510_v51, 16  ;;  %v1680_v48 = vrot.slane %v1678_v16, 1  ;;  %1289 = vst.msk [vmem:[#allocation3 + $0x51] ss:$8 sm:$0x10] %vm9294_vm10, %v8180_v56  ;;  %v1700_v21 = vshrl.u32 %v1510_v51, 16 }
 0x23d   : > { %v1692_v60 = vrot.slane %v1690_v52, 1  ;;  %1290 = vst.msk [vmem:[#allocation3 + $0x20] sm:$0xff] %vm341_vm3, %v8180_v56  ;;  %v1669_v7 = vor.u32 %v1668_v45, %v1664_v57  ;;  %v6325_v33 = vld [vmem:[%s12073_s5 + $0x8d0] sm:$0xf0]  ;;  %v7888_v41 = vld [vmem:[%s12073_s5 + $0x554] sm:$0xf0] }
 0x23e   : > { %v1502_v36 = vld [vmem:[#allocation3 + $0x50] sm:$0x1]  ;;  %v1704_v39 = vrot.slane %v1702_v53, 1  ;;  %1293 = vst.msk [vmem:[#allocation3 + $0x70] sm:$0x3] %vm1292_vm11, %v8180_v56  ;;  %v1681_v18 = vor.u32 %v1680_v48, %v1676_v59  ;;  %v6328_v47 = vor.u32 %v7997_v32, %v6325_v33 }
 0x23f   : > { %v1512_v55 = vpack.c.bf16 %v1502_v36, %v1502_v36  ;;  %v1503_v58 = vld [vmem:[#allocation3 + $0x58] sm:$0x1]  ;;  %1285 = vst.msk [vmem:[#allocation3] ss:$8 sm:$0xf] %vm9294_vm10, %v8180_v56  ;;  %v1693_v2 = vor.u32 %v1692_v60, %v1688_v17 }
 0x240   : > { %v1513_v1 = vpack.c.bf16 %v1503_v58, %v1503_v58  ;;  %v1504_v4 = vld [vmem:[#allocation3 + $0x60] sm:$0x1]  ;;  %1288 = vst.msk [vmem:[#allocation3 + $0x51] ss:$8 sm:$0xf] %vm9294_vm10, %v8180_v56  ;;  %v1705_v23 = vor.u32 %v1704_v39, %v1700_v21 }
 0x241   : > { %v1671_v9 = vshll.u32 %v1512_v55, 16  ;;  %v1514_v12 = vpack.c.bf16 %v1504_v4, %v1504_v4  ;;  %v1505_v13 = vld [vmem:[#allocation3 + $0x68] sm:$0x1]  ;;  %v7920_v11 = vld [vmem:[%s12073_s5 + $0x654] sm:$0xf0] }
 0x242   : > { %v1683_v19 = vshll.u32 %v1513_v1, 16  ;;  %v1515_v20 = vpack.c.bf16 %v1505_v13, %v1505_v13  ;;  %v5883_v56 = vld [vmem:[%s12073_s5 + $0x548] sm:$0xf]  ;;  %v7977_v49 = vld [vmem:[%s12073_s5 + $0x824] sm:$0xf]  ;;  %v6012_v36 = vor.u32 %v7920_v11, %v6011_v10 }
 0x243   : > { %v1673_v61 = vrot.slane %v1671_v9, 1  ;;  %v1695_v3 = vshll.u32 %v1514_v12, 16  ;;  %v6245_v16 = vld [vmem:[%s12073_s5 + $0x830] sm:$0xf0]  ;;  %v5884_v52 = vor.u32 %v7888_v41, %v5883_v56  ;;  %v7993_v53 = vld [vmem:[%s12073_s5 + $0x8a4] sm:$0xf] }
 0x244   : > { %v1685_v22 = vrot.slane %v1683_v19, 1  ;;  %v1707_v24 = vshll.u32 %v1515_v20, 16  ;;  %v1501_v42 = vld [vmem:[#allocation3 + $0x20] sm:$0xfe]  ;;  %v5867_v48 = vld [vmem:[%s12073_s5 + $0x528] sm:$0xf]  ;;  %v6248_v55 = vor.u32 %v7977_v49, %v6245_v16  ;;  %v6312_v63 = vor.u32 %v7993_v53, %v6309_v35 }
 0x245   : > { %v9348_v29 = vsel %vm1662_vm9, %v1669_v7, %v1673_v61  ;;  %v1697_v30 = vrot.slane %v1695_v3, 1  ;;  %v1506_v46 = vld [vmem:[#allocation3 + $0x70] sm:$0x1]  ;;  %v1511_v26 = vpack.c.bf16 %v1347_v28, %v1501_v42  ;;  %v7916_v57 = vld [vmem:[%s12073_s5 + $0x634] sm:$0xf0]  ;;  %v5868_v4 = vor.u32 %v7884_v54, %v5867_v48 }
 0x246   : > { %2458 = vmatmul.bf16.vlgmr.msrb.gmra.mxu0 %v9348_v29  ;;  %v9358_v34 = vsel %vm1662_vm9, %v1681_v18, %v1685_v22  ;;  %v1709_v37 = vrot.slane %v1707_v24, 1  ;;  %v1516_v51 = vpack.c.bf16 %v1506_v46, %v1506_v46  ;;  %v6229_v1 = vld [vmem:[%s12073_s5 + $0x810] sm:$0xf0]  ;;  %v7989_v17 = vld [vmem:[%s12073_s5 + $0x884] sm:$0xf]  ;;  %v5996_v40 = vor.u32 %v7916_v57, %v5995_v50 }
 0x247   : > { %2472 = vmatmul.bf16.vlgmr.msrb.gmra.mxu1 %v9358_v34  ;;  %v9365_v43 = vsel %vm1662_vm9, %v1693_v2, %v1697_v30  ;;  %2562 = vmatpush.bf16.msrb.mxu0 %v6280_v62  ;;  %v1714_v45 = vshll.u32 %v1511_v26, 16  ;;  %v1712_v58 = vshrl.u32 %v1511_v26, 16  ;;  %v6293_v39 = vld [vmem:[%s12073_s5 + $0x890] sm:$0xf0]  ;;  %v5851_v6 = vld [vmem:[%s12073_s5 + $0x508] sm:$0xf]  ;;  %v6232_v9 = vor.u32 %v7973_v0, %v6229_v1 }
 0x248   : > { %2486 = vmatmul.bf16.vlgmr.msrb.gmra.mxu2 %v9365_v43  ;;  %v9375_v27 = vsel %vm1662_vm9, %v1705_v23, %v1709_v37  ;;  %2580 = vmatpush.bf16.msrb.mxu1 %v6344_v25  ;;  %v1719_v60 = vshll.u32 %v1516_v51, 16  ;;  %v7880_v7 = vld [vmem:[%s12073_s5 + $0x514] sm:$0xf0]  ;;  %v5979_v12 = vld [vmem:[%s12073_s5 + $0x608] sm:$0xf]  ;;  %v6296_v18 = vor.u32 %v7989_v17, %v6293_v39 }
 0x249   : > { %2500 = vmatmul.bf16.vlgmr.msrb.gmra.mxu3 %v9375_v27  ;;  %2590 = vmatpush.bf16.msrb.mxu2 %v5900_v31  ;;  %v1716_v59 = vrot.slane %v1714_v45, 1  ;;  %v7912_v13 = vld [vmem:[%s12073_s5 + $0x614] sm:$0xf0]  ;;  %v7969_v19 = vld [vmem:[%s12073_s5 + $0x7e4] sm:$0xf]  ;;  %v5852_v21 = vor.u32 %v7880_v7, %v5851_v6 }
 0x24a   : > { %2604 = vmatpush.bf16.msrb.mxu3 %v6028_v38  ;;  %v1721_v15 = vrot.slane %v1719_v60, 1  ;;  %v6213_v20 = vld [vmem:[%s12073_s5 + $0x7f0] sm:$0xf0]  ;;  %v6283_v61 = vld [vmem:[%s12073_s5 + $0x868] sm:$0xf]  ;;  %v5980_v3 = vor.u32 %v7912_v13, %v5979_v12 }
 0x24b   : > { %2563 = vmatpush.bf16.msrb.mxu0 %v6264_v44  ;;  %v1717_v14 = vor.u32 %v1716_v59, %v1712_v58  ;;  %v7988_v2 = vld [vmem:[%s12073_s5 + $0x874] sm:$0xf0]  ;;  %v5835_v62 = vld [vmem:[%s12073_s5 + $0x4e8] sm:$0xf]  ;;  %v6216_v22 = vor.u32 %v7969_v19, %v6213_v20  ;;  %v7965_v56 = vld [vmem:[%s12073_s5 + $0x7c4] sm:$0xf] }
 0x24c   : > { %2581 = vmatpush.bf16.msrb.mxu1 %v6328_v47  ;;  %v7876_v5 = vld [vmem:[%s12073_s5 + $0x4f4] sm:$0xf0]  ;;  %v5963_v23 = vld [vmem:[%s12073_s5 + $0x5e8] sm:$0xf]  ;;  %v6284_v25 = vor.u32 %v7988_v2, %v6283_v61  ;;  %v6197_v28 = vld [vmem:[%s12073_s5 + $0x7d0] sm:$0xf0] }
 0x24d   : > { %2591 = vmatpush.bf16.msrb.mxu2 %v5884_v52  ;;  %v9445_v8 = vsel %vm1662_vm9, %v1717_v14, %v1721_v15  ;;  %v7908_v24 = vld [vmem:[%s12073_s5 + $0x5f4] sm:$0xf0]  ;;  %v5836_v30 = vor.u32 %v7876_v5, %v5835_v62  ;;  %v6267_v31 = vld [vmem:[%s12073_s5 + $0x848] sm:$0xf]  ;;  %v6200_v41 = vor.u32 %v7965_v56, %v6197_v28  ;;  %v7961_v11 = vld [vmem:[%s12073_s5 + $0x7a4] sm:$0xf] }
 0x24e   : > { %2605 = vmatpush.bf16.msrb.mxu3 %v6012_v36  ;;  %v7984_v32 = vld [vmem:[%s12073_s5 + $0x854] sm:$0xf0]  ;;  %v5964_v33 = vor.u32 %v7908_v24, %v5963_v23  ;;  %v5819_v37 = vld [vmem:[%s12073_s5 + $0x4c8] sm:$0xf]  ;;  %v6181_v46 = vld [vmem:[%s12073_s5 + $0x7b0] sm:$0xf0] }
 0x24f   : > { %2564 = vmatpush.bf16.msrb.mxu0 %v6248_v55  ;;  %v7872_v38 = vld [vmem:[%s12073_s5 + $0x4d4] sm:$0xf0]  ;;  %v5947_v42 = vld [vmem:[%s12073_s5 + $0x5c8] sm:$0xf]  ;;  %v6268_v10 = vor.u32 %v7984_v32, %v6267_v31  ;;  %v6184_v53 = vor.u32 %v7961_v11, %v6181_v46  ;;  %v7957_v48 = vld [vmem:[%s12073_s5 + $0x784] sm:$0xf] }
 0x250   : > { %2582 = vmatpush.bf16.msrb.mxu1 %v6312_v63  ;;  %v7904_v44 = vld [vmem:[%s12073_s5 + $0x5d4] sm:$0xf0]  ;;  %v5820_v26 = vor.u32 %v7872_v38, %v5819_v37  ;;  %v6251_v47 = vld [vmem:[%s12073_s5 + $0x828] sm:$0xf]  ;;  %v6165_v54 = vld [vmem:[%s12073_s5 + $0x790] sm:$0xf0] }
 0x251   : > { %2592 = vmatpush.bf16.msrb.mxu2 %v5868_v4  ;;  %v7980_v49 = vld [vmem:[%s12073_s5 + $0x834] sm:$0xf0]  ;;  %v5948_v16 = vor.u32 %v7904_v44, %v5947_v42  ;;  %v5803_v51 = vld [vmem:[%s12073_s5 + $0x4a8] sm:$0xf]  ;;  %v6168_v4 = vor.u32 %v7957_v48, %v6165_v54  ;;  %v5901_v12 = vld [vmem:[%s12073_s5 + $0x578] sm:$0xf0] }
 0x252   : > { %2606 = vmatpush.bf16.msrb.mxu3 %v5996_v40  ;;  %v7868_v52 = vld [vmem:[%s12073_s5 + $0x4b4] sm:$0xf0]  ;;  %v5931_v35 = vld [vmem:[%s12073_s5 + $0x5a8] sm:$0xf]  ;;  %v6252_v36 = vor.u32 %v7980_v49, %v6251_v47  ;;  %v7886_v62 = vld [vmem:[%s12073_s5 + $0x54c] sm:$0xf] }
 0x253   : > { %2565 = vmatpush.bf16.msrb.mxu0 %v6232_v9  ;;  %v7900_v45 = vld [vmem:[%s12073_s5 + $0x5b4] sm:$0xf0]  ;;  %v6235_v50 = vld [vmem:[%s12073_s5 + $0x808] sm:$0xf]  ;;  %v5804_v55 = vor.u32 %v7868_v52, %v5803_v51  ;;  %v7890_v9 = vld [vmem:[%s12073_s5 + $0x56c] sm:$0xf] }
 0x254   : > { %2583 = vmatpush.bf16.msrb.mxu1 %v6296_v18  ;;  %v7976_v57 = vld [vmem:[%s12073_s5 + $0x814] sm:$0xf0]  ;;  %v6155_v58 = vld [vmem:[%s12073_s5 + $0x768] sm:$0xf]  ;;  %v5932_v60 = vor.u32 %v7900_v45, %v5931_v35  ;;  %v5885_v5 = vld [vmem:[%s12073_s5 + $0x558] sm:$0xf0] }
 0x255   : > { %2593 = vmatpush.bf16.msrb.mxu2 %v5852_v21  ;;  %v7956_v59 = vld [vmem:[%s12073_s5 + $0x774] sm:$0xf0]  ;;  %v5787_v63 = vld [vmem:[%s12073_s5 + $0x488] sm:$0xf]  ;;  %v6236_v6 = vor.u32 %v7976_v57, %v6235_v50  ;;  %v5904_v21 = vor.u32 %v7890_v9, %v5901_v12  ;;  %v7882_v37 = vld [vmem:[%s12073_s5 + $0x52c] sm:$0xf] }
 0x256   : > { %2607 = vmatpush.bf16.msrb.mxu3 %v5980_v3  ;;  %6353 = vmatmul.msk.bf16.vlgmr.msra.gmra.mxu0 %vm341_vm3, %v9445_v8  ;;  %v7864_v0 = vld [vmem:[%s12073_s5 + $0x494] sm:$0xf0]  ;;  %v5915_v1 = vld [vmem:[%s12073_s5 + $0x588] sm:$0xf]  ;;  %v6156_v7 = vor.u32 %v7956_v59, %v6155_v58  ;;  %v5869_v38 = vld [vmem:[%s12073_s5 + $0x538] sm:$0xf0] }
 0x257   : > { %2528 = vmatmul.bf16.vlgmr.msra.gmra.mxu1 %v9348_v29  ;;  %2566 = vmatpush.bf16.msrb.mxu0 %v6216_v22  ;;  %v7896_v17 = vld [vmem:[%s12073_s5 + $0x594] sm:$0xf0]  ;;  %v6347_v39 = vld [vmem:[%s12073_s5 + $0x8e8] sm:$0xf]  ;;  %v5788_v13 = vor.u32 %v7864_v0, %v5787_v63  ;;  %v5872_v47 = vor.u32 %v7882_v37, %v5869_v38  ;;  %v7878_v51 = vld [vmem:[%s12073_s5 + $0x50c] sm:$0xf] }
 0x258   : > { %2542 = vmatmul.bf16.vlgmr.msra.gmra.mxu2 %v9358_v34  ;;  %2632 = vmatpush.bf16.msra.mxu1 %v6284_v25  ;;  %v8004_v40 = vld [vmem:[%s12073_s5 + $0x8f4] sm:$0xf0]  ;;  %v5916_v14 = vor.u32 %v7896_v17, %v5915_v1  ;;  %v6219_v18 = vld [vmem:[%s12073_s5 + $0x7e8] sm:$0xf]  ;;  %v5853_v52 = vld [vmem:[%s12073_s5 + $0x518] sm:$0xf0] }
 0x259   : > { %2556 = vmatmul.bf16.vlgmr.msra.gmra.mxu3 %v9365_v43  ;;  %2594 = vmatpush.bf16.msrb.mxu2 %v5836_v30  ;;  %v6348_v15 = vor.u32 %v8004_v40, %v6347_v39  ;;  %v7972_v19 = vld [vmem:[%s12073_s5 + $0x7f4] sm:$0xf0]  ;;  %v6139_v20 = vld [vmem:[%s12073_s5 + $0x748] sm:$0xf]  ;;  %v5888_v30 = vor.u32 %v7886_v62, %v5885_v5  ;;  %v6285_v35 = vld [vmem:[%s12073_s5 + $0x878] sm:$0xf0]  ;;  %v5856_v58 = vor.u32 %v7878_v51, %v5853_v52 }
 0x25a   : > { %2608 = vmatpush.bf16.msrb.mxu3 %v5964_v33  ;;  %v7952_v61 = vld [vmem:[%s12073_s5 + $0x754] sm:$0xf0]  ;;  %v6331_v2 = vld [vmem:[%s12073_s5 + $0x8c8] sm:$0xf]  ;;  %v6220_v22 = vor.u32 %v7972_v19, %v6219_v18  ;;  %v7954_v63 = vld [vmem:[%s12073_s5 + $0x76c] sm:$0xf] }
 0x25b   : > { %2567 = vmatpush.bf16.msrb.mxu0 %v6200_v41  ;;  %v8000_v3 = vld [vmem:[%s12073_s5 + $0x8d4] sm:$0xf0]  ;;  %v6140_v23 = vor.u32 %v7952_v61, %v6139_v20  ;;  %v6203_v25 = vld [vmem:[%s12073_s5 + $0x7c8] sm:$0xf]  ;;  %v6157_v0 = vld [vmem:[%s12073_s5 + $0x778] sm:$0xf0] }
 0x25c   : > { %2633 = vmatpush.bf16.msra.mxu1 %v6268_v10  ;;  %v6332_v24 = vor.u32 %v8000_v3, %v6331_v2  ;;  %v7968_v56 = vld [vmem:[%s12073_s5 + $0x7d4] sm:$0xf0]  ;;  %v6123_v28 = vld [vmem:[%s12073_s5 + $0x728] sm:$0xf]  ;;  %v5837_v1 = vld [vmem:[%s12073_s5 + $0x4f8] sm:$0xf0] }
 0x25d   : > { %2595 = vmatpush.bf16.msrb.mxu2 %v5820_v26  ;;  %v7948_v31 = vld [vmem:[%s12073_s5 + $0x734] sm:$0xf0]  ;;  %v6315_v32 = vld [vmem:[%s12073_s5 + $0x8a8] sm:$0xf]  ;;  %v6204_v41 = vor.u32 %v7968_v56, %v6203_v25  ;;  %v6269_v17 = vld [vmem:[%s12073_s5 + $0x858] sm:$0xf0] }
 0x25e   : > { %2609 = vmatpush.bf16.msrb.mxu3 %v5948_v16  ;;  %v7996_v33 = vld [vmem:[%s12073_s5 + $0x8b4] sm:$0xf0]  ;;  %v6187_v42 = vld [vmem:[%s12073_s5 + $0x7a8] sm:$0xf]  ;;  %v6124_v44 = vor.u32 %v7948_v31, %v6123_v28  ;;  %v6141_v18 = vld [vmem:[%s12073_s5 + $0x758] sm:$0xf0] }
 0x25f   : > { %2568 = vmatpush.bf16.msrb.mxu0 %v6184_v53  ;;  %v6316_v10 = vor.u32 %v7996_v33, %v6315_v32  ;;  %v7964_v11 = vld [vmem:[%s12073_s5 + $0x7b4] sm:$0xf0]  ;;  %v6107_v46 = vld [vmem:[%s12073_s5 + $0x708] sm:$0xf]  ;;  %v7986_v53 = vld [vmem:[%s12073_s5 + $0x86c] sm:$0xf] }
 0x260   : > { %2634 = vmatpush.bf16.msra.mxu1 %v6252_v36  ;;  %v7944_v26 = vld [vmem:[%s12073_s5 + $0x714] sm:$0xf0]  ;;  %v6299_v49 = vld [vmem:[%s12073_s5 + $0x888] sm:$0xf]  ;;  %v6188_v45 = vor.u32 %v7964_v11, %v6187_v42  ;;  %v6288_v59 = vor.u32 %v7986_v53, %v6285_v35  ;;  %v5821_v19 = vld [vmem:[%s12073_s5 + $0x4d8] sm:$0xf0] }
 0x261   : > { %2596 = vmatpush.bf16.msrb.mxu2 %v5804_v55  ;;  %v7992_v16 = vld [vmem:[%s12073_s5 + $0x894] sm:$0xf0]  ;;  %v6171_v36 = vld [vmem:[%s12073_s5 + $0x788] sm:$0xf]  ;;  %v6108_v48 = vor.u32 %v7944_v26, %v6107_v46  ;;  %v7978_v20 = vld [vmem:[%s12073_s5 + $0x82c] sm:$0xf] }
 0x262   : > { %2610 = vmatpush.bf16.msrb.mxu3 %v5932_v60  ;;  %v6300_v54 = vor.u32 %v7992_v16, %v6299_v49  ;;  %v7960_v50 = vld [vmem:[%s12073_s5 + $0x794] sm:$0xf0]  ;;  %v6091_v55 = vld [vmem:[%s12073_s5 + $0x6e8] sm:$0xf]  ;;  %v7874_v60 = vld [vmem:[%s12073_s5 + $0x4ec] sm:$0xf] }
 0x263   : > { %2569 = vmatpush.bf16.msrb.mxu0 %v6168_v4  ;;  %v7940_v57 = vld [vmem:[%s12073_s5 + $0x6f4] sm:$0xf0]  ;;  %v7982_v4 = vld [vmem:[%s12073_s5 + $0x84c] sm:$0xf]  ;;  %v6172_v39 = vor.u32 %v7960_v50, %v6171_v36  ;;  %v5840_v12 = vor.u32 %v7874_v60, %v5837_v1  ;;  %v6059_v3 = vld [vmem:[%s12073_s5 + $0x6a8] sm:$0xf] }
 0x264   : > { %2635 = vmatpush.bf16.msra.mxu1 %v6236_v6  ;;  %v6092_v40 = vor.u32 %v7940_v57, %v6091_v55  ;;  %v6160_v6 = vor.u32 %v7954_v63, %v6157_v0  ;;  %v7936_v9 = vld [vmem:[%s12073_s5 + $0x6d4] sm:$0xf0]  ;;  %v6125_v25 = vld [vmem:[%s12073_s5 + $0x738] sm:$0xf0]  ;;  %v7974_v28 = vld [vmem:[%s12073_s5 + $0x80c] sm:$0xf] }
 0x265   : > { %2597 = vmatpush.bf16.msrb.mxu2 %v5788_v13  ;;  %v6272_v13 = vor.u32 %v7982_v4, %v6269_v17  ;;  %v7932_v62 = vld [vmem:[%s12073_s5 + $0x6b4] sm:$0xf0]  ;;  %v5805_v56 = vld [vmem:[%s12073_s5 + $0x4b8] sm:$0xf0]  ;;  %v6043_v33 = vld [vmem:[%s12073_s5 + $0x688] sm:$0xf] }
 0x266   : > { %2611 = vmatpush.bf16.msrb.mxu3 %v5916_v14  ;;  %2570 = vmatmul.bf16.vlgmr.msrb.gmra.mxu0 %v9375_v27  ;;  %v7870_v14 = vld [vmem:[%s12073_s5 + $0x4cc] sm:$0xf]  ;;  %v6060_v31 = vor.u32 %v7932_v62, %v6059_v3  ;;  %v7928_v37 = vld [vmem:[%s12073_s5 + $0x694] sm:$0xf0]  ;;  %v6109_v11 = vld [vmem:[%s12073_s5 + $0x718] sm:$0xf0] }
 0x267   : > { %2618 = vmatpush.bf16.msra.mxu0 %v6156_v7  ;;  %6354 = vmatmul.msk.bf16.vlgmr.msrb.gmra.mxu1 %vm341_vm3, %v9445_v8  ;;  %v6075_v7 = vld [vmem:[%s12073_s5 + $0x6c8] sm:$0xf]  ;;  %v5824_v5 = vor.u32 %v7870_v14, %v5821_v19  ;;  %v7862_v38 = vld [vmem:[%s12073_s5 + $0x48c] sm:$0xf]  ;;  %v6029_v26 = vld [vmem:[%s12073_s5 + $0x678] sm:$0xf0]  ;;  %v6044_v52 = vor.u32 %v7928_v37, %v6043_v33 }
 0x268   : > { %2598 = vmatmul.bf16.vlgmr.msrb.gmra.mxu2 %v9348_v29  ;;  %2636 = vmatpush.bf16.msra.mxu1 %v6220_v22  ;;  %v6076_v61 = vor.u32 %v7936_v9, %v6075_v7  ;;  %v7922_v46 = vld [vmem:[%s12073_s5 + $0x66c] sm:$0xf]  ;;  %v6221_v49 = vld [vmem:[%s12073_s5 + $0x7f8] sm:$0xf0] }
 0x269   : > { %2650 = vmatpush.bf16.msra.mxu2 %v6348_v15  ;;  %2612 = vmatmul.bf16.vlgmr.msrb.gmra.mxu3 %v9358_v34  ;;  %v7950_v15 = vld [vmem:[%s12073_s5 + $0x74c] sm:$0xf]  ;;  %v6349_v51 = vld [vmem:[%s12073_s5 + $0x8f8] sm:$0xf0] }
 0x26a   : > { %2660 = vmatpush.bf16.msra.mxu3 %v5904_v21  ;;  %v6253_v21 = vld [vmem:[%s12073_s5 + $0x838] sm:$0xf0]  ;;  %v6144_v2 = vor.u32 %v7950_v15, %v6141_v18  ;;  %v8002_v16 = vld [vmem:[%s12073_s5 + $0x8ec] sm:$0xf] }
 0x26b   : > { %2619 = vmatpush.bf16.msra.mxu0 %v6140_v23  ;;  %v6256_v22 = vor.u32 %v7978_v20, %v6253_v21  ;;  %v7866_v23 = vld [vmem:[%s12073_s5 + $0x4ac] sm:$0xf]  ;;  %v6352_v50 = vor.u32 %v8002_v16, %v6349_v51  ;;  %v6013_v57 = vld [vmem:[%s12073_s5 + $0x658] sm:$0xf0]  ;;  %v7839_v16 = vld [vmem:[%s12073_s5 + $0x3cc] sm:$0xf0] }
 0x26c   : > { %2637 = vmatpush.bf16.msra.mxu1 %v6204_v41  ;;  %v5808_v41 = vor.u32 %v7866_v23, %v5805_v56  ;;  %v7938_v36 = vld [vmem:[%s12073_s5 + $0x6ec] sm:$0xf]  ;;  %v6333_v63 = vld [vmem:[%s12073_s5 + $0x8d8] sm:$0xf0]  ;;  %v6727_v23 = vld [vmem:[%s12073_s5 + $0x2e0] sm:$0xf] }
 0x26d   : > { %2651 = vmatpush.bf16.msra.mxu2 %v6332_v24  ;;  %v7946_v24 = vld [vmem:[%s12073_s5 + $0x72c] sm:$0xf]  ;;  %v6077_v17 = vld [vmem:[%s12073_s5 + $0x6d8] sm:$0xf0]  ;;  %v6855_v56 = vld [vmem:[%s12073_s5 + $0x3e0] sm:$0xf] }
 0x26e   : > { %2661 = vmatpush.bf16.msra.mxu3 %v5888_v30  ;;  %v6237_v30 = vld [vmem:[%s12073_s5 + $0x818] sm:$0xf0]  ;;  %v6128_v32 = vor.u32 %v7946_v24, %v6125_v25  ;;  %v7918_v55 = vld [vmem:[%s12073_s5 + $0x64c] sm:$0xf]  ;;  %v7811_v25 = vld [vmem:[%s12073_s5 + $0x2ec] sm:$0xf0] }
 0x26f   : > { %2620 = vmatpush.bf16.msra.mxu0 %v6124_v44  ;;  %v6240_v42 = vor.u32 %v7974_v28, %v6237_v30  ;;  %v5789_v44 = vld [vmem:[%s12073_s5 + $0x498] sm:$0xf0]  ;;  %v7998_v60 = vld [vmem:[%s12073_s5 + $0x8cc] sm:$0xf]  ;;  %v6016_v1 = vor.u32 %v7918_v55, %v6013_v57  ;;  %v7843_v28 = vld [vmem:[%s12073_s5 + $0x3ec] sm:$0xf0] }
 0x270   : > { %2638 = vmatpush.bf16.msra.mxu1 %v6188_v45  ;;  %v5792_v35 = vor.u32 %v7862_v38, %v5789_v44  ;;  %v6032_v45 = vor.u32 %v7922_v46, %v6029_v26  ;;  %v7934_v4 = vld [vmem:[%s12073_s5 + $0x6cc] sm:$0xf]  ;;  %v5997_v7 = vld [vmem:[%s12073_s5 + $0x638] sm:$0xf0]  ;;  %v6856_v44 = vor.u32 %v7843_v28, %v6855_v56  ;;  %v6711_v46 = vld [vmem:[%s12073_s5 + $0x2c0] sm:$0xf] }
 0x271   : > { %2652 = vmatpush.bf16.msra.mxu2 %v6316_v10  ;;  %v7942_v10 = vld [vmem:[%s12073_s5 + $0x70c] sm:$0xf]  ;;  %v6317_v14 = vld [vmem:[%s12073_s5 + $0x8b8] sm:$0xf0]  ;;  %v6080_v15 = vor.u32 %v7934_v4, %v6077_v17  ;;  %v7803_v55 = vld [vmem:[%s12073_s5 + $0x2ac] sm:$0xf0] }
 0x272   : > { %2662 = vmatpush.bf16.msra.mxu3 %v5872_v47  ;;  %v7970_v47 = vld [vmem:[%s12073_s5 + $0x7ec] sm:$0xf]  ;;  %v6112_v53 = vor.u32 %v7942_v10, %v6109_v11  ;;  %v6061_v20 = vld [vmem:[%s12073_s5 + $0x6b8] sm:$0xf0]  ;;  %v6599_v10 = vld [vmem:[%s12073_s5 + $0x1e0] sm:$0xf] }
 0x273   : > { %2621 = vmatpush.bf16.msra.mxu0 %v6108_v48  ;;  %v6093_v48 = vld [vmem:[%s12073_s5 + $0x6f8] sm:$0xf0]  ;;  %v7962_v9 = vld [vmem:[%s12073_s5 + $0x7ac] sm:$0xf]  ;;  %v7779_v11 = vld [vmem:[%s12073_s5 + $0x1ec] sm:$0xf0] }
 0x274   : > { %2639 = vmatpush.bf16.msra.mxu1 %v6172_v39  ;;  %v6096_v0 = vor.u32 %v7938_v36, %v6093_v48  ;;  %v7930_v19 = vld [vmem:[%s12073_s5 + $0x6ac] sm:$0xf]  ;;  %v6173_v62 = vld [vmem:[%s12073_s5 + $0x798] sm:$0xf0]  ;;  %v6583_v48 = vld [vmem:[%s12073_s5 + $0x1c0] sm:$0xf] }
 0x275   : > { %2653 = vmatpush.bf16.msra.mxu2 %v6300_v54  ;;  %v6224_v54 = vor.u32 %v7970_v47, %v6221_v49  ;;  %v7910_v21 = vld [vmem:[%s12073_s5 + $0x60c] sm:$0xf]  ;;  %v6064_v24 = vor.u32 %v7930_v19, %v6061_v20  ;;  %v7807_v47 = vld [vmem:[%s12073_s5 + $0x2cc] sm:$0xf0]  ;;  %v6839_v49 = vld [vmem:[%s12073_s5 + $0x3c0] sm:$0xf] }
 0x276   : > { %2663 = vmatpush.bf16.msra.mxu3 %v5856_v58  ;;  %v7966_v58 = vld [vmem:[%s12073_s5 + $0x7cc] sm:$0xf]  ;;  %v6840_v36 = vor.u32 %v7839_v16, %v6839_v49  ;;  %v6823_v57 = vld [vmem:[%s12073_s5 + $0x3a0] sm:$0xf]  ;;  %v7771_v17 = vld [vmem:[%s12073_s5 + $0x1ac] sm:$0xf0] }
 0x277   : > { %2622 = vmatpush.bf16.msra.mxu0 %v6092_v40  ;;  %2640 = vmatmul.bf16.vlgmr.msra.gmra.mxu1 %v9375_v27  ;;  %v6336_v40 = vor.u32 %v7998_v60, %v6333_v63  ;;  %v7958_v3 = vld [vmem:[%s12073_s5 + $0x78c] sm:$0xf]  ;;  %v6471_v19 = vld [vmem:[%s12073_s5 + $0xe0] sm:$0xf]  ;;  %v7747_v20 = vld [vmem:[%s12073_s5 + $0xec] sm:$0xf0] }
 0x278   : > { %2688 = vmatpush.bf16.msrb.mxu1 %v6160_v6  ;;  %6355 = vmatmul.msk.bf16.vlgmr.msra.gmra.mxu2 %vm341_vm3, %v9445_v8  ;;  %v7914_v6 = vld [vmem:[%s12073_s5 + $0x62c] sm:$0xf]  ;;  %v6176_v33 = vor.u32 %v7958_v3, %v6173_v62  ;;  %v6455_v56 = vld [vmem:[%s12073_s5 + $0xc0] sm:$0xf]  ;;  %v7743_v28 = vld [vmem:[%s12073_s5 + $0xcc] sm:$0xf0] }
 0x279   : > { %2702 = vmatpush.bf16.msrb.mxu2 %v6288_v59  ;;  %v6205_v59 = vld [vmem:[%s12073_s5 + $0x7d8] sm:$0xf0]  ;;  %v6000_v18 = vor.u32 %v7914_v6, %v5997_v7  ;;  %v7906_v38 = vld [vmem:[%s12073_s5 + $0x5ec] sm:$0xf]  ;;  %v6807_v6 = vld [vmem:[%s12073_s5 + $0x380] sm:$0xf] }
 0x27a   : > { %2664 = vmatpush.bf16.msra.mxu3 %v5840_v12  ;;  %v6208_v39 = vor.u32 %v7966_v58, %v6205_v59  ;;  %v6189_v12 = vld [vmem:[%s12073_s5 + $0x7b8] sm:$0xf0]  ;;  %v7835_v58 = vld [vmem:[%s12073_s5 + $0x3ac] sm:$0xf0]  ;;  %v7898_v63 = vld [vmem:[%s12073_s5 + $0x5ac] sm:$0xf] }
 0x27b   : > { %2623 = vmatpush.bf16.msra.mxu0 %v6076_v61  ;;  %v6192_v61 = vor.u32 %v7962_v9, %v6189_v12  ;;  %v6824_v4 = vor.u32 %v7835_v58, %v6823_v57  ;;  %v7831_v7 = vld [vmem:[%s12073_s5 + $0x38c] sm:$0xf0]  ;;  %v6759_v49 = vld [vmem:[%s12073_s5 + $0x320] sm:$0xf]  ;;  %v7777_v58 = vld [vmem:[%s12073_s5 + $0x1e4] sm:$0xf] }
 0x27c   : > { %2689 = vmatpush.bf16.msrb.mxu1 %v6144_v2  ;;  %v5981_v2 = vld [vmem:[%s12073_s5 + $0x618] sm:$0xf0]  ;;  %v7819_v16 = vld [vmem:[%s12073_s5 + $0x32c] sm:$0xf0] }
 0x27d   : > { %2703 = vmatpush.bf16.msrb.mxu2 %v6272_v13  ;;  %v7994_v13 = vld [vmem:[%s12073_s5 + $0x8ac] sm:$0xf]  ;;  %v5984_v30 = vor.u32 %v7910_v21, %v5981_v2  ;;  %v6663_v21 = vld [vmem:[%s12073_s5 + $0x260] sm:$0xf]  ;;  %v7827_v2 = vld [vmem:[%s12073_s5 + $0x36c] sm:$0xf0] }
 0x27e   : > { %2665 = vmatpush.bf16.msra.mxu3 %v5824_v5  ;;  %v7990_v5 = vld [vmem:[%s12073_s5 + $0x88c] sm:$0xf]  ;;  %v7815_v57 = vld [vmem:[%s12073_s5 + $0x30c] sm:$0xf0] }
 0x27f   : > { %2624 = vmatpush.bf16.msra.mxu0 %v6060_v31  ;;  %v7926_v31 = vld [vmem:[%s12073_s5 + $0x68c] sm:$0xf] }
 0x280   : > { %2690 = vmatpush.bf16.msrb.mxu1 %v6128_v32  ;;  %v6045_v32 = vld [vmem:[%s12073_s5 + $0x698] sm:$0xf0] }
 0x281   : > { %2704 = vmatpush.bf16.msrb.mxu2 %v6256_v22  ;;  %v6301_v22 = vld [vmem:[%s12073_s5 + $0x898] sm:$0xf0]  ;;  %v6048_v26 = vor.u32 %v7926_v31, %v6045_v32  ;;  %v7791_v31 = vld [vmem:[%s12073_s5 + $0x24c] sm:$0xf0]  ;;  %v6775_v32 = vld [vmem:[%s12073_s5 + $0x340] sm:$0xf] }
 0x282   : > { %2666 = vmatpush.bf16.msra.mxu3 %v5808_v41  ;;  %v6304_v37 = vor.u32 %v7990_v5, %v6301_v22  ;;  %v5965_v41 = vld [vmem:[%s12073_s5 + $0x5f8] sm:$0xf0]  ;;  %v6472_v5 = vor.u32 %v7747_v20, %v6471_v19  ;;  %v6535_v22 = vld [vmem:[%s12073_s5 + $0x160] sm:$0xf]  ;;  %v7805_v19 = vld [vmem:[%s12073_s5 + $0x2c4] sm:$0xf] }
 0x283   : > { %2625 = vmatpush.bf16.msra.mxu0 %v6044_v52  ;;  %v5968_v51 = vor.u32 %v7906_v38, %v5965_v41  ;;  %v6600_v52 = vor.u32 %v7779_v11, %v6599_v10  ;;  %v6456_v38 = vor.u32 %v7743_v28, %v6455_v56  ;;  %v6519_v41 = vld [vmem:[%s12073_s5 + $0x140] sm:$0xf]  ;;  %v6713_v20 = vld [vmem:[%s12073_s5 + $0x2d0] sm:$0xf0] }
 0x284   : > { %2691 = vmatpush.bf16.msrb.mxu1 %v6112_v53  ;;  %v7902_v53 = vld [vmem:[%s12073_s5 + $0x5cc] sm:$0xf]  ;;  %v6439_v11 = vld [vmem:[%s12073_s5 + $0xa0] sm:$0xf]  ;;  %v6716_v56 = vor.u32 %v7805_v19, %v6713_v20  ;;  %v6457_v28 = vld [vmem:[%s12073_s5 + $0xd0] sm:$0xf0] }
 0x285   : > { %2705 = vmatpush.bf16.msrb.mxu2 %v6240_v42  ;;  %v6728_v42 = vor.u32 %v7811_v25, %v6727_v23  ;;  %v7763_v23 = vld [vmem:[%s12073_s5 + $0x16c] sm:$0xf0]  ;;  %v7725_v20 = vld [vmem:[%s12073_s5 + $0x44] sm:$0xf] }
 0x286   : > { %2667 = vmatpush.bf16.msra.mxu3 %v5792_v35  ;;  %2626 = vmatmul.bf16.vlgmr.msra.gmra.mxu0 %v9365_v43  ;;  %v5949_v35 = vld [vmem:[%s12073_s5 + $0x5d8] sm:$0xf0] }
 0x287   : > { %2674 = vmatpush.bf16.msrb.mxu0 %v6032_v45  ;;  %v6712_v45 = vor.u32 %v7807_v47, %v6711_v46  ;;  %v5952_v59 = vor.u32 %v7902_v53, %v5949_v35  ;;  %v7739_v46 = vld [vmem:[%s12073_s5 + $0xac] sm:$0xf0]  ;;  %v6423_v35 = vld [vmem:[%s12073_s5 + $0x80] sm:$0xf] }
 0x288   : > { %2692 = vmatpush.bf16.msrb.mxu1 %v6096_v0  ;;  %v5933_v0 = vld [vmem:[%s12073_s5 + $0x5b8] sm:$0xf0]  ;;  %v7787_v47 = vld [vmem:[%s12073_s5 + $0x22c] sm:$0xf0] }
 0x289   : > { %2706 = vmatpush.bf16.msrb.mxu2 %v6224_v54  ;;  %2668 = vmatmul.bf16.vlgmr.msra.gmra.mxu3 %v9348_v29  ;;  %v6320_v29 = vor.u32 %v7994_v13, %v6317_v14  ;;  %v7775_v54 = vld [vmem:[%s12073_s5 + $0x1cc] sm:$0xf0]  ;;  %v5936_v9 = vor.u32 %v7898_v63, %v5933_v0  ;;  %v5917_v13 = vld [vmem:[%s12073_s5 + $0x598] sm:$0xf0]  ;;  %v6551_v14 = vld [vmem:[%s12073_s5 + $0x180] sm:$0xf] }
 0x28a   : > { %2720 = vmatpush.bf16.msrb.mxu3 %v6352_v50  ;;  %v6695_v50 = vld [vmem:[%s12073_s5 + $0x2a0] sm:$0xf]  ;;  %v6584_v60 = vor.u32 %v7775_v54, %v6583_v48  ;;  %v7755_v53 = vld [vmem:[%s12073_s5 + $0x12c] sm:$0xf0]  ;;  %v6729_v63 = vld [vmem:[%s12073_s5 + $0x2f0] sm:$0xf0] }
 0x28b   : > { %2675 = vmatpush.bf16.msrb.mxu0 %v6016_v1  ;;  %v6696_v1 = vor.u32 %v7803_v55, %v6695_v50  ;;  %v7735_v48 = vld [vmem:[%s12073_s5 + $0x8c] sm:$0xf0]  ;;  %v6615_v54 = vld [vmem:[%s12073_s5 + $0x200] sm:$0xf] }
 0x28c   : > { %2693 = vmatpush.bf16.msrb.mxu1 %v6080_v15  ;;  %v7783_v50 = vld [vmem:[%s12073_s5 + $0x20c] sm:$0xf0]  ;;  %v6743_v55 = vld [vmem:[%s12073_s5 + $0x300] sm:$0xf] }
 0x28d   : > { %2707 = vmatpush.bf16.msrb.mxu2 %v6208_v39  ;;  %v6679_v39 = vld [vmem:[%s12073_s5 + $0x280] sm:$0xf] }
 0x28e   : > { %2721 = vmatpush.bf16.msrb.mxu3 %v6336_v40  ;;  %v7799_v40 = vld [vmem:[%s12073_s5 + $0x28c] sm:$0xf0] }
 0x28f   : > { %2676 = vmatpush.bf16.msrb.mxu0 %v6000_v18  ;;  %v6680_v15 = vor.u32 %v7799_v40, %v6679_v39  ;;  %v6808_v18 = vor.u32 %v7831_v7, %v6807_v6  ;;  %v7751_v39 = vld [vmem:[%s12073_s5 + $0x10c] sm:$0xf0] }
 0x290   : > { %2694 = vmatpush.bf16.msrb.mxu1 %v6064_v24  ;;  %v1340_v40 = vld [vmem:[#allocation3 + $0x10] sm:$0xff] }
 0x291   : > { %2708 = vmatpush.bf16.msrb.mxu2 %v6192_v61  ;;  %v7795_v61 = vld [vmem:[%s12073_s5 + $0x26c] sm:$0xf0] }
 0x292   : > { %2722 = vmatpush.bf16.msrb.mxu3 %v6320_v29  ;;  %v6791_v29 = vld [vmem:[%s12073_s5 + $0x360] sm:$0xf]  ;;  %v6664_v24 = vor.u32 %v7795_v61, %v6663_v21  ;;  %v1339_v61 = vld [vmem:[#allocation3 + $0x8] sm:$0xff] }
 0x293   : > { %2677 = vmatpush.bf16.msrb.mxu0 %v5984_v30  ;;  %v6792_v25 = vor.u32 %v7827_v2, %v6791_v29  ;;  %v6647_v30 = vld [vmem:[%s12073_s5 + $0x240] sm:$0xf]  ;;  %v8162_v29 = vld [vmem:[#allocation3 + $0x38] sm:$0xff] }
 0x294   : > { %2695 = vmatpush.bf16.msrb.mxu1 %v6048_v26  ;;  %v6631_v26 = vld [vmem:[%s12073_s5 + $0x220] sm:$0xf]  ;;  %v10061_v2 = vpack.c.bf16 %v8162_v29, %v1340_v40 }
 0x295   : > { %2709 = vmatpush.bf16.msrb.mxu2 %v6176_v33  ;;  %v7823_v33 = vld [vmem:[%s12073_s5 + $0x34c] sm:$0xf0] }
 0x296   : > { %2723 = vmatpush.bf16.msrb.mxu3 %v6304_v37  ;;  %v6536_v37 = vor.u32 %v7763_v23, %v6535_v22  ;;  %v6776_v10 = vor.u32 %v7823_v33, %v6775_v32  ;;  %v7727_v22 = vld [vmem:[%s12073_s5 + $0x4c] sm:$0xf0]  ;;  %v7741_v23 = vld [vmem:[%s12073_s5 + $0xc4] sm:$0xf]  ;;  %v6697_v33 = vld [vmem:[%s12073_s5 + $0x2b0] sm:$0xf0] }
 0x297   : > { %2678 = vmatpush.bf16.msrb.mxu0 %v5968_v51  ;;  %2696 = vmatmul.bf16.vlgmr.msrb.gmra.mxu1 %v9365_v43  ;;  %v7894_v43 = vld [vmem:[%s12073_s5 + $0x58c] sm:$0xf]  ;;  %v7801_v32 = vld [vmem:[%s12073_s5 + $0x2a4] sm:$0xf] }
 0x298   : > { %2710 = vmatmul.bf16.vlgmr.msrb.gmra.mxu2 %v9375_v27  ;;  %3467 = vmatpush.bf16.msra.mxu1 %v6600_v52  ;;  %v6567_v27 = vld [vmem:[%s12073_s5 + $0x1a0] sm:$0xf]  ;;  %v5920_v3 = vor.u32 %v7894_v43, %v5917_v13  ;;  %v6440_v52 = vor.u32 %v7739_v46, %v6439_v11  ;;  %v7731_v43 = vld [vmem:[%s12073_s5 + $0x6c] sm:$0xf0]  ;;  %v6473_v13 = vld [vmem:[%s12073_s5 + $0xf0] sm:$0xf0] }
 0x299   : > { %3481 = vmatpush.bf16.msra.mxu2 %v6728_v42  ;;  %6356 = vmatmul.msk.bf16.vlgmr.msrb.gmra.mxu3 %vm341_vm3, %v9445_v8  ;;  %v6568_v12 = vor.u32 %v7771_v17, %v6567_v27  ;;  %v7767_v8 = vld [vmem:[%s12073_s5 + $0x18c] sm:$0xf0]  ;;  %v6744_v27 = vor.u32 %v7815_v57, %v6743_v55  ;;  %v6487_v17 = vld [vmem:[%s12073_s5 + $0x100] sm:$0xf]  ;;  %v7737_v46 = vld [vmem:[%s12073_s5 + $0xa4] sm:$0xf] }
 0x29a   : > { %3495 = vmatpush.bf16.msra.mxu3 %v6856_v44  ;;  %v6552_v62 = vor.u32 %v7767_v8, %v6551_v14  ;;  %v7759_v42 = vld [vmem:[%s12073_s5 + $0x14c] sm:$0xf0]  ;;  %v6648_v44 = vor.u32 %v7791_v31, %v6647_v30  ;;  %v7773_v14 = vld [vmem:[%s12073_s5 + $0x1c4] sm:$0xf]  ;;  %v6585_v8 = vld [vmem:[%s12073_s5 + $0x1d0] sm:$0xf0] }
 0x29b   : > { %2679 = vmatpush.bf16.msrb.mxu0 %v5952_v59  ;;  %v6520_v51 = vor.u32 %v7759_v42, %v6519_v41  ;;  %v6601_v59 = vld [vmem:[%s12073_s5 + $0x1f0] sm:$0xf0]  ;;  %v7769_v30 = vld [vmem:[%s12073_s5 + $0x1a4] sm:$0xf]  ;;  %v6460_v42 = vor.u32 %v7741_v23, %v6457_v28  ;;  %v7723_v11 = vld [vmem:[%s12073_s5 + $0x2c] sm:$0xf0] }
 0x29c   : > { %3468 = vmatpush.bf16.msra.mxu1 %v6584_v60  ;;  %v7809_v60 = vld [vmem:[%s12073_s5 + $0x2e4] sm:$0xf]  ;;  %v6604_v6 = vor.u32 %v7777_v58, %v6601_v59  ;;  %v6569_v31 = vld [vmem:[%s12073_s5 + $0x1b0] sm:$0xf0]  ;;  %v6919_v55 = vld [vmem:[%s12073_s5 + $0x460] sm:$0xf] }
 0x29d   : > { %3482 = vmatpush.bf16.msra.mxu2 %v6712_v45  ;;  %v6632_v45 = vor.u32 %v7787_v47, %v6631_v26  ;;  %v6732_v7 = vor.u32 %v7809_v60, %v6729_v63  ;;  %v6700_v26 = vor.u32 %v7801_v32, %v6697_v33  ;;  %v6441_v47 = vld [vmem:[%s12073_s5 + $0xb0] sm:$0xf0]  ;;  %v7859_v57 = vld [vmem:[%s12073_s5 + $0x46c] sm:$0xf0]  ;;  %v7761_v58 = vld [vmem:[%s12073_s5 + $0x164] sm:$0xf] }
 0x29e   : > { %3496 = vmatpush.bf16.msra.mxu3 %v6840_v36  ;;  %v6760_v36 = vor.u32 %v7819_v16, %v6759_v49  ;;  %v7765_v49 = vld [vmem:[%s12073_s5 + $0x184] sm:$0xf]  ;;  %v6553_v16 = vld [vmem:[%s12073_s5 + $0x190] sm:$0xf0]  ;;  %v6871_v32 = vld [vmem:[%s12073_s5 + $0x400] sm:$0xf] }
 0x29f   : > { %2680 = vmatpush.bf16.msrb.mxu0 %v5936_v9  ;;  %v6407_v9 = vld [vmem:[%s12073_s5 + $0x60] sm:$0xf]  ;;  %v6537_v59 = vld [vmem:[%s12073_s5 + $0x170] sm:$0xf0]  ;;  %v7793_v60 = vld [vmem:[%s12073_s5 + $0x264] sm:$0xf] }
 0x2a0   : > { %3469 = vmatpush.bf16.msra.mxu1 %v6568_v12  ;;  %v7745_v12 = vld [vmem:[%s12073_s5 + $0xe4] sm:$0xf]  ;;  %v6408_v21 = vor.u32 %v7731_v43, %v6407_v9  ;;  %v6665_v63 = vld [vmem:[%s12073_s5 + $0x270] sm:$0xf0]  ;;  %v6540_v40 = vor.u32 %v7761_v58, %v6537_v59  ;;  %v7855_v9 = vld [vmem:[%s12073_s5 + $0x44c] sm:$0xf0] }
 0x2a1   : > { %3483 = vmatpush.bf16.msra.mxu2 %v6696_v1  ;;  %v6424_v1 = vor.u32 %v7735_v48, %v6423_v35  ;;  %v6444_v35 = vor.u32 %v7737_v46, %v6441_v47  ;;  %v7733_v48 = vld [vmem:[%s12073_s5 + $0x84] sm:$0xf]  ;;  %v6921_v59 = vld [vmem:[%s12073_s5 + $0x470] sm:$0xf0] }
 0x2a2   : > { %3497 = vmatpush.bf16.msra.mxu3 %v6824_v4  ;;  %v6616_v4 = vor.u32 %v7783_v50, %v6615_v54  ;;  %v6425_v54 = vld [vmem:[%s12073_s5 + $0x90] sm:$0xf0]  ;;  %v7757_v43 = vld [vmem:[%s12073_s5 + $0x144] sm:$0xf] }
 0x2a3   : > { %2681 = vmatpush.bf16.msrb.mxu0 %v5920_v3  ;;  %v6476_v3 = vor.u32 %v7745_v12, %v6473_v13  ;;  %v6521_v12 = vld [vmem:[%s12073_s5 + $0x150] sm:$0xf0]  ;;  %v7789_v13 = vld [vmem:[%s12073_s5 + $0x244] sm:$0xf] }
 0x2a4   : > { %3470 = vmatpush.bf16.msra.mxu1 %v6552_v62  ;;  %v6588_v62 = vor.u32 %v7773_v14, %v6585_v8  ;;  %v6649_v14 = vld [vmem:[%s12073_s5 + $0x250] sm:$0xf0]  ;;  %v8165_v8 = vld [vmem:[#allocation3 + $0x28] sm:$0xff]  ;;  %v7785_v23 = vld [vmem:[%s12073_s5 + $0x224] sm:$0xf] }
 0x2a5   : > { %3484 = vmatpush.bf16.msra.mxu2 %v6680_v15  ;;  %v6488_v15 = vor.u32 %v7751_v39, %v6487_v17  ;;  %v7729_v17 = vld [vmem:[%s12073_s5 + $0x64] sm:$0xf]  ;;  %v6409_v39 = vld [vmem:[%s12073_s5 + $0x70] sm:$0xf0]  ;;  %v6652_v29 = vor.u32 %v7789_v13, %v6649_v14 }
 0x2a6   : > { %3498 = vmatpush.bf16.msra.mxu3 %v6808_v18  ;;  %2682 = vmatmul.bf16.vlgmr.msrb.gmra.mxu0 %v9358_v34  ;;  %v6503_v34 = vld [vmem:[%s12073_s5 + $0x120] sm:$0xf]  ;;  %v1341_v18 = vld [vmem:[#allocation3 + $0x18] sm:$0xff]  ;;  %v7781_v46 = vld [vmem:[%s12073_s5 + $0x204] sm:$0xf] }
 0x2a7   : > { %3453 = vmatpush.bf16.msra.mxu0 %v6472_v5  ;;  %v6504_v0 = vor.u32 %v7755_v53, %v6503_v34  ;;  %v6391_v5 = vld [vmem:[%s12073_s5 + $0x40] sm:$0xf]  ;;  %v7841_v47 = vld [vmem:[%s12073_s5 + $0x3e4] sm:$0xf] }
 0x2a8   : > { %3471 = vmatpush.bf16.msra.mxu1 %v6536_v37  ;;  %v8164_v37 = vld [vmem:[#allocation3 + $0x30] sm:$0xff]  ;;  %v6392_v41 = vor.u32 %v7727_v22, %v6391_v5  ;;  %v6359_v53 = vld [vmem:[%s12073_s5] sm:$0xf]  ;;  %v7753_v5 = vld [vmem:[%s12073_s5 + $0x124] sm:$0xf] }
 0x2a9   : > { %3485 = vmatpush.bf16.msra.mxu2 %v6664_v24  ;;  %v8163_v24 = vld [vmem:[#allocation3 + $0x40] sm:$0xff]  ;;  %v6505_v22 = vld [vmem:[%s12073_s5 + $0x130] sm:$0xf0] }
 0x2aa   : > { %3499 = vmatpush.bf16.msra.mxu3 %v6792_v25  ;;  %v10072_v25 = vpack.c.bf16 %v8163_v24, %v1341_v18  ;;  %v6412_v18 = vor.u32 %v7729_v17, %v6409_v39  ;;  %v6633_v24 = vld [vmem:[%s12073_s5 + $0x230] sm:$0xf0]  ;;  %v6508_v33 = vor.u32 %v7753_v5, %v6505_v22  ;;  %v7857_v58 = vld [vmem:[%s12073_s5 + $0x464] sm:$0xf]  ;;  %v6591_v17 = vld [vmem:[%s12073_s5 + $0x1c8] sm:$0xf] }
 0x2ab   : > { %3454 = vmatpush.bf16.msra.mxu0 %v6456_v38  ;;  %v10091_v38 = vpack.c.bf16 %v8164_v37, %v1339_v61  ;;  %v6524_v61 = vor.u32 %v7757_v43, %v6521_v12  ;;  %v6636_v37 = vor.u32 %v7785_v23, %v6633_v24  ;;  %v7776_v39 = vld [vmem:[%s12073_s5 + $0x1d4] sm:$0xf0]  ;;  %v6575_v23 = vld [vmem:[%s12073_s5 + $0x1a8] sm:$0xf] }
 0x2ac   : > { %3472 = vmatpush.bf16.msra.mxu1 %v6520_v51  ;;  %v7797_v51 = vld [vmem:[%s12073_s5 + $0x284] sm:$0xf]  ;;  %v7740_v5 = vld [vmem:[%s12073_s5 + $0xb4] sm:$0xf0] }
 0x2ad   : > { %3486 = vmatpush.bf16.msra.mxu2 %v6648_v44  ;;  %v6572_v44 = vor.u32 %v7769_v30, %v6569_v31  ;;  %v7721_v30 = vld [vmem:[%s12073_s5 + $0x24] sm:$0xf]  ;;  %v6377_v31 = vld [vmem:[%s12073_s5 + $0x30] sm:$0xf0]  ;;  %v7772_v24 = vld [vmem:[%s12073_s5 + $0x1b4] sm:$0xf0] }
 0x2ae   : > { %3500 = vmatpush.bf16.msra.mxu3 %v6776_v10  ;;  %v6375_v10 = vld [vmem:[%s12073_s5 + $0x20] sm:$0xf] }
 0x2af   : > { %3455 = vmatpush.bf16.msra.mxu0 %v6440_v52  ;;  %v6681_v52 = vld [vmem:[%s12073_s5 + $0x290] sm:$0xf0]  ;;  %v6376_v34 = vor.u32 %v7723_v11, %v6375_v10 }
 0x2b0   : > { %3473 = vmatpush.bf16.msra.mxu1 %v6504_v0  ;;  %v6684_v50 = vor.u32 %v7797_v51, %v6681_v52  ;;  %v6489_v10 = vld [vmem:[%s12073_s5 + $0x110] sm:$0xf0]  ;;  %v6479_v51 = vld [vmem:[%s12073_s5 + $0xe8] sm:$0xf]  ;;  %v7748_v52 = vld [vmem:[%s12073_s5 + $0xf4] sm:$0xf0] }
 0x2b1   : > { %3487 = vmatpush.bf16.msra.mxu2 %v6632_v45  ;;  %v6556_v45 = vor.u32 %v7765_v49, %v6553_v16  ;;  %v6857_v16 = vld [vmem:[%s12073_s5 + $0x3f0] sm:$0xf0] }
 0x2b2   : > { %3501 = vmatpush.bf16.msra.mxu3 %v6760_v36  ;;  %v7719_v36 = vld [vmem:[%s12073_s5 + $0xc] sm:$0xf0] }
 0x2b3   : > { %3456 = vmatpush.bf16.msra.mxu0 %v6424_v1  ;;  %v6360_v0 = vor.u32 %v7719_v36, %v6359_v53  ;;  %v6428_v1 = vor.u32 %v7733_v48, %v6425_v54  ;;  %v7717_v54 = vld [vmem:[%s12073_s5 + $0x4] sm:$0xf] }
 0x2b4   : > { %3474 = vmatpush.bf16.msra.mxu1 %v6488_v15 }
 0x2b5   : > { %3488 = vmatpush.bf16.msra.mxu2 %v6616_v4  ;;  %v6920_v4 = vor.u32 %v7859_v57, %v6919_v55  ;;  %v6860_v55 = vor.u32 %v7841_v47, %v6857_v16  ;;  %v6480_v57 = vor.u32 %v7748_v52, %v6479_v51 }
 0x2b6   : > { %3502 = vmatpush.bf16.msra.mxu3 %v6744_v27  ;;  %v1338_v27 = vld [vmem:[#allocation3] sm:$0xff] }
 0x2b7   : > { %3457 = vmatpush.bf16.msra.mxu0 %v6408_v21  ;;  %3475 = vmatmul.bf16.vlgmr.msra.gmra.mxu1 %v10091_v38  ;;  %v10172_v15 = vpack.c.bf16 %v8165_v8, %v1338_v27  ;;  %v6393_v21 = vld [vmem:[%s12073_s5 + $0x50] sm:$0xf0] }
 0x2b8   : > { %3489 = vmatmul.bf16.vlgmr.msra.gmra.mxu2 %v10061_v2  ;;  %3523 = vmatpush.bf16.msrb.mxu1 %v6476_v3  ;;  %v6887_v3 = vld [vmem:[%s12073_s5 + $0x420] sm:$0xf] }
 0x2b9   : > { %3537 = vmatpush.bf16.msrb.mxu2 %v6604_v6  ;;  %3503 = vmatmul.bf16.vlgmr.msra.gmra.mxu3 %v10072_v25  ;;  %v6668_v6 = vor.u32 %v7793_v60, %v6665_v63  ;;  %v7837_v60 = vld [vmem:[%s12073_s5 + $0x3c4] sm:$0xf] }
 0x2ba   : > { %3551 = vmatpush.bf16.msrb.mxu3 %v6732_v7  ;;  %v6903_v7 = vld [vmem:[%s12073_s5 + $0x440] sm:$0xf] }
 0x2bb   : > { %3458 = vmatpush.bf16.msra.mxu0 %v6392_v41  ;;  %v6904_v19 = vor.u32 %v7855_v9, %v6903_v7  ;;  %v6924_v7 = vor.u32 %v7857_v58, %v6921_v59  ;;  %v6863_v58 = vld [vmem:[%s12073_s5 + $0x3e8] sm:$0xf]  ;;  %v7844_v59 = vld [vmem:[%s12073_s5 + $0x3f4] sm:$0xf0] }
 0x2bc   : > { %3524 = vmatpush.bf16.msrb.mxu1 %v6460_v42  ;;  %v7847_v42 = vld [vmem:[%s12073_s5 + $0x40c] sm:$0xf0] }
 0x2bd   : > { %3538 = vmatpush.bf16.msrb.mxu2 %v6588_v62  ;;  %v7851_v62 = vld [vmem:[%s12073_s5 + $0x42c] sm:$0xf0]  ;;  %v6872_v53 = vor.u32 %v7847_v42, %v6871_v32  ;;  %v6889_v32 = vld [vmem:[%s12073_s5 + $0x430] sm:$0xf0]  ;;  %v6431_v42 = vld [vmem:[%s12073_s5 + $0x88] sm:$0xf] }
 0x2be   : > { %3552 = vmatpush.bf16.msrb.mxu3 %v6716_v56  ;;  %v6396_v56 = vor.u32 %v7725_v20, %v6393_v21  ;;  %v6888_v28 = vor.u32 %v7851_v62, %v6887_v3  ;;  %v7833_v20 = vld [vmem:[%s12073_s5 + $0x3a4] sm:$0xf]  ;;  %v6592_v21 = vor.u32 %v7776_v39, %v6591_v17  ;;  %v6825_v3 = vld [vmem:[%s12073_s5 + $0x3b0] sm:$0xf0]  ;;  %v6447_v62 = vld [vmem:[%s12073_s5 + $0xa8] sm:$0xf]  ;;  %v6864_v17 = vor.u32 %v7844_v59, %v6863_v58 }
 0x2bf   : > { %3459 = vmatpush.bf16.msra.mxu0 %v6376_v34  ;;  %v6380_v34 = vor.u32 %v7721_v30, %v6377_v31  ;;  %v6448_v30 = vor.u32 %v7740_v5, %v6447_v62  ;;  %v7849_v31 = vld [vmem:[%s12073_s5 + $0x424] sm:$0xf]  ;;  %v6399_v39 = vld [vmem:[%s12073_s5 + $0x48] sm:$0xf]  ;;  %v6761_v62 = vld [vmem:[%s12073_s5 + $0x330] sm:$0xf0] }
 0x2c0   : > { %3525 = vmatpush.bf16.msrb.mxu1 %v6444_v35  ;;  %v6607_v35 = vld [vmem:[%s12073_s5 + $0x1e8] sm:$0xf]  ;;  %v7746_v58 = vld [vmem:[%s12073_s5 + $0xec] sm:$0xf]  ;;  %v6481_v59 = vld [vmem:[%s12073_s5 + $0xf8] sm:$0xf0] }
 0x2c1   : > { %3539 = vmatpush.bf16.msrb.mxu2 %v6572_v44  ;;  %v7749_v44 = vld [vmem:[%s12073_s5 + $0x104] sm:$0xf] }
 0x2c2   : > { %3553 = vmatpush.bf16.msrb.mxu3 %v6700_v26  ;;  %v6617_v26 = vld [vmem:[%s12073_s5 + $0x210] sm:$0xf0]  ;;  %v6492_v36 = vor.u32 %v7749_v44, %v6489_v10  ;;  %v7736_v44 = vld [vmem:[%s12073_s5 + $0x94] sm:$0xf0]  ;;  %v6559_v10 = vld [vmem:[%s12073_s5 + $0x188] sm:$0xf] }
 0x2c3   : > { %3460 = vmatpush.bf16.msra.mxu0 %v6360_v0  ;;  %v2459_v41 = vpop.f32.mrf.mxu0  ;;  %v6620_v48 = vor.u32 %v7781_v46, %v6617_v26  ;;  %v6841_v0 = vld [vmem:[%s12073_s5 + $0x3d0] sm:$0xf0]  ;;  %v6892_v26 = vor.u32 %v7849_v31, %v6889_v32  ;;  %v6831_v31 = vld [vmem:[%s12073_s5 + $0x3a8] sm:$0xf]  ;;  %v7836_v32 = vld [vmem:[%s12073_s5 + $0x3b4] sm:$0xf0] }
 0x2c4   : > { %3526 = vmatpush.bf16.msrb.mxu1 %v6428_v1  ;;  %v2473_v11 = vpop.f32.mrf.mxu1  ;;  %v6463_v1 = vld [vmem:[%s12073_s5 + $0xc8] sm:$0xf]  ;;  %v6844_v14 = vor.u32 %v7837_v60, %v6841_v0 }
 0x2c5   : > { %3540 = vmatpush.bf16.msrb.mxu2 %v6556_v45  ;;  %v2474_v49 = vadd.f32 %v2473_v11, %v2459_v41  ;;  %v7780_v45 = vld [vmem:[%s12073_s5 + $0x1f4] sm:$0xf0]  ;;  %v6809_v41 = vld [vmem:[%s12073_s5 + $0x390] sm:$0xf0] }
 0x2c6   : > { %3554 = vmatpush.bf16.msrb.mxu3 %v6684_v50  ;;  %3461 = vmatmul.bf16.vlgmr.msra.gmra.mxu0 %v10172_v15  ;;  %v6361_v50 = vld [vmem:[%s12073_s5 + $0x10] sm:$0xf0]  ;;  %v6608_v63 = vor.u32 %v7780_v45, %v6607_v35  ;;  %v7768_v11 = vld [vmem:[%s12073_s5 + $0x194] sm:$0xf0]  ;;  %v7825_v45 = vld [vmem:[%s12073_s5 + $0x364] sm:$0xf] }
 0x2c7   : > { %3513 = vmatpush.bf16.msrb.mxu0 %v6920_v4  ;;  %v7744_v4 = vld [vmem:[%s12073_s5 + $0xd4] sm:$0xf0]  ;;  %v6364_v27 = vor.u32 %v7717_v54, %v6361_v50  ;;  %v6873_v35 = vld [vmem:[%s12073_s5 + $0x410] sm:$0xf0]  ;;  %v6415_v54 = vld [vmem:[%s12073_s5 + $0x68] sm:$0xf] }
 0x2c8   : > { %3527 = vmatpush.bf16.msrb.mxu1 %v6412_v18  ;;  %v6464_v8 = vor.u32 %v7744_v4, %v6463_v1  ;;  %v7853_v18 = vld [vmem:[%s12073_s5 + $0x444] sm:$0xf]  ;;  %v7732_v50 = vld [vmem:[%s12073_s5 + $0x74] sm:$0xf0]  ;;  %v6777_v4 = vld [vmem:[%s12073_s5 + $0x350] sm:$0xf0] }
 0x2c9   : > { %3541 = vmatpush.bf16.msrb.mxu2 %v6540_v40  ;;  %v1342_v40 = vld [vmem:[#allocation3 + $0x20] sm:$0xff]  ;;  %v6416_v0 = vor.u32 %v7732_v50, %v6415_v54 }
 0x2ca   : > { %3555 = vmatpush.bf16.msrb.mxu3 %v6668_v6  ;;  %v7821_v1 = vld [vmem:[%s12073_s5 + $0x344] sm:$0xf] }
 0x2cb   : > { %3514 = vmatpush.bf16.msrb.mxu0 %v6904_v19  ;;  %v2487_v6 = vpop.f32.mrf.mxu2  ;;  %v10271_v9 = vpop.f32.mrf.mxu0  ;;  %v6905_v19 = vld [vmem:[%s12073_s5 + $0x450] sm:$0xf0] }
 0x2cc   : > { %3528 = vmatpush.bf16.msrb.mxu1 %v6396_v56  ;;  %v2488_v43 = vadd.f32 %v2487_v6, %v2474_v49  ;;  %v2501_v12 = vpop.f32.mrf.mxu3  ;;  %v10273_v13 = vpop.f32.mrf.mxu1  ;;  %v6908_v56 = vor.u32 %v7853_v18, %v6905_v19  ;;  %v7845_v49 = vld [vmem:[%s12073_s5 + $0x404] sm:$0xf]  ;;  %v6527_v6 = vld [vmem:[%s12073_s5 + $0x148] sm:$0xf] }
 0x2cd   : > { %3542 = vmatpush.bf16.msrb.mxu2 %v6524_v61  ;;  %v8166_v61 = vld [vmem:[#allocation3 + $0x48] sm:$0xff]  ;;  %v6876_v60 = vor.u32 %v7845_v49, %v6873_v35  ;;  %v7752_v49 = vld [vmem:[%s12073_s5 + $0x114] sm:$0xf0] }
 0x2ce   : > { %3556 = vmatpush.bf16.msrb.mxu3 %v6652_v29  ;;  %v10284_v29 = vpack.c.bf16 %v8166_v61, %v1342_v40  ;;  %v2502_v22 = vadd.f32 %v2501_v12, %v2488_v43  ;;  %v7728_v40 = vld [vmem:[%s12073_s5 + $0x54] sm:$0xf0]  ;;  %v6847_v43 = vld [vmem:[%s12073_s5 + $0x3c8] sm:$0xf] }
 0x2cf   : > { %3515 = vmatpush.bf16.msrb.mxu0 %v6888_v28  ;;  %v6828_v28 = vor.u32 %v7833_v20, %v6825_v3  ;;  %v7840_v12 = vld [vmem:[%s12073_s5 + $0x3d4] sm:$0xf0]  ;;  %v6400_v61 = vor.u32 %v7728_v40, %v6399_v39  ;;  %v7817_v3 = vld [vmem:[%s12073_s5 + $0x324] sm:$0xf]  ;;  %v6719_v40 = vld [vmem:[%s12073_s5 + $0x2c8] sm:$0xf] }
 0x2d0   : > { %3529 = vmatpush.bf16.msrb.mxu1 %v6380_v34  ;;  %v7828_v39 = vld [vmem:[%s12073_s5 + $0x374] sm:$0xf0] }
 0x2d1   : > { %3543 = vmatpush.bf16.msrb.mxu2 %v6508_v33  ;;  %v7829_v33 = vld [vmem:[%s12073_s5 + $0x384] sm:$0xf] }
 0x2d2   : > { %3557 = vmatpush.bf16.msrb.mxu3 %v6636_v37  ;;  %v6576_v37 = vor.u32 %v7772_v24, %v6575_v23  ;;  %v6812_v34 = vor.u32 %v7829_v33, %v6809_v41  ;;  %v6383_v23 = vld [vmem:[%s12073_s5 + $0x28] sm:$0xf]  ;;  %v7724_v24 = vld [vmem:[%s12073_s5 + $0x34] sm:$0xf0]  ;;  %v6764_v33 = vor.u32 %v7817_v3, %v6761_v62  ;;  %v7813_v41 = vld [vmem:[%s12073_s5 + $0x304] sm:$0xf] }
 0x2d3   : > { %3516 = vmatpush.bf16.msrb.mxu0 %v6872_v53  ;;  %v10330_v46 = vpop.f32.mrf.mxu2  ;;  %v2515_v47 = vpop.f32.mrf.mxu0  ;;  %v6432_v53 = vor.u32 %v7736_v44, %v6431_v42  ;;  %v6745_v42 = vld [vmem:[%s12073_s5 + $0x310] sm:$0xf0]  ;;  %v6367_v44 = vld [vmem:[%s12073_s5 + $0x8] sm:$0xf] }
 0x2d4   : > { %3530 = vmatpush.bf16.msrb.mxu1 %v6364_v27  ;;  %v10335_v16 = vpop.f32.mrf.mxu3  ;;  %v10337_v51 = vadd.f32 %v2515_v47, %v2502_v22  ;;  %v2529_v52 = vpop.f32.mrf.mxu1  ;;  %v6848_v22 = vor.u32 %v7840_v12, %v6847_v43  ;;  %v6495_v47 = vld [vmem:[%s12073_s5 + $0x108] sm:$0xf]  ;;  %v7808_v43 = vld [vmem:[%s12073_s5 + $0x2d4] sm:$0xf0] }
 0x2d5   : > { %3544 = vmatpush.bf16.msrb.mxu2 %v6492_v36  ;;  %v6793_v36 = vld [vmem:[%s12073_s5 + $0x370] sm:$0xf0]  ;;  %v6911_v12 = vld [vmem:[%s12073_s5 + $0x448] sm:$0xf] }
 0x2d6   : > { %3558 = vmatpush.bf16.msrb.mxu3 %v6620_v48  ;;  %6933 = vmatmul.msk.bf16.vlgmr.msrb.gmra.mxu0 %vm341_vm3, %v10284_v29  ;;  %v6560_v48 = vor.u32 %v7768_v11, %v6559_v10  ;;  %v6832_v11 = vor.u32 %v7836_v32, %v6831_v31  ;;  %v6783_v62 = vld [vmem:[%s12073_s5 + $0x348] sm:$0xf]  ;;  %v7738_v32 = vld [vmem:[%s12073_s5 + $0xac] sm:$0xf] }
 0x2d7   : > { %3565 = vmatpush.bf16.msra.mxu0 %v6860_v55  ;;  %3531 = vmatmul.bf16.vlgmr.msrb.gmra.mxu1 %v10172_v15  ;;  %v6543_v55 = vld [vmem:[%s12073_s5 + $0x168] sm:$0xf] }
 0x2d8   : > { %3545 = vmatmul.bf16.vlgmr.msrb.gmra.mxu2 %v10091_v38  ;;  %3583 = vmatpush.bf16.msra.mxu1 %v6924_v7  ;;  %v7760_v7 = vld [vmem:[%s12073_s5 + $0x154] sm:$0xf0] }
 0x2d9   : > { %3593 = vmatpush.bf16.msra.mxu2 %v6480_v57  ;;  %3559 = vmatmul.bf16.vlgmr.msrb.gmra.mxu3 %v10061_v2  ;;  %v7764_v57 = vld [vmem:[%s12073_s5 + $0x174] sm:$0xf0]  ;;  %v6528_v5 = vor.u32 %v7760_v7, %v6527_v6  ;;  %v6484_v7 = vor.u32 %v7746_v58, %v6481_v59 }
 0x2da   : > { %3607 = vmatpush.bf16.msra.mxu3 %v6608_v63  ;;  %v6796_v63 = vor.u32 %v7825_v45, %v6793_v36  ;;  %v6544_v27 = vor.u32 %v7764_v57, %v6543_v55  ;;  %v7812_v45 = vld [vmem:[%s12073_s5 + $0x2f4] sm:$0xf0]  ;;  %v6927_v36 = vld [vmem:[%s12073_s5 + $0x468] sm:$0xf]  ;;  %v6748_v55 = vor.u32 %v7813_v41, %v6745_v42 }
 0x2db   : > { %3566 = vmatpush.bf16.msra.mxu0 %v6844_v14  ;;  %v2543_v14 = vpop.f32.mrf.mxu2  ;;  %v6767_v42 = vld [vmem:[%s12073_s5 + $0x328] sm:$0xf]  ;;  %v7816_v59 = vld [vmem:[%s12073_s5 + $0x314] sm:$0xf0] }
 0x2dc   : > { %3584 = vmatpush.bf16.msra.mxu1 %v6908_v56  ;;  %v2544_v18 = vadd.f32 %v2543_v14, %v2529_v52  ;;  %v2557_v19 = vpop.f32.mrf.mxu3  ;;  %v10392_v20 = vpop.f32.mrf.mxu1  ;;  %v6511_v56 = vld [vmem:[%s12073_s5 + $0x128] sm:$0xf]  ;;  %v7856_v14 = vld [vmem:[%s12073_s5 + $0x454] sm:$0xf0] }
 0x2dd   : > { %3594 = vmatpush.bf16.msra.mxu2 %v6464_v8  ;;  %v10390_v8 = vpop.f32.mrf.mxu0  ;;  %v6815_v52 = vld [vmem:[%s12073_s5 + $0x388] sm:$0xf]  ;;  %v6912_v3 = vor.u32 %v7856_v14, %v6911_v12 }
 0x2de   : > { %3608 = vmatpush.bf16.msra.mxu3 %v6592_v21  ;;  %v6780_v21 = vor.u32 %v7821_v1, %v6777_v4 }
 0x2df   : > { %3567 = vmatpush.bf16.msra.mxu0 %v6828_v28  ;;  %v2558_v28 = vadd.f32 %v2557_v19, %v2544_v18  ;;  %v7742_v18 = vld [vmem:[%s12073_s5 + $0xcc] sm:$0xf]  ;;  %v6465_v19 = vld [vmem:[%s12073_s5 + $0xd8] sm:$0xf0] }
 0x2e0   : > { %3585 = vmatpush.bf16.msra.mxu1 %v6892_v26  ;;  %v7720_v26 = vld [vmem:[%s12073_s5 + $0x14] sm:$0xf0] }
 0x2e1   : > { %3595 = vmatpush.bf16.msra.mxu2 %v6448_v30  ;;  %v7756_v30 = vld [vmem:[%s12073_s5 + $0x134] sm:$0xf0]  ;;  %v6368_v57 = vor.u32 %v7720_v26, %v6367_v44  ;;  %v6687_v26 = vld [vmem:[%s12073_s5 + $0x288] sm:$0xf] }
 0x2e2   : > { %3609 = vmatpush.bf16.msra.mxu3 %v6576_v37  ;;  %v6384_v37 = vor.u32 %v7724_v24, %v6383_v23  ;;  %v6512_v10 = vor.u32 %v7756_v30, %v6511_v56  ;;  %v6468_v23 = vor.u32 %v7742_v18, %v6465_v19  ;;  %v7804_v56 = vld [vmem:[%s12073_s5 + $0x2b4] sm:$0xf0]  ;;  %v6655_v18 = vld [vmem:[%s12073_s5 + $0x248] sm:$0xf] }
 0x2e3   : > { %3568 = vmatpush.bf16.msra.mxu0 %v6812_v34  ;;  %v7832_v34 = vld [vmem:[%s12073_s5 + $0x394] sm:$0xf0]  ;;  %v10447_v35 = vpop.f32.mrf.mxu2 }
 0x2e4   : > { %3586 = vmatpush.bf16.msra.mxu1 %v6876_v60  ;;  %v10458_v54 = vpop.f32.mrf.mxu3  ;;  %v2585_v1 = vpop.f32.mrf.mxu1  ;;  %v7852_v30 = vld [vmem:[%s12073_s5 + $0x434] sm:$0xf0] }
 0x2e5   : > { %3596 = vmatpush.bf16.msra.mxu2 %v6432_v53  ;;  %v6735_v53 = vld [vmem:[%s12073_s5 + $0x2e8] sm:$0xf]  ;;  %v2571_v50 = vpop.f32.mrf.mxu0  ;;  %v7792_v19 = vld [vmem:[%s12073_s5 + $0x254] sm:$0xf0] }
 0x2e6   : > { %3610 = vmatpush.bf16.msra.mxu3 %v6560_v48  ;;  %v7860_v48 = vld [vmem:[%s12073_s5 + $0x474] sm:$0xf0]  ;;  %v2572_v60 = vadd.f32 %v2571_v50, %v2558_v28  ;;  %v6736_v4 = vor.u32 %v7812_v45, %v6735_v53  ;;  %v6895_v28 = vld [vmem:[%s12073_s5 + $0x428] sm:$0xf]  ;;  %v7734_v53 = vld [vmem:[%s12073_s5 + $0x8c] sm:$0xf] }
 0x2e7   : > { %3569 = vmatpush.bf16.msra.mxu0 %v6796_v63  ;;  %6934 = vmatmul.msk.bf16.vlgmr.msra.gmra.mxu1 %vm341_vm3, %v10284_v29  ;;  %v6496_v63 = vor.u32 %v7752_v49, %v6495_v47  ;;  %v7800_v47 = vld [vmem:[%s12073_s5 + $0x294] sm:$0xf0]  ;;  %v6433_v45 = vld [vmem:[%s12073_s5 + $0x98] sm:$0xf0] }
 0x2e8   : > { %3635 = vmatpush.bf16.msrb.mxu1 %v6864_v17  ;;  %v6799_v17 = vld [vmem:[%s12073_s5 + $0x368] sm:$0xf]  ;;  %v10475_v6 = vadd.f32 %v2585_v1, %v2572_v60 }
 0x2e9   : > { %3597 = vmatpush.bf16.msra.mxu2 %v6416_v0  ;;  %v6816_v0 = vor.u32 %v7832_v34, %v6815_v52  ;;  %v6879_v52 = vld [vmem:[%s12073_s5 + $0x408] sm:$0xf]  ;;  %v7848_v34 = vld [vmem:[%s12073_s5 + $0x414] sm:$0xf0] }
 0x2ea   : > { %3611 = vmatpush.bf16.msra.mxu3 %v6544_v27  ;;  %v6928_v27 = vor.u32 %v7860_v48, %v6927_v36  ;;  %v7842_v36 = vld [vmem:[%s12073_s5 + $0x3ec] sm:$0xf]  ;;  %v6865_v48 = vld [vmem:[%s12073_s5 + $0x3f8] sm:$0xf0]  ;;  %v6880_v58 = vor.u32 %v7848_v34, %v6879_v52  ;;  %v6671_v60 = vld [vmem:[%s12073_s5 + $0x268] sm:$0xf] }
 0x2eb   : > { %3570 = vmatpush.bf16.msra.mxu0 %v6780_v21  ;;  %v6800_v21 = vor.u32 %v7828_v39, %v6799_v17  ;;  %v2599_v24 = vpop.f32.mrf.mxu2  ;;  %v6868_v1 = vor.u32 %v7842_v36, %v6865_v48  ;;  %v6737_v17 = vld [vmem:[%s12073_s5 + $0x2f8] sm:$0xf0]  ;;  %v6623_v52 = vld [vmem:[%s12073_s5 + $0x208] sm:$0xf]  ;;  %v7784_v34 = vld [vmem:[%s12073_s5 + $0x214] sm:$0xf0] }
 0x2ec   : > { %3636 = vmatpush.bf16.msrb.mxu1 %v6848_v22  ;;  %v6703_v22 = vld [vmem:[%s12073_s5 + $0x2a8] sm:$0xf]  ;;  %v2613_v31 = vpop.f32.mrf.mxu3  ;;  %v6417_v39 = vld [vmem:[%s12073_s5 + $0x78] sm:$0xf0] }
 0x2ed   : > { %3598 = vmatpush.bf16.msra.mxu2 %v6400_v61  ;;  %v6720_v61 = vor.u32 %v7808_v43, %v6719_v40  ;;  %v6704_v44 = vor.u32 %v7804_v56, %v6703_v22  ;;  %v7838_v40 = vld [vmem:[%s12073_s5 + $0x3cc] sm:$0xf]  ;;  %v6401_v22 = vld [vmem:[%s12073_s5 + $0x58] sm:$0xf0]  ;;  %v6656_v56 = vor.u32 %v7792_v19, %v6655_v18 }
 0x2ee   : > { %3612 = vmatpush.bf16.msra.mxu3 %v6528_v5  ;;  %v7824_v5 = vld [vmem:[%s12073_s5 + $0x354] sm:$0xf0]  ;;  %v6369_v48 = vld [vmem:[%s12073_s5 + $0x18] sm:$0xf0]  ;;  %v7822_v19 = vld [vmem:[%s12073_s5 + $0x34c] sm:$0xf] }
 0x2ef   : > { %3571 = vmatpush.bf16.msra.mxu0 %v6764_v33  ;;  %v6449_v33 = vld [vmem:[%s12073_s5 + $0xb8] sm:$0xf0]  ;;  %v6784_v41 = vor.u32 %v7824_v5, %v6783_v62  ;;  %v7806_v62 = vld [vmem:[%s12073_s5 + $0x2cc] sm:$0xf] }
 0x2f0   : > { %3637 = vmatpush.bf16.msrb.mxu1 %v6832_v11  ;;  %v7820_v11 = vld [vmem:[%s12073_s5 + $0x334] sm:$0xf0]  ;;  %v6452_v49 = vor.u32 %v7738_v32, %v6449_v33  ;;  %v6721_v5 = vld [vmem:[%s12073_s5 + $0x2d8] sm:$0xf0] }
 0x2f1   : > { %3599 = vmatpush.bf16.msra.mxu2 %v6384_v37  ;;  %v10519_v37 = vadd.f32 %v2613_v31, %v2599_v24  ;;  %v6768_v50 = vor.u32 %v7820_v11, %v6767_v42  ;;  %v6833_v24 = vld [vmem:[%s12073_s5 + $0x3b8] sm:$0xf0]  ;;  %v7788_v31 = vld [vmem:[%s12073_s5 + $0x234] sm:$0xf0]  ;;  %v7802_v42 = vld [vmem:[%s12073_s5 + $0x2ac] sm:$0xf] }
 0x2f2   : > { %3613 = vmatpush.bf16.msra.mxu3 %v6512_v10  ;;  %v6896_v10 = vor.u32 %v7852_v30, %v6895_v28  ;;  %v6724_v28 = vor.u32 %v7806_v62, %v6721_v5  ;;  %v6639_v30 = vld [vmem:[%s12073_s5 + $0x228] sm:$0xf]  ;;  %v7830_v11 = vld [vmem:[%s12073_s5 + $0x38c] sm:$0xf]  ;;  %v6593_v18 = vld [vmem:[%s12073_s5 + $0x1d8] sm:$0xf0] }
 0x2f3   : > { %3572 = vmatpush.bf16.msra.mxu0 %v6748_v55  ;;  %v6751_v55 = vld [vmem:[%s12073_s5 + $0x308] sm:$0xf]  ;;  %v7854_v62 = vld [vmem:[%s12073_s5 + $0x44c] sm:$0xf]  ;;  %v6913_v5 = vld [vmem:[%s12073_s5 + $0x458] sm:$0xf0] }
 0x2f4   : > { %3638 = vmatpush.bf16.msrb.mxu1 %v6816_v0  ;;  %v6436_v0 = vor.u32 %v7734_v53, %v6433_v45  ;;  %v6752_v43 = vor.u32 %v7816_v59, %v6751_v55  ;;  %v7718_v53 = vld [vmem:[%s12073_s5 + $0xc] sm:$0xf]  ;;  %v6689_v55 = vld [vmem:[%s12073_s5 + $0x298] sm:$0xf0] }
 0x2f5   : > { %3600 = vmatpush.bf16.msra.mxu2 %v6368_v57  ;;  %v6688_v57 = vor.u32 %v7800_v47, %v6687_v26  ;;  %v6817_v26 = vld [vmem:[%s12073_s5 + $0x398] sm:$0xf0]  ;;  %v6640_v47 = vor.u32 %v7788_v31, %v6639_v30  ;;  %v7826_v59 = vld [vmem:[%s12073_s5 + $0x36c] sm:$0xf]  ;;  %v6916_v30 = vor.u32 %v7854_v62, %v6913_v5  ;;  %v8067_v62 = vld [vmem:[%s12073_s5 + $0xaec] sm:$0xf0] }
 0x2f6   : > { %3614 = vmatpush.bf16.msra.mxu3 %v6496_v63  ;;  %3573 = vmatmul.bf16.vlgmr.msra.gmra.mxu0 %v10072_v25  ;;  %v7796_v63 = vld [vmem:[%s12073_s5 + $0x274] sm:$0xf0]  ;;  %v6820_v36 = vor.u32 %v7830_v11, %v6817_v26  ;;  %v7770_v31 = vld [vmem:[%s12073_s5 + $0x1ac] sm:$0xf]  ;;  %v7435_v5 = vld [vmem:[%s12073_s5 + $0xbc0] sm:$0xf] }
 0x2f7   : > { %3621 = vmatpush.bf16.msrb.mxu0 %v6736_v4  ;;  %v7730_v4 = vld [vmem:[%s12073_s5 + $0x6c] sm:$0xf]  ;;  %v6672_v12 = vor.u32 %v7796_v63, %v6671_v60  ;;  %v6801_v60 = vld [vmem:[%s12073_s5 + $0x378] sm:$0xf0] }
 0x2f8   : > { %3601 = vmatmul.bf16.vlgmr.msra.gmra.mxu2 %v10172_v15  ;;  %3639 = vmatpush.bf16.msrb.mxu1 %v6800_v21  ;;  %v6420_v21 = vor.u32 %v7730_v4, %v6417_v39  ;;  %v7858_v63 = vld [vmem:[%s12073_s5 + $0x46c] sm:$0xf]  ;;  %v6624_v4 = vor.u32 %v7784_v34, %v6623_v52 }
 0x2f9   : > { %3653 = vmatpush.bf16.msrb.mxu2 %v6928_v27  ;;  %3615 = vmatmul.bf16.vlgmr.msra.gmra.mxu3 %v10091_v38  ;;  %v7810_v27 = vld [vmem:[%s12073_s5 + $0x2ec] sm:$0xf] }
 0x2fa   : > { %3663 = vmatpush.bf16.msrb.mxu3 %v6484_v7  ;;  %v6849_v7 = vld [vmem:[%s12073_s5 + $0x3d8] sm:$0xf0]  ;;  %v6740_v14 = vor.u32 %v7810_v27, %v6737_v17  ;;  %v6372_v17 = vor.u32 %v7718_v53, %v6369_v48  ;;  %v7766_v52 = vld [vmem:[%s12073_s5 + $0x18c] sm:$0xf] }
 0x2fb   : > { %3622 = vmatpush.bf16.msrb.mxu0 %v6720_v61  ;;  %v6852_v61 = vor.u32 %v7838_v40, %v6849_v7  ;;  %v7794_v40 = vld [vmem:[%s12073_s5 + $0x26c] sm:$0xf]  ;;  %v6673_v7 = vld [vmem:[%s12073_s5 + $0x278] sm:$0xf0] }
 0x2fc   : > { %3640 = vmatpush.bf16.msrb.mxu1 %v6784_v41  ;;  %v7722_v41 = vld [vmem:[%s12073_s5 + $0x2c] sm:$0xf]  ;;  %v6753_v48 = vld [vmem:[%s12073_s5 + $0x318] sm:$0xf0] }
 0x2fd   : > { %3654 = vmatpush.bf16.msrb.mxu2 %v6912_v3  ;;  %v7726_v3 = vld [vmem:[%s12073_s5 + $0x4c] sm:$0xf] }
 0x2fe   : > { %3664 = vmatpush.bf16.msrb.mxu3 %v6468_v23  ;;  %v7834_v23 = vld [vmem:[%s12073_s5 + $0x3ac] sm:$0xf]  ;;  %v6404_v32 = vor.u32 %v7726_v3, %v6401_v22  ;;  %v6785_v3 = vld [vmem:[%s12073_s5 + $0x358] sm:$0xf0]  ;;  %v6676_v22 = vor.u32 %v7794_v40, %v6673_v7 }
 0x2ff   : > { %3623 = vmatpush.bf16.msrb.mxu0 %v6704_v44  ;;  %v6836_v33 = vor.u32 %v7834_v23, %v6833_v24  ;;  %v6705_v44 = vld [vmem:[%s12073_s5 + $0x2b8] sm:$0xf0]  ;;  %v7790_v24 = vld [vmem:[%s12073_s5 + $0x24c] sm:$0xf] }
 0x300   : > { %3641 = vmatpush.bf16.msrb.mxu1 %v6768_v50  ;;  %v7798_v50 = vld [vmem:[%s12073_s5 + $0x28c] sm:$0xf] }
 0x301   : > { %3655 = vmatpush.bf16.msrb.mxu2 %v6896_v10  ;;  %v6385_v10 = vld [vmem:[%s12073_s5 + $0x38] sm:$0xf0]  ;;  %v6692_v27 = vor.u32 %v7798_v50, %v6689_v55 }
 0x302   : > { %3665 = vmatpush.bf16.msrb.mxu3 %v6452_v49  ;;  %v6708_v49 = vor.u32 %v7802_v42, %v6705_v44  ;;  %v6388_v45 = vor.u32 %v7722_v41, %v6385_v10  ;;  %v10713_v41 = vpop.f32.mrf.mxu3  ;;  %v6769_v42 = vld [vmem:[%s12073_s5 + $0x338] sm:$0xf0]  ;;  %v7850_v44 = vld [vmem:[%s12073_s5 + $0x42c] sm:$0xf] }
 0x303   : > { %3624 = vmatpush.bf16.msrb.mxu0 %v6688_v57  ;;  %v7778_v57 = vld [vmem:[%s12073_s5 + $0x1ec] sm:$0xf]  ;;  %v6897_v10 = vld [vmem:[%s12073_s5 + $0x438] sm:$0xf0] }
 0x304   : > { %3642 = vmatpush.bf16.msrb.mxu1 %v6752_v43  ;;  %v6804_v43 = vor.u32 %v7826_v59, %v6801_v60  ;;  %v6900_v53 = vor.u32 %v7850_v44, %v6897_v10  ;;  %v7451_v59 = vld [vmem:[%s12073_s5 + $0xbe0] sm:$0xf]  ;;  %v8063_v10 = vld [vmem:[%s12073_s5 + $0xacc] sm:$0xf0] }
 0x305   : > { %3656 = vmatpush.bf16.msrb.mxu2 %v6880_v58  ;;  %v6609_v58 = vld [vmem:[%s12073_s5 + $0x1f8] sm:$0xf0]  ;;  %v7307_v44 = vld [vmem:[%s12073_s5 + $0xac0] sm:$0xf] }
 0x306   : > { %3666 = vmatpush.bf16.msrb.mxu3 %v6436_v0  ;;  %v6929_v0 = vld [vmem:[%s12073_s5 + $0x478] sm:$0xf0]  ;;  %v6612_v39 = vor.u32 %v7778_v57, %v6609_v58  ;;  %v7846_v57 = vld [vmem:[%s12073_s5 + $0x40c] sm:$0xf] }
 0x307   : > { %3625 = vmatpush.bf16.msrb.mxu0 %v6672_v12  ;;  %3643 = vmatmul.bf16.vlgmr.msrb.gmra.mxu1 %v10072_v25  ;;  %v6932_v12 = vor.u32 %v7858_v63, %v6929_v0  ;;  %v6881_v58 = vld [vmem:[%s12073_s5 + $0x418] sm:$0xf0]  ;;  %v8099_v63 = vld [vmem:[%s12073_s5 + $0xbec] sm:$0xf0]  ;;  %v7579_v0 = vld [vmem:[%s12073_s5 + $0xce0] sm:$0xf] }
 0x308   : > { %3691 = vmatpush.bf16.msra.mxu1 %v6740_v14  ;;  %6935 = vmatmul.msk.bf16.vlgmr.msrb.gmra.mxu2 %vm341_vm3, %v10284_v29  ;;  %v7774_v14 = vld [vmem:[%s12073_s5 + $0x1cc] sm:$0xf]  ;;  %v6884_v7 = vor.u32 %v7846_v57, %v6881_v58  ;;  %v6513_v57 = vld [vmem:[%s12073_s5 + $0x138] sm:$0xf0] }
 0x309   : > { %3705 = vmatpush.bf16.msra.mxu2 %v6868_v1  ;;  %v10668_v1 = vpop.f32.mrf.mxu1  ;;  %v6596_v23 = vor.u32 %v7774_v14, %v6593_v18  ;;  %v7452_v18 = vor.u32 %v8099_v63, %v7451_v59  ;;  %v7403_v63 = vld [vmem:[%s12073_s5 + $0xb80] sm:$0xf] }
 0x30a   : > { %3667 = vmatpush.bf16.msrb.mxu3 %v6420_v21  ;;  %v10685_v21 = vpop.f32.mrf.mxu0 }
 0x30b   : > { %3626 = vmatpush.bf16.msrb.mxu0 %v6656_v56  ;;  %v6657_v56 = vld [vmem:[%s12073_s5 + $0x258] sm:$0xf0] }
 0x30c   : > { %3692 = vmatpush.bf16.msra.mxu1 %v6724_v28  ;;  %v6788_v28 = vor.u32 %v7822_v19, %v6785_v3  ;;  %v6660_v11 = vor.u32 %v7790_v24, %v6657_v56  ;;  %v10780_v14 = vpop.f32.mrf.mxu3  ;;  %v7323_v3 = vld [vmem:[%s12073_s5 + $0xae0] sm:$0xf]  ;;  %v8127_v56 = vld [vmem:[%s12073_s5 + $0xccc] sm:$0xf0] }
 0x30d   : > { %3706 = vmatpush.bf16.msra.mxu2 %v6852_v61  ;;  %v10687_v61 = vpop.f32.mrf.mxu2  ;;  %v7563_v24 = vld [vmem:[%s12073_s5 + $0xcc0] sm:$0xf] }
 0x30e   : > { %3668 = vmatpush.bf16.msrb.mxu3 %v6404_v32  ;;  %v6577_v32 = vld [vmem:[%s12073_s5 + $0x1b8] sm:$0xf0] }
 0x30f   : > { %3627 = vmatpush.bf16.msrb.mxu0 %v6640_v47  ;;  %v6580_v26 = vor.u32 %v7770_v31, %v6577_v32  ;;  %v7786_v47 = vld [vmem:[%s12073_s5 + $0x22c] sm:$0xf]  ;;  %v6529_v32 = vld [vmem:[%s12073_s5 + $0x158] sm:$0xf0] }
 0x310   : > { %3693 = vmatpush.bf16.msra.mxu1 %v6708_v49  ;;  %v6641_v49 = vld [vmem:[%s12073_s5 + $0x238] sm:$0xf0]  ;;  %v7758_v31 = vld [vmem:[%s12073_s5 + $0x14c] sm:$0xf] }
 0x311   : > { %3707 = vmatpush.bf16.msra.mxu2 %v6836_v33  ;;  %v7818_v33 = vld [vmem:[%s12073_s5 + $0x32c] sm:$0xf]  ;;  %v10735_v34 = vpop.f32.mrf.mxu1  ;;  %v6644_v60 = vor.u32 %v7786_v47, %v6641_v49  ;;  %v8091_v47 = vld [vmem:[%s12073_s5 + $0xbac] sm:$0xf0]  ;;  %v7547_v49 = vld [vmem:[%s12073_s5 + $0xca0] sm:$0xf] }
 0x312   : > { %3669 = vmatpush.bf16.msrb.mxu3 %v6388_v45  ;;  %v6561_v45 = vld [vmem:[%s12073_s5 + $0x198] sm:$0xf0]  ;;  %v10746_v50 = vpop.f32.mrf.mxu0 }
 0x313   : > { %3628 = vmatpush.bf16.msrb.mxu0 %v6624_v4  ;;  %v8131_v4 = vld [vmem:[%s12073_s5 + $0xcec] sm:$0xf0] }
 0x314   : > { %3694 = vmatpush.bf16.msra.mxu1 %v6692_v27  ;;  %v6564_v27 = vor.u32 %v7766_v52, %v6561_v45  ;;  %v7580_v19 = vor.u32 %v8131_v4, %v7579_v0  ;;  %v8123_v52 = vld [vmem:[%s12073_s5 + $0xcac] sm:$0xf0]  ;;  %v6532_v45 = vor.u32 %v7758_v31, %v6529_v32  ;;  %v7531_v4 = vld [vmem:[%s12073_s5 + $0xc80] sm:$0xf] }
 0x315   : > { %3708 = vmatpush.bf16.msra.mxu2 %v6820_v36  ;;  %v7814_v36 = vld [vmem:[%s12073_s5 + $0x30c] sm:$0xf]  ;;  %v10748_v55 = vpop.f32.mrf.mxu2  ;;  %v7548_v59 = vor.u32 %v8123_v52, %v7547_v49  ;;  %v8087_v0 = vld [vmem:[%s12073_s5 + $0xb8c] sm:$0xf0]  ;;  %v7371_v49 = vld [vmem:[%s12073_s5 + $0xb40] sm:$0xf] }
 0x316   : > { %3670 = vmatpush.bf16.msrb.mxu3 %v6372_v17  ;;  %3629 = vmatmul.bf16.vlgmr.msrb.gmra.mxu0 %v10061_v2  ;;  %v7782_v17 = vld [vmem:[%s12073_s5 + $0x20c] sm:$0xf]  ;;  %v6756_v40 = vor.u32 %v7814_v36, %v6753_v48  ;;  %v7308_v36 = vor.u32 %v8063_v10, %v7307_v44 }
 0x317   : > { %3677 = vmatpush.bf16.msra.mxu0 %v6612_v39  ;;  %v6625_v39 = vld [vmem:[%s12073_s5 + $0x218] sm:$0xf0]  ;;  %v7754_v48 = vld [vmem:[%s12073_s5 + $0x12c] sm:$0xf] }
 0x318   : > { %3695 = vmatpush.bf16.msra.mxu1 %v6676_v22  ;;  %v6628_v22 = vor.u32 %v7782_v17, %v6625_v39  ;;  %v10858_v17 = vpop.f32.mrf.mxu3  ;;  %v6516_v39 = vor.u32 %v7754_v48, %v6513_v57  ;;  %v8111_v48 = vld [vmem:[%s12073_s5 + $0xc4c] sm:$0xf0] }
 0x319   : > { %3709 = vmatpush.bf16.msra.mxu2 %v6804_v43  ;;  %3671 = vmatmul.bf16.vlgmr.msrb.gmra.mxu3 %v10172_v15  ;;  %v6772_v15 = vor.u32 %v7818_v33, %v6769_v42  ;;  %v7762_v43 = vld [vmem:[%s12073_s5 + $0x16c] sm:$0xf]  ;;  %v7564_v42 = vor.u32 %v8127_v56, %v7563_v24 }
 0x31a   : > { %3723 = vmatpush.bf16.msra.mxu3 %v6932_v12  ;;  %v6545_v12 = vld [vmem:[%s12073_s5 + $0x178] sm:$0xf0] }
 0x31b   : > { %3678 = vmatpush.bf16.msra.mxu0 %v6596_v23  ;;  %v8095_v23 = vld [vmem:[%s12073_s5 + $0xbcc] sm:$0xf0] }
 0x31c   : > { %3696 = vmatpush.bf16.msra.mxu1 %v6660_v11  ;;  %v7436_v33 = vor.u32 %v8095_v23, %v7435_v5  ;;  %v7419_v11 = vld [vmem:[%s12073_s5 + $0xba0] sm:$0xf]  ;;  %v8083_v5 = vld [vmem:[%s12073_s5 + $0xb6c] sm:$0xf0] }
 0x31d   : > { %3710 = vmatpush.bf16.msra.mxu2 %v6788_v28  ;;  %v6548_v28 = vor.u32 %v7762_v43, %v6545_v12  ;;  %v7420_v58 = vor.u32 %v8091_v47, %v7419_v11  ;;  %v7275_v43 = vld [vmem:[%s12073_s5 + $0xa80] sm:$0xf]  ;;  %v7404_v12 = vor.u32 %v8087_v0, %v7403_v63  ;;  %v8115_v23 = vld [vmem:[%s12073_s5 + $0xc6c] sm:$0xf0] }
 0x31e   : > { %3724 = vmatpush.bf16.msra.mxu3 %v6916_v30  ;;  %v7324_v30 = vor.u32 %v8067_v62, %v7323_v3  ;;  %v8035_v3 = vld [vmem:[%s12073_s5 + $0x9ec] sm:$0xf0]  ;;  %v7387_v62 = vld [vmem:[%s12073_s5 + $0xb60] sm:$0xf] }
 0x31f   : > { %3679 = vmatpush.bf16.msra.mxu0 %v6580_v26  ;;  %v10815_v26 = vpop.f32.mrf.mxu1  ;;  %v7388_v10 = vor.u32 %v8083_v5, %v7387_v62  ;;  %v7179_v47 = vld [vmem:[%s12073_s5 + $0x9c0] sm:$0xf]  ;;  %v8047_v0 = vld [vmem:[%s12073_s5 + $0xa4c] sm:$0xf0]  ;;  %v3736_v5 = vld [vmem:[#allocation3 + $0x18] sm:$0xfc] }
 0x320   : > { %3697 = vmatpush.bf16.msra.mxu1 %v6644_v60  ;;  %v8059_v60 = vld [vmem:[%s12073_s5 + $0xaac] sm:$0xf0]  ;;  %v2725_v57 = vpop.f32.mrf.mxu3  ;;  %v7243_v63 = vld [vmem:[%s12073_s5 + $0xa40] sm:$0xf] }
 0x321   : > { %3711 = vmatpush.bf16.msra.mxu2 %v6772_v15  ;;  %v10826_v15 = vpop.f32.mrf.mxu0 }
 0x322   : > { %3725 = vmatpush.bf16.msra.mxu3 %v6900_v53  ;;  %v10828_v53 = vpop.f32.mrf.mxu2 }
 0x323   : > { %3680 = vmatpush.bf16.msra.mxu0 %v6564_v27  ;;  %v8119_v27 = vld [vmem:[%s12073_s5 + $0xc8c] sm:$0xf0] }
 0x324   : > { %3698 = vmatpush.bf16.msra.mxu1 %v6628_v22  ;;  %v7515_v22 = vld [vmem:[%s12073_s5 + $0xc60] sm:$0xf] }
 0x325   : > { %3712 = vmatpush.bf16.msra.mxu2 %v6756_v40  ;;  %v7516_v11 = vor.u32 %v8115_v23, %v7515_v22  ;;  %v3741_v22 = vld [vmem:[#allocation3 + $0x68] sm:$0x3]  ;;  %v10947_v23 = vld [vmem:[#allocation3 + $0x8] sm:$0xfc] }
 0x326   : > { %3726 = vmatpush.bf16.msra.mxu3 %v6884_v7  ;;  %v6497_v7 = vld [vmem:[%s12073_s5 + $0x118] sm:$0xf0] }
 0x327   : > { %3681 = vmatpush.bf16.msra.mxu0 %v6548_v28  ;;  %3699 = vmatmul.bf16.vlgmr.msra.gmra.mxu1 %v10061_v2  ;;  %v7750_v2 = vld [vmem:[%s12073_s5 + $0x10c] sm:$0xf]  ;;  %v2697_v24 = vpop.f32.mrf.mxu1 }
 0x328   : > { %3713 = vmatmul.bf16.vlgmr.msra.gmra.mxu2 %v10072_v25  ;;  %4665 = vmatpush.bf16.msrb.mxu1 %v7324_v30  ;;  %v7291_v25 = vld [vmem:[%s12073_s5 + $0xaa0] sm:$0xf]  ;;  %v6500_v28 = vor.u32 %v7750_v2, %v6497_v7 }
 0x329   : > { %4679 = vmatpush.bf16.msrb.mxu2 %v7452_v18  ;;  %6936 = vmatmul.msk.bf16.vlgmr.msra.gmra.mxu3 %vm341_vm3, %v10284_v29  ;;  %v7292_v40 = vor.u32 %v8059_v60, %v7291_v25  ;;  %v8055_v29 = vld [vmem:[%s12073_s5 + $0xa8c] sm:$0xf0]  ;;  %v7532_v18 = vor.u32 %v8119_v27, %v7531_v4  ;;  %v2683_v56 = vpop.f32.mrf.mxu0  ;;  %v10923_v4 = vld [vmem:[#allocation3 + $0x60] sm:$0x3] }
 0x32a   : > { %4693 = vmatpush.bf16.msrb.mxu3 %v7580_v19  ;;  %v7195_v19 = vld [vmem:[%s12073_s5 + $0x9e0] sm:$0xf]  ;;  %v2684_v30 = vadd.f32 %v2683_v56, %v10780_v14  ;;  %v7276_v31 = vor.u32 %v8055_v29, %v7275_v43  ;;  %v2711_v44 = vpop.f32.mrf.mxu2  ;;  %v8031_v14 = vld [vmem:[%s12073_s5 + $0x9cc] sm:$0xf0] }
 0x32b   : > { %3682 = vmatpush.bf16.msra.mxu0 %v6532_v45  ;;  %v7196_v32 = vor.u32 %v8035_v3, %v7195_v19  ;;  %v8079_v45 = vld [vmem:[%s12073_s5 + $0xb4c] sm:$0xf0]  ;;  %v7180_v60 = vor.u32 %v8031_v14, %v7179_v47  ;;  %v7163_v2 = vld [vmem:[%s12073_s5 + $0x9a0] sm:$0xf]  ;;  %v8167_v3 = vld [vmem:[#allocation3 + $0x38] sm:$0xff]  ;;  %v3750_v47 = vpack.c.bf16 %v10923_v4, %v10923_v4 }
 0x32c   : > { %4666 = vmatpush.bf16.msrb.mxu1 %v7308_v36  ;;  %v2698_v52 = vadd.f32 %v2697_v24, %v2684_v30  ;;  %v7499_v36 = vld [vmem:[%s12073_s5 + $0xc40] sm:$0xf]  ;;  %v7372_v27 = vor.u32 %v8079_v45, %v7371_v49  ;;  %v8075_v29 = vld [vmem:[%s12073_s5 + $0xb2c] sm:$0xf0]  ;;  %v7244_v24 = vor.u32 %v8047_v0, %v7243_v63  ;;  %v8065_v45 = vld [vmem:[%s12073_s5 + $0xae4] sm:$0xf] }
 0x32d   : > { %4680 = vmatpush.bf16.msrb.mxu2 %v7436_v33  ;;  %v7259_v33 = vld [vmem:[%s12073_s5 + $0xa60] sm:$0xf]  ;;  %v8043_v30 = vld [vmem:[%s12073_s5 + $0xa2c] sm:$0xf0] }
 0x32e   : > { %4694 = vmatpush.bf16.msrb.mxu3 %v7564_v42  ;;  %v8051_v42 = vld [vmem:[%s12073_s5 + $0xa6c] sm:$0xf0]  ;;  %v7355_v7 = vld [vmem:[%s12073_s5 + $0xb20] sm:$0xf] }
 0x32f   : > { %3683 = vmatpush.bf16.msra.mxu0 %v6516_v39  ;;  %v7260_v25 = vor.u32 %v8051_v42, %v7259_v33  ;;  %v7500_v39 = vor.u32 %v8111_v48, %v7499_v36  ;;  %v2699_v33 = vpop.f32.mrf.mxu1  ;;  %v7467_v49 = vld [vmem:[%s12073_s5 + $0xc00] sm:$0xf]  ;;  %v7325_v48 = vld [vmem:[%s12073_s5 + $0xaf0] sm:$0xf0] }
 0x330   : > { %4667 = vmatpush.bf16.msrb.mxu1 %v7292_v40  ;;  %v8027_v40 = vld [vmem:[%s12073_s5 + $0x9ac] sm:$0xf0] }
 0x331   : > { %4681 = vmatpush.bf16.msrb.mxu2 %v7420_v58  ;;  %v10915_v58 = vld [vmem:[#allocation3 + $0x10] sm:$0xfc]  ;;  %v2685_v19 = vpop.f32.mrf.mxu0  ;;  %v7164_v56 = vor.u32 %v8027_v40, %v7163_v2  ;;  %v2727_v40 = vpop.f32.mrf.mxu3 }
 0x332   : > { %4695 = vmatpush.bf16.msrb.mxu3 %v7548_v59  ;;  %v2712_v59 = vadd.f32 %v2711_v44, %v2698_v52  ;;  %v3745_v62 = vpack.c.bf16 %v8167_v3, %v10915_v58  ;;  %v8023_v44 = vld [vmem:[%s12073_s5 + $0x98c] sm:$0xf0]  ;;  %v2713_v36 = vpop.f32.mrf.mxu2  ;;  %v7453_v58 = vld [vmem:[%s12073_s5 + $0xbf0] sm:$0xf0] }
 0x333   : > { %3684 = vmatpush.bf16.msra.mxu0 %v6500_v28  ;;  %v7227_v28 = vld [vmem:[%s12073_s5 + $0xa20] sm:$0xf]  ;;  %v8103_v52 = vld [vmem:[%s12073_s5 + $0xc0c] sm:$0xf0] }
 0x334   : > { %4668 = vmatpush.bf16.msrb.mxu1 %v7276_v31  ;;  %v10934_v43 = vadd.f32 %v2725_v57, %v2712_v59  ;;  %v7147_v31 = vld [vmem:[%s12073_s5 + $0x980] sm:$0xf]  ;;  %v8097_v57 = vld [vmem:[%s12073_s5 + $0xbe4] sm:$0xf]  ;;  %v8169_v63 = vld [vmem:[#allocation3 + $0x30] sm:$0xff]  ;;  %v3915_v2 = vrot.slane %v3745_v62, 1 }
 0x335   : > { %4682 = vmatpush.bf16.msrb.mxu2 %v7404_v12  ;;  %v7483_v12 = vld [vmem:[%s12073_s5 + $0xc20] sm:$0xf]  ;;  %v3744_v0 = vpack.c.bf16 %v8169_v63, %v10947_v23  ;;  %v7456_v23 = vor.u32 %v8097_v57, %v7453_v58  ;;  %v7181_v57 = vld [vmem:[%s12073_s5 + $0x9d0] sm:$0xf0]  ;;  %v8057_v58 = vld [vmem:[%s12073_s5 + $0xaa4] sm:$0xf] }
 0x336   : > { %4696 = vmatpush.bf16.msrb.mxu3 %v7532_v18  ;;  %3685 = vmatmul.bf16.vlgmr.msra.gmra.mxu0 %v10091_v38  ;;  %v8107_v18 = vld [vmem:[%s12073_s5 + $0xc2c] sm:$0xf0]  ;;  %v2686_v38 = vadd.f32 %v2685_v19, %v10858_v17  ;;  %v7356_v17 = vor.u32 %v8075_v29, %v7355_v7  ;;  %v8168_v59 = vld [vmem:[#allocation3 + $0x40] sm:$0xff]  ;;  %v7468_v29 = vor.u32 %v8103_v52, %v7467_v49  ;;  %v3916_v19 = vrot.slane %v3750_v47, 1  ;;  %v7421_v63 = vld [vmem:[%s12073_s5 + $0xbb0] sm:$0xf0] }
 0x337   : > { %4651 = vmatpush.bf16.msrb.mxu0 %v7196_v32  ;;  %v3739_v32 = vld [vmem:[#allocation3 + $0x58] sm:$0x3]  ;;  %v7484_v42 = vor.u32 %v8107_v18, %v7483_v12  ;;  %v7211_v12 = vld [vmem:[%s12073_s5 + $0xa00] sm:$0xf]  ;;  %v8039_v18 = vld [vmem:[%s12073_s5 + $0xa0c] sm:$0xf0] }
 0x338   : > { %4669 = vmatpush.bf16.msrb.mxu1 %v7260_v25  ;;  %v2700_v14 = vadd.f32 %v2699_v33, %v2686_v38  ;;  %v3746_v25 = vpack.c.bf16 %v8168_v59, %v3736_v5  ;;  %v3749_v3 = vpack.c.bf16 %v3739_v32, %v3739_v32  ;;  %v7131_v62 = vld [vmem:[%s12073_s5 + $0x960] sm:$0xf]  ;;  %v8019_v38 = vld [vmem:[%s12073_s5 + $0x96c] sm:$0xf0]  ;;  %v7293_v59 = vld [vmem:[%s12073_s5 + $0xab0] sm:$0xf0] }
 0x339   : > { %4683 = vmatpush.bf16.msrb.mxu2 %v7388_v10  ;;  %v7339_v10 = vld [vmem:[%s12073_s5 + $0xb00] sm:$0xf]  ;;  %v8015_v52 = vld [vmem:[%s12073_s5 + $0x94c] sm:$0xf0] }
 0x33a   : > { %4697 = vmatpush.bf16.msrb.mxu3 %v7516_v11  ;;  %v8071_v11 = vld [vmem:[%s12073_s5 + $0xb0c] sm:$0xf0]  ;;  %v2714_v4 = vadd.f32 %v2713_v36, %v2700_v14  ;;  %v3918_v32 = vrot.slane %v3746_v25, 1  ;;  %v7115_v49 = vld [vmem:[%s12073_s5 + $0x940] sm:$0xf]  ;;  %v11031_v36 = vsel %vm3908_vm12, %v3915_v2, %v3916_v19 }
 0x33b   : > { %4652 = vmatpush.bf16.msrb.mxu0 %v7180_v60  ;;  %v3751_v60 = vpack.c.bf16 %v3741_v22, %v3741_v22  ;;  %v7340_v7 = vor.u32 %v8071_v11, %v7339_v10  ;;  %v7328_v22 = vor.u32 %v8065_v45, %v7325_v48  ;;  %v3912_v10 = vrot.slane %v3744_v0, 1  ;;  %v8029_v45 = vld [vmem:[%s12073_s5 + $0x9c4] sm:$0xf]  ;;  %v7165_v19 = vld [vmem:[%s12073_s5 + $0x9b0] sm:$0xf0] }
 0x33c   : > { %4670 = vmatpush.bf16.msrb.mxu1 %v7244_v24  ;;  %v10995_v5 = vadd.f32 %v2727_v40, %v2714_v4  ;;  %v8033_v24 = vld [vmem:[%s12073_s5 + $0x9e4] sm:$0xf]  ;;  %v3913_v11 = vrot.slane %v3749_v3, 1  ;;  %v7116_v0 = vor.u32 %v8015_v52, %v7115_v49  ;;  %v7184_v2 = vor.u32 %v8029_v45, %v7181_v57  ;;  %v7261_v49 = vld [vmem:[%s12073_s5 + $0xa70] sm:$0xf0]  ;;  %v3476_v45 = vpop.f32.mrf.mxu1 }
 0x33d   : > { %4684 = vmatpush.bf16.msrb.mxu2 %v7372_v27  ;;  %v7228_v27 = vor.u32 %v8043_v30, %v7227_v28  ;;  %v8061_v28 = vld [vmem:[%s12073_s5 + $0xac4] sm:$0xf]  ;;  %v7309_v30 = vld [vmem:[%s12073_s5 + $0xad0] sm:$0xf0]  ;;  %v3919_v33 = vrot.slane %v3751_v60, 1  ;;  %v7296_v40 = vor.u32 %v8057_v58, %v7293_v59 }
 0x33e   : > { %4698 = vmatpush.bf16.msrb.mxu3 %v7500_v39  ;;  %v7148_v39 = vor.u32 %v8023_v44, %v7147_v31  ;;  %v7212_v31 = vor.u32 %v8039_v18, %v7211_v12  ;;  %v7132_v44 = vor.u32 %v8019_v38, %v7131_v62  ;;  %v7312_v14 = vor.u32 %v8061_v28, %v7309_v30  ;;  %v8089_v60 = vld [vmem:[%s12073_s5 + $0xba4] sm:$0xf]  ;;  %v7405_v62 = vld [vmem:[%s12073_s5 + $0xb90] sm:$0xf0] }
 0x33f   : > { %4653 = vmatpush.bf16.msrb.mxu0 %v7164_v56  ;;  %v7197_v56 = vld [vmem:[%s12073_s5 + $0x9f0] sm:$0xf0]  ;;  %v11044_v25 = vsel %vm3908_vm12, %v3918_v32, %v3919_v33  ;;  %v3733_v4 = vld [vmem:[#allocation3] sm:$0xfc]  ;;  %v7424_v18 = vor.u32 %v8089_v60, %v7421_v63  ;;  %v8007_v32 = vld [vmem:[%s12073_s5 + $0x90c] sm:$0xf0] }
 0x340   : > { %4671 = vmatpush.bf16.msrb.mxu1 %v7228_v27  ;;  %v7200_v47 = vor.u32 %v8033_v24, %v7197_v56  ;;  %v3738_v27 = vld [vmem:[#allocation3 + $0x50] sm:$0x3]  ;;  %v8025_v12 = vld [vmem:[%s12073_s5 + $0x9a4] sm:$0xf]  ;;  %v7083_v24 = vld [vmem:[%s12073_s5 + $0x900] sm:$0xf] }
 0x341   : > { %4685 = vmatpush.bf16.msrb.mxu2 %v7356_v17  ;;  %v8093_v17 = vld [vmem:[%s12073_s5 + $0xbc4] sm:$0xf]  ;;  %v8170_v56 = vld [vmem:[#allocation3 + $0x28] sm:$0xff]  ;;  %v7168_v30 = vor.u32 %v8025_v12, %v7165_v19  ;;  %v7084_v57 = vor.u32 %v8007_v32, %v7083_v24  ;;  %v3504_v12 = vpop.f32.mrf.mxu3  ;;  %v7245_v19 = vld [vmem:[%s12073_s5 + $0xa50] sm:$0xf0] }
 0x342   : > { %4699 = vmatpush.bf16.msrb.mxu3 %v7484_v42  ;;  %v7437_v42 = vld [vmem:[%s12073_s5 + $0xbd0] sm:$0xf0]  ;;  %v8053_v3 = vld [vmem:[%s12073_s5 + $0xa84] sm:$0xf]  ;;  %v3743_v28 = vpack.c.bf16 %v8170_v56, %v3733_v4  ;;  %v7611_v32 = vld [vmem:[%s12073_s5 + $0xd20] sm:$0xf] }
 0x343   : > { %4654 = vmatpush.bf16.msrb.mxu0 %v7148_v39  ;;  %v7440_v48 = vor.u32 %v8093_v17, %v7437_v42  ;;  %v11054_v39 = vsel %vm3908_vm12, %v3912_v10, %v3913_v11  ;;  %v8021_v33 = vld [vmem:[%s12073_s5 + $0x984] sm:$0xf]  ;;  %v7149_v17 = vld [vmem:[%s12073_s5 + $0x990] sm:$0xf0]  ;;  %v3748_v42 = vpack.c.bf16 %v3738_v27, %v3738_v27  ;;  %v7643_v11 = vld [vmem:[%s12073_s5 + $0xd60] sm:$0xf]  ;;  %v3490_v27 = vpop.f32.mrf.mxu2 }
 0x344   : > { %4672 = vmatpush.bf16.msrb.mxu1 %v7212_v31  ;;  %v3909_v58 = vrot.slane %v3743_v28, 1  ;;  %v7152_v60 = vor.u32 %v8021_v33, %v7149_v17  ;;  %v8017_v4 = vld [vmem:[%s12073_s5 + $0x964] sm:$0xf]  ;;  %v7117_v56 = vld [vmem:[%s12073_s5 + $0x950] sm:$0xf0] }
 0x345   : > { %4686 = vmatpush.bf16.msrb.mxu2 %v7340_v7  ;;  %v7099_v7 = vld [vmem:[%s12073_s5 + $0x920] sm:$0xf]  ;;  %v8013_v24 = vld [vmem:[%s12073_s5 + $0x944] sm:$0xf]  ;;  %v8139_v33 = vld [vmem:[%s12073_s5 + $0xd2c] sm:$0xf0] }
 0x346   : > { %4700 = vmatpush.bf16.msrb.mxu3 %v7468_v29  ;;  %v8011_v29 = vld [vmem:[%s12073_s5 + $0x92c] sm:$0xf0]  ;;  %v8041_v17 = vld [vmem:[%s12073_s5 + $0xa24] sm:$0xf] }
 0x347   : > { %4655 = vmatpush.bf16.msrb.mxu0 %v7132_v44  ;;  %4673 = vmatmul.bf16.vlgmr.msrb.gmra.mxu1 %v11054_v39  ;;  %v7100_v38 = vor.u32 %v8011_v29, %v7099_v7  ;;  %v2476_v44 = vadd.f32 %v10273_v13, %v10271_v9  ;;  %v8081_v9 = vld [vmem:[%s12073_s5 + $0xb64] sm:$0xf]  ;;  %v7389_v13 = vld [vmem:[%s12073_s5 + $0xb70] sm:$0xf0]  ;;  %v7627_v7 = vld [vmem:[%s12073_s5 + $0xd40] sm:$0xf] }
 0x348   : > { %4687 = vmatmul.bf16.vlgmr.msrb.gmra.mxu2 %v11031_v36  ;;  %4721 = vmatpush.bf16.msra.mxu1 %v7200_v47  ;;  %v8147_v47 = vld [vmem:[%s12073_s5 + $0xd6c] sm:$0xf0]  ;;  %v8045_v29 = vld [vmem:[%s12073_s5 + $0xa44] sm:$0xf] }
 0x349   : > { %4735 = vmatpush.bf16.msra.mxu2 %v7328_v22  ;;  %4701 = vmatmul.bf16.vlgmr.msrb.gmra.mxu3 %v11044_v25  ;;  %v7277_v22 = vld [vmem:[%s12073_s5 + $0xa90] sm:$0xf0]  ;;  %v2490_v52 = vadd.f32 %v10330_v46, %v2476_v44  ;;  %v7644_v63 = vor.u32 %v8147_v47, %v7643_v11 }
 0x34a   : > { %4749 = vmatpush.bf16.msra.mxu3 %v7456_v23  ;;  %v8085_v23 = vld [vmem:[%s12073_s5 + $0xb84] sm:$0xf]  ;;  %v7280_v31 = vor.u32 %v8053_v3, %v7277_v22  ;;  %v7133_v46 = vld [vmem:[%s12073_s5 + $0x970] sm:$0xf0] }
 0x34b   : > { %4656 = vmatpush.bf16.msrb.mxu0 %v7116_v0  ;;  %v7408_v10 = vor.u32 %v8085_v23, %v7405_v62  ;;  %v3910_v0 = vrot.slane %v3748_v42, 1  ;;  %v8077_v3 = vld [vmem:[%s12073_s5 + $0xb44] sm:$0xf]  ;;  %v7373_v22 = vld [vmem:[%s12073_s5 + $0xb50] sm:$0xf0]  ;;  %v2504_v23 = vadd.f32 %v10335_v16, %v2490_v52  ;;  %v7136_v62 = vor.u32 %v8017_v4, %v7133_v46 }
 0x34c   : > { %4722 = vmatpush.bf16.msra.mxu1 %v7184_v2  ;;  %v7248_v16 = vor.u32 %v8045_v29, %v7245_v19  ;;  %v7229_v44 = vld [vmem:[%s12073_s5 + $0xa30] sm:$0xf0]  ;;  %v7612_v52 = vor.u32 %v8139_v33, %v7611_v32  ;;  %v3742_v4 = vld [vmem:[#allocation3 + $0x70] sm:$0x3]  ;;  %v8036_v19 = vld [vmem:[%s12073_s5 + $0x9f4] sm:$0xf0] }
 0x34d   : > { %4736 = vmatpush.bf16.msra.mxu2 %v7312_v14  ;;  %v8049_v14 = vld [vmem:[%s12073_s5 + $0xa64] sm:$0xf]  ;;  %v2518_v42 = vadd.f32 %v10390_v8, %v2504_v23  ;;  %v7357_v11 = vld [vmem:[%s12073_s5 + $0xb30] sm:$0xf0]  ;;  %v8068_v23 = vld [vmem:[%s12073_s5 + $0xaf4] sm:$0xf0] }
 0x34e   : > { %4750 = vmatpush.bf16.msra.mxu3 %v7440_v48  ;;  %v3462_v48 = vpop.f32.mrf.mxu0  ;;  %v7264_v2 = vor.u32 %v8049_v14, %v7261_v49  ;;  %v8009_v8 = vld [vmem:[%s12073_s5 + $0x924] sm:$0xf]  ;;  %v7101_v49 = vld [vmem:[%s12073_s5 + $0x930] sm:$0xf0] }
 0x34f   : > { %4657 = vmatpush.bf16.msrb.mxu0 %v7100_v38  ;;  %v3463_v59 = vadd.f32 %v3462_v48, %v10337_v51  ;;  %v8143_v51 = vld [vmem:[%s12073_s5 + $0xd4c] sm:$0xf0]  ;;  %v8005_v32 = vld [vmem:[%s12073_s5 + $0x904] sm:$0xf]  ;;  %v7085_v33 = vld [vmem:[%s12073_s5 + $0x910] sm:$0xf0] }
 0x350   : > { %4723 = vmatpush.bf16.msra.mxu1 %v7168_v30  ;;  %v7628_v38 = vor.u32 %v8143_v51, %v7627_v7  ;;  %v11147_v30 = vsel %vm3908_vm12, %v3909_v58, %v3910_v0  ;;  %v8135_v48 = vld [vmem:[%s12073_s5 + $0xd0c] sm:$0xf0]  ;;  %v3478_v58 = vpop.f32.mrf.mxu1  ;;  %v3737_v0 = vld [vmem:[#allocation3 + $0x20] sm:$0xfc]  ;;  %v3492_v7 = vpop.f32.mrf.mxu2  ;;  %v7104_v51 = vor.u32 %v8009_v8, %v7101_v49  ;;  %v7187_v8 = vld [vmem:[%s12073_s5 + $0x9c8] sm:$0xf] }
 0x351   : > { %4737 = vmatpush.bf16.msra.mxu2 %v7296_v40  ;;  %v7392_v40 = vor.u32 %v8081_v9, %v7389_v13  ;;  %v7120_v13 = vor.u32 %v8013_v24, %v7117_v56  ;;  %v3752_v24 = vpack.c.bf16 %v3742_v4, %v3742_v4  ;;  %v8032_v49 = vld [vmem:[%s12073_s5 + $0x9d4] sm:$0xf0] }
 0x352   : > { %4751 = vmatpush.bf16.msra.mxu3 %v7424_v18  ;;  %v3477_v18 = vadd.f32 %v3476_v45, %v3463_v59  ;;  %v7595_v45 = vld [vmem:[%s12073_s5 + $0xd00] sm:$0xf]  ;;  %v7232_v59 = vor.u32 %v8041_v17, %v7229_v44  ;;  %v8145_v44 = vld [vmem:[%s12073_s5 + $0xd64] sm:$0xf] }
 0x353   : > { %4658 = vmatpush.bf16.msrb.mxu0 %v7084_v57  ;;  %v8037_v57 = vld [vmem:[%s12073_s5 + $0xa04] sm:$0xf]  ;;  %v7596_v29 = vor.u32 %v8135_v48, %v7595_v45  ;;  %v8064_v45 = vld [vmem:[%s12073_s5 + $0xad4] sm:$0xf0] }
 0x354   : > { %4724 = vmatpush.bf16.msra.mxu1 %v7152_v60  ;;  %v3491_v28 = vadd.f32 %v3490_v27, %v3477_v18  ;;  %v8069_v27 = vld [vmem:[%s12073_s5 + $0xb04] sm:$0xf]  ;;  %v7203_v18 = vld [vmem:[%s12073_s5 + $0x9e8] sm:$0xf] }
 0x355   : > { %4738 = vmatpush.bf16.msra.mxu2 %v7280_v31  ;;  %v7376_v31 = vor.u32 %v8077_v3, %v7373_v22  ;;  %v3506_v3 = vpop.f32.mrf.mxu3  ;;  %v7331_v22 = vld [vmem:[%s12073_s5 + $0xae8] sm:$0xf] }
 0x356   : > { %4752 = vmatpush.bf16.msra.mxu3 %v7408_v10  ;;  %4659 = vmatmul.bf16.vlgmr.msrb.gmra.mxu0 %v11147_v30  ;;  %v8073_v10 = vld [vmem:[%s12073_s5 + $0xb24] sm:$0xf]  ;;  %v11169_v47 = vadd.f32 %v3504_v12, %v3491_v28  ;;  %v3464_v14 = vpop.f32.mrf.mxu0  ;;  %v7581_v12 = vld [vmem:[%s12073_s5 + $0xcf0] sm:$0xf0]  ;;  %v2546_v28 = vadd.f32 %v10447_v35, %v10392_v20 }
 0x357   : > { %4711 = vmatpush.bf16.msra.mxu0 %v7644_v63  ;;  %v3465_v9 = vadd.f32 %v3464_v14, %v2518_v42  ;;  %v7360_v60 = vor.u32 %v8073_v10, %v7357_v11  ;;  %v7213_v63 = vld [vmem:[%s12073_s5 + $0xa10] sm:$0xf0]  ;;  %v7204_v42 = vor.u32 %v8036_v19, %v7203_v18  ;;  %v8125_v35 = vld [vmem:[%s12073_s5 + $0xcc4] sm:$0xf]  ;;  %v7332_v11 = vor.u32 %v8068_v23, %v7331_v22  ;;  %v8060_v22 = vld [vmem:[%s12073_s5 + $0xab4] sm:$0xf0] }
 0x358   : > { %4725 = vmatpush.bf16.msra.mxu1 %v7136_v62  ;;  %v8171_v62 = vld [vmem:[#allocation3 + $0x48] sm:$0xff]  ;;  %v7645_v20 = vld [vmem:[%s12073_s5 + $0xd70] sm:$0xf0] }
 0x359   : > { %4739 = vmatpush.bf16.msra.mxu2 %v7264_v2  ;;  %v3479_v46 = vadd.f32 %v3478_v58, %v3465_v9  ;;  %v7341_v2 = vld [vmem:[%s12073_s5 + $0xb10] sm:$0xf0]  ;;  %v2560_v58 = vadd.f32 %v10458_v54, %v2546_v28  ;;  %v8117_v28 = vld [vmem:[%s12073_s5 + $0xc84] sm:$0xf] }
 0x35a   : > { %4753 = vmatpush.bf16.msra.mxu3 %v7392_v40  ;;  %v8129_v40 = vld [vmem:[%s12073_s5 + $0xce4] sm:$0xf]  ;;  %v7565_v14 = vld [vmem:[%s12073_s5 + $0xcd0] sm:$0xf0] }
 0x35b   : > { %4712 = vmatpush.bf16.msra.mxu0 %v7628_v38  ;;  %v3747_v38 = vpack.c.bf16 %v8171_v62, %v3737_v0  ;;  %v3493_v56 = vadd.f32 %v3492_v7, %v3479_v46  ;;  %v7584_v17 = vor.u32 %v8129_v40, %v7581_v12  ;;  %v7568_v4 = vor.u32 %v8125_v35, %v7565_v14  ;;  %v7629_v54 = vld [vmem:[%s12073_s5 + $0xd50] sm:$0xf0]  ;;  %v7171_v7 = vld [vmem:[%s12073_s5 + $0x9a8] sm:$0xf] }
 0x35c   : > { %4726 = vmatpush.bf16.msra.mxu1 %v7120_v13  ;;  %v7088_v13 = vor.u32 %v8005_v32, %v7085_v33  ;;  %v7188_v46 = vor.u32 %v8032_v49, %v7187_v8  ;;  %v7155_v32 = vld [vmem:[%s12073_s5 + $0x988] sm:$0xf]  ;;  %v8024_v33 = vld [vmem:[%s12073_s5 + $0x994] sm:$0xf0] }
 0x35d   : > { %4740 = vmatpush.bf16.msra.mxu2 %v7248_v16  ;;  %v7216_v16 = vor.u32 %v8037_v57, %v7213_v63  ;;  %v11230_v10 = vadd.f32 %v3506_v3, %v3493_v56  ;;  %v3921_v48 = vrot.slane %v3747_v38, 1  ;;  %v3922_v57 = vrot.slane %v3752_v24, 1  ;;  %v3560_v18 = vpop.f32.mrf.mxu3  ;;  %v7299_v3 = vld [vmem:[%s12073_s5 + $0xaa8] sm:$0xf]  ;;  %v8137_v24 = vld [vmem:[%s12073_s5 + $0xd24] sm:$0xf] }
 0x35e   : > { %4754 = vmatpush.bf16.msra.mxu3 %v7376_v31  ;;  %v7344_v31 = vor.u32 %v8069_v27, %v7341_v2  ;;  %v3518_v9 = vpop.f32.mrf.mxu0  ;;  %v7648_v63 = vor.u32 %v8145_v44, %v7645_v20  ;;  %v8141_v27 = vld [vmem:[%s12073_s5 + $0xd44] sm:$0xf]  ;;  %v3546_v2 = vpop.f32.mrf.mxu2  ;;  %v7613_v56 = vld [vmem:[%s12073_s5 + $0xd30] sm:$0xf0]  ;;  %v7283_v44 = vld [vmem:[%s12073_s5 + $0xa88] sm:$0xf] }
 0x35f   : > { %4713 = vmatpush.bf16.msra.mxu0 %v7612_v52  ;;  %v7315_v52 = vld [vmem:[%s12073_s5 + $0xac8] sm:$0xf]  ;;  %v11273_v19 = vsel %vm3908_vm12, %v3921_v48, %v3922_v57  ;;  %v8056_v20 = vld [vmem:[%s12073_s5 + $0xa94] sm:$0xf0]  ;;  %v7616_v14 = vor.u32 %v8137_v24, %v7613_v56  ;;  %v8105_v56 = vld [vmem:[%s12073_s5 + $0xc24] sm:$0xf] }
 0x360   : > { %4727 = vmatpush.bf16.msra.mxu1 %v7104_v51  ;;  %v7316_v40 = vor.u32 %v8064_v45, %v7315_v52  ;;  %v8028_v51 = vld [vmem:[%s12073_s5 + $0x9b4] sm:$0xf0]  ;;  %v7517_v52 = vld [vmem:[%s12073_s5 + $0xc70] sm:$0xf0]  ;;  %v7284_v48 = vor.u32 %v8056_v20, %v7283_v44  ;;  %v7139_v57 = vld [vmem:[%s12073_s5 + $0x968] sm:$0xf] }
 0x361   : > { %4741 = vmatpush.bf16.msra.mxu2 %v7232_v59  ;;  %v11249_v59 = vadd.f32 %v3518_v9, %v11169_v47  ;;  %v8121_v47 = vld [vmem:[%s12073_s5 + $0xca4] sm:$0xf]  ;;  %v7172_v38 = vor.u32 %v8028_v51, %v7171_v7  ;;  %v7156_v9 = vor.u32 %v8024_v33, %v7155_v32  ;;  %v7501_v7 = vld [vmem:[%s12073_s5 + $0xc50] sm:$0xf0]  ;;  %v7107_v32 = vld [vmem:[%s12073_s5 + $0x928] sm:$0xf] }
 0x362   : > { %4755 = vmatpush.bf16.msra.mxu3 %v7360_v60  ;;  %v3532_v60 = vpop.f32.mrf.mxu1  ;;  %v8012_v33 = vld [vmem:[%s12073_s5 + $0x934] sm:$0xf0]  ;;  %v7555_v44 = vld [vmem:[%s12073_s5 + $0xca8] sm:$0xf] }
 0x363   : > { %4714 = vmatpush.bf16.msra.mxu0 %v7596_v29  ;;  %v3533_v0 = vadd.f32 %v3532_v60, %v10475_v6  ;;  %v7549_v6 = vld [vmem:[%s12073_s5 + $0xcb0] sm:$0xf0]  ;;  %v2574_v29 = vadd.f32 %v10685_v21, %v2560_v58  ;;  %v7632_v21 = vor.u32 %v8141_v27, %v7629_v54  ;;  %v8020_v58 = vld [vmem:[%s12073_s5 + $0x974] sm:$0xf0]  ;;  %v7267_v60 = vld [vmem:[%s12073_s5 + $0xa68] sm:$0xf] }
 0x364   : > { %4728 = vmatpush.bf16.msra.mxu1 %v7088_v13  ;;  %v7552_v62 = vor.u32 %v8121_v47, %v7549_v6  ;;  %v7597_v13 = vld [vmem:[%s12073_s5 + $0xd10] sm:$0xf0]  ;;  %v8109_v6 = vld [vmem:[%s12073_s5 + $0xc44] sm:$0xf]  ;;  %v8124_v20 = vld [vmem:[%s12073_s5 + $0xcb4] sm:$0xf0] }
 0x365   : > { %4742 = vmatpush.bf16.msra.mxu2 %v7216_v16  ;;  %v3547_v12 = vadd.f32 %v3546_v2, %v3533_v0  ;;  %v7300_v16 = vor.u32 %v8060_v22, %v7299_v3  ;;  %v8052_v0 = vld [vmem:[%s12073_s5 + $0xa74] sm:$0xf0]  ;;  %v3562_v27 = vpop.f32.mrf.mxu3  ;;  %v7251_v3 = vld [vmem:[%s12073_s5 + $0xa48] sm:$0xf] }
 0x366   : > { %4756 = vmatpush.bf16.msra.mxu3 %v7344_v31  ;;  %7657 = vmatmul.msk.bf16.vlgmr.msra.gmra.mxu0 %vm341_vm3, %v11273_v19  ;;  %v7533_v31 = vld [vmem:[%s12073_s5 + $0xc90] sm:$0xf0]  ;;  %v3548_v45 = vpop.f32.mrf.mxu2  ;;  %v7268_v51 = vor.u32 %v8052_v0, %v7267_v60  ;;  %v8048_v22 = vld [vmem:[%s12073_s5 + $0xa54] sm:$0xf0]  ;;  %v7459_v60 = vld [vmem:[%s12073_s5 + $0xbe8] sm:$0xf] }
 0x367   : > { %4763 = vmatpush.bf16.msrb.mxu0 %v7584_v17  ;;  %v11282_v23 = vadd.f32 %v3560_v18, %v3547_v12  ;;  %v2588_v17 = vadd.f32 %v10668_v1, %v2574_v29  ;;  %4729 = vmatmul.bf16.vlgmr.msra.gmra.mxu1 %v11147_v30  ;;  %v8133_v1 = vld [vmem:[%s12073_s5 + $0xd04] sm:$0xf]  ;;  %v7536_v49 = vor.u32 %v8117_v28, %v7533_v31  ;;  %v7123_v12 = vld [vmem:[%s12073_s5 + $0x948] sm:$0xf]  ;;  %v8016_v18 = vld [vmem:[%s12073_s5 + $0x954] sm:$0xf0] }
 0x368   : > { %4743 = vmatmul.bf16.vlgmr.msra.gmra.mxu2 %v11054_v39  ;;  %4781 = vmatpush.bf16.msrb.mxu1 %v7648_v63  ;;  %v7600_v54 = vor.u32 %v8133_v1, %v7597_v13  ;;  %v7124_v24 = vor.u32 %v8016_v18, %v7123_v12  ;;  %v7485_v28 = vld [vmem:[%s12073_s5 + $0xc30] sm:$0xf0]  ;;  %v8101_v1 = vld [vmem:[%s12073_s5 + $0xc04] sm:$0xf]  ;;  %v7556_v13 = vor.u32 %v8124_v20, %v7555_v44  ;;  %v7523_v18 = vld [vmem:[%s12073_s5 + $0xc68] sm:$0xf] }
 0x369   : > { %4791 = vmatpush.bf16.msrb.mxu2 %v7204_v42  ;;  %4757 = vmatmul.bf16.vlgmr.msra.gmra.mxu3 %v11031_v36  ;;  %v3520_v42 = vpop.f32.mrf.mxu0  ;;  %v8092_v20 = vld [vmem:[%s12073_s5 + $0xbb4] sm:$0xf0] }
 0x36a   : > { %4805 = vmatpush.bf16.msrb.mxu3 %v7332_v11  ;;  %v11313_v35 = vadd.f32 %v3520_v42, %v11230_v10  ;;  %v3534_v11 = vpop.f32.mrf.mxu1  ;;  %v8113_v10 = vld [vmem:[%s12073_s5 + $0xc64] sm:$0xf]  ;;  %v8044_v42 = vld [vmem:[%s12073_s5 + $0xa34] sm:$0xf0] }
 0x36b   : > { %4764 = vmatpush.bf16.msrb.mxu0 %v7568_v4  ;;  %v3535_v8 = vadd.f32 %v3534_v11, %v2588_v17  ;;  %v7587_v4 = vld [vmem:[%s12073_s5 + $0xce8] sm:$0xf]  ;;  %v7520_v2 = vor.u32 %v8113_v10, %v7517_v52  ;;  %v7488_v11 = vor.u32 %v8105_v56, %v7485_v28  ;;  %v8008_v10 = vld [vmem:[%s12073_s5 + $0x914] sm:$0xf0] }
 0x36c   : > { %4782 = vmatpush.bf16.msrb.mxu1 %v7632_v21  ;;  %v7571_v21 = vld [vmem:[%s12073_s5 + $0xcc8] sm:$0xf] }
 0x36d   : > { %4792 = vmatpush.bf16.msrb.mxu2 %v7188_v46  ;;  %v3549_v63 = vadd.f32 %v3548_v45, %v3535_v8  ;;  %v8132_v46 = vld [vmem:[%s12073_s5 + $0xcf4] sm:$0xf0]  ;;  %v7235_v17 = vld [vmem:[%s12073_s5 + $0xa28] sm:$0xf]  ;;  %v7469_v8 = vld [vmem:[%s12073_s5 + $0xc10] sm:$0xf0] }
 0x36e   : > { %4806 = vmatpush.bf16.msrb.mxu3 %v7316_v40  ;;  %v7140_v40 = vor.u32 %v8020_v58, %v7139_v57  ;;  %v7588_v29 = vor.u32 %v8132_v46, %v7587_v4  ;;  %v7219_v52 = vld [vmem:[%s12073_s5 + $0xa08] sm:$0xf]  ;;  %v8040_v45 = vld [vmem:[%s12073_s5 + $0xa14] sm:$0xf0]  ;;  %v7472_v46 = vor.u32 %v8101_v1, %v7469_v8 }
 0x36f   : > { %4765 = vmatpush.bf16.msrb.mxu0 %v7552_v62  ;;  %v11345_v47 = vadd.f32 %v3562_v27, %v3549_v63  ;;  %v8128_v62 = vld [vmem:[%s12073_s5 + $0xcd4] sm:$0xf0]  ;;  %v7539_v57 = vld [vmem:[%s12073_s5 + $0xc88] sm:$0xf] }
 0x370   : > { %4783 = vmatpush.bf16.msrb.mxu1 %v7616_v14  ;;  %v7572_v31 = vor.u32 %v8128_v62, %v7571_v21  ;;  %v7108_v14 = vor.u32 %v8012_v33, %v7107_v32  ;;  %v8120_v58 = vld [vmem:[%s12073_s5 + $0xc94] sm:$0xf0]  ;;  %v7507_v33 = vld [vmem:[%s12073_s5 + $0xc48] sm:$0xf] }
 0x371   : > { %4793 = vmatpush.bf16.msrb.mxu2 %v7172_v38  ;;  %v7504_v38 = vor.u32 %v8109_v6, %v7501_v7  ;;  %v8100_v63 = vld [vmem:[%s12073_s5 + $0xbf4] sm:$0xf0]  ;;  %v7220_v6 = vor.u32 %v8040_v45, %v7219_v52  ;;  %v7540_v7 = vor.u32 %v8120_v58, %v7539_v57  ;;  %v7491_v45 = vld [vmem:[%s12073_s5 + $0xc28] sm:$0xf] }
 0x372   : > { %4807 = vmatpush.bf16.msrb.mxu3 %v7300_v16  ;;  %v7252_v16 = vor.u32 %v8048_v22, %v7251_v3  ;;  %v3588_v4 = vpop.f32.mrf.mxu1  ;;  %v8116_v3 = vld [vmem:[%s12073_s5 + $0xc74] sm:$0xf0]  ;;  %v7443_v22 = vld [vmem:[%s12073_s5 + $0xbc8] sm:$0xf] }
 0x373   : > { %4766 = vmatpush.bf16.msrb.mxu0 %v7536_v49  ;;  %v7091_v49 = vld [vmem:[%s12073_s5 + $0x908] sm:$0xf]  ;;  %v3574_v0 = vpop.f32.mrf.mxu0  ;;  %v8096_v62 = vld [vmem:[%s12073_s5 + $0xbd4] sm:$0xf0]  ;;  %v7524_v28 = vor.u32 %v8116_v3, %v7523_v18 }
 0x374   : > { %4784 = vmatpush.bf16.msrb.mxu1 %v7600_v54  ;;  %v7092_v27 = vor.u32 %v8008_v10, %v7091_v49  ;;  %v8034_v54 = vld [vmem:[%s12073_s5 + $0x9ec] sm:$0xf]  ;;  %v7395_v18 = vld [vmem:[%s12073_s5 + $0xb68] sm:$0xf]  ;;  %v8084_v3 = vld [vmem:[%s12073_s5 + $0xb74] sm:$0xf0] }
 0x375   : > { %4794 = vmatpush.bf16.msrb.mxu2 %v7156_v9  ;;  %v7236_v9 = vor.u32 %v8044_v42, %v7235_v17  ;;  %v8112_v17 = vld [vmem:[%s12073_s5 + $0xc54] sm:$0xf0]  ;;  %v8026_v49 = vld [vmem:[%s12073_s5 + $0x9ac] sm:$0xf] }
 0x376   : > { %4808 = vmatpush.bf16.msrb.mxu3 %v7284_v48  ;;  %v2628_v48 = vadd.f32 %v10746_v50, %v10519_v37  ;;  %v7651_v37 = vld [vmem:[%s12073_s5 + $0xd68] sm:$0xf]  ;;  %v8148_v50 = vld [vmem:[%s12073_s5 + $0xd74] sm:$0xf0]  ;;  %v7508_v52 = vor.u32 %v8112_v17, %v7507_v33 }
 0x377   : > { %4767 = vmatpush.bf16.msrb.mxu0 %v7520_v2  ;;  %7658 = vmatmul.msk.bf16.vlgmr.msrb.gmra.mxu1 %vm341_vm3, %v11273_v19  ;;  %v7205_v2 = vld [vmem:[%s12073_s5 + $0x9f8] sm:$0xf0]  ;;  %v7652_v12 = vor.u32 %v8148_v50, %v7651_v37  ;;  %v7379_v17 = vld [vmem:[%s12073_s5 + $0xb48] sm:$0xf] }
 0x378   : > { %4833 = vmatpush.bf16.msra.mxu1 %v7588_v29  ;;  %v7460_v29 = vor.u32 %v8100_v63, %v7459_v60  ;;  %v8108_v63 = vld [vmem:[%s12073_s5 + $0xc34] sm:$0xf0] }
 0x379   : > { %4795 = vmatpush.bf16.msrb.mxu2 %v7140_v40  ;;  %v3575_v40 = vadd.f32 %v3574_v0, %v11282_v23  ;;  %v2616_v23 = vadd.f32 %v10713_v41, %v10687_v61  ;;  %v8030_v61 = vld [vmem:[%s12073_s5 + $0x9cc] sm:$0xf]  ;;  %v7189_v41 = vld [vmem:[%s12073_s5 + $0x9d8] sm:$0xf0]  ;;  %v7603_v0 = vld [vmem:[%s12073_s5 + $0xd08] sm:$0xf] }
 0x37a   : > { %4809 = vmatpush.bf16.msrb.mxu3 %v7268_v51  ;;  %v2642_v51 = vadd.f32 %v10735_v34, %v2628_v48  ;;  %v7208_v34 = vor.u32 %v8034_v54, %v7205_v2  ;;  %v7192_v44 = vor.u32 %v8030_v61, %v7189_v41  ;;  %v3590_v57 = vpop.f32.mrf.mxu1  ;;  %v8130_v54 = vld [vmem:[%s12073_s5 + $0xcec] sm:$0xf]  ;;  %v7589_v2 = vld [vmem:[%s12073_s5 + $0xcf8] sm:$0xf0] }
 0x37b   : > { %4768 = vmatpush.bf16.msrb.mxu0 %v7504_v38  ;;  %v11454_v21 = vadd.f32 %v3588_v4, %v3575_v40  ;;  %v7635_v38 = vld [vmem:[%s12073_s5 + $0xd48] sm:$0xf]  ;;  %v2630_v56 = vadd.f32 %v10826_v15, %v2616_v23  ;;  %v3576_v8 = vpop.f32.mrf.mxu0  ;;  %v8136_v4 = vld [vmem:[%s12073_s5 + $0xd14] sm:$0xf0]  ;;  %v7492_v40 = vor.u32 %v8108_v63, %v7491_v45  ;;  %v7141_v61 = vld [vmem:[%s12073_s5 + $0x978] sm:$0xf0] }
 0x37c   : > { %4834 = vmatpush.bf16.msra.mxu1 %v7572_v31  ;;  %v7444_v31 = vor.u32 %v8096_v62, %v7443_v22  ;;  %v7427_v15 = vld [vmem:[%s12073_s5 + $0xba8] sm:$0xf]  ;;  %v3616_v42 = vpop.f32.mrf.mxu3  ;;  %v3577_v10 = vadd.f32 %v3576_v8, %v11345_v47  ;;  %v8088_v47 = vld [vmem:[%s12073_s5 + $0xb94] sm:$0xf0]  ;;  %v8098_v62 = vld [vmem:[%s12073_s5 + $0xbec] sm:$0xf] }
 0x37d   : > { %4796 = vmatpush.bf16.msrb.mxu2 %v7124_v24  ;;  %v8144_v24 = vld [vmem:[%s12073_s5 + $0xd54] sm:$0xf0]  ;;  %v7428_v58 = vor.u32 %v8092_v20, %v7427_v15  ;;  %v8126_v41 = vld [vmem:[%s12073_s5 + $0xccc] sm:$0xf]  ;;  %v7557_v8 = vld [vmem:[%s12073_s5 + $0xcb8] sm:$0xf0] }
 0x37e   : > { %4810 = vmatpush.bf16.msrb.mxu3 %v7252_v16  ;;  %v2656_v16 = vadd.f32 %v10748_v55, %v2642_v51  ;;  %v7636_v32 = vor.u32 %v8144_v24, %v7635_v38  ;;  %v3602_v55 = vpop.f32.mrf.mxu2  ;;  %v11516_v37 = vadd.f32 %v3590_v57, %v3577_v10  ;;  %v7461_v38 = vld [vmem:[%s12073_s5 + $0xbf8] sm:$0xf0]  ;;  %v8080_v15 = vld [vmem:[%s12073_s5 + $0xb54] sm:$0xf0]  ;;  %v8094_v20 = vld [vmem:[%s12073_s5 + $0xbcc] sm:$0xf] }
 0x37f   : > { %4769 = vmatpush.bf16.msrb.mxu0 %v7488_v11  ;;  %v7619_v11 = vld [vmem:[%s12073_s5 + $0xd28] sm:$0xf]  ;;  %v7464_v33 = vor.u32 %v8098_v62, %v7461_v38  ;;  %v8076_v10 = vld [vmem:[%s12073_s5 + $0xb34] sm:$0xf0]  ;;  %v8010_v57 = vld [vmem:[%s12073_s5 + $0x92c] sm:$0xf] }
 0x380   : > { %4835 = vmatpush.bf16.msra.mxu1 %v7556_v13  ;;  %v3603_v1 = vadd.f32 %v3602_v55, %v2656_v16  ;;  %v2644_v13 = vadd.f32 %v10815_v26, %v2630_v56  ;;  %v7411_v26 = vld [vmem:[%s12073_s5 + $0xb88] sm:$0xf]  ;;  %v7573_v56 = vld [vmem:[%s12073_s5 + $0xcd8] sm:$0xf0] }
 0x381   : > { %4797 = vmatpush.bf16.msrb.mxu2 %v7108_v14  ;;  %v8140_v14 = vld [vmem:[%s12073_s5 + $0xd34] sm:$0xf0]  ;;  %v7412_v51 = vor.u32 %v8088_v47, %v7411_v26  ;;  %v7109_v63 = vld [vmem:[%s12073_s5 + $0x938] sm:$0xf0]  ;;  %v8118_v26 = vld [vmem:[%s12073_s5 + $0xc8c] sm:$0xf] }
 0x382   : > { %4811 = vmatpush.bf16.msrb.mxu3 %v7236_v9  ;;  %v7173_v9 = vld [vmem:[%s12073_s5 + $0x9b8] sm:$0xf0]  ;;  %v11505_v48 = vadd.f32 %v3616_v42, %v3603_v1  ;;  %v7620_v60 = vor.u32 %v8140_v14, %v7619_v11  ;;  %v7576_v42 = vor.u32 %v8126_v41, %v7573_v56  ;;  %v8122_v1 = vld [vmem:[%s12073_s5 + $0xcac] sm:$0xf] }
 0x383   : > { %4770 = vmatpush.bf16.msrb.mxu0 %v7472_v46  ;;  %v7176_v50 = vor.u32 %v8026_v49, %v7173_v9  ;;  %v8022_v46 = vld [vmem:[%s12073_s5 + $0x98c] sm:$0xf]  ;;  %v7445_v11 = vld [vmem:[%s12073_s5 + $0xbd8] sm:$0xf0]  ;;  %v7380_v49 = vor.u32 %v8080_v15, %v7379_v17  ;;  %v7560_v45 = vor.u32 %v8122_v1, %v7557_v8 }
 0x384   : > { %4836 = vmatpush.bf16.msra.mxu1 %v7540_v7  ;;  %v2658_v7 = vadd.f32 %v10828_v53, %v2644_v13  ;;  %v7592_v53 = vor.u32 %v8130_v54, %v7589_v2  ;;  %v7125_v14 = vld [vmem:[%s12073_s5 + $0x958] sm:$0xf0]  ;;  %v7448_v9 = vor.u32 %v8094_v20, %v7445_v11  ;;  %v7363_v13 = vld [vmem:[%s12073_s5 + $0xb28] sm:$0xf]  ;;  %v7112_v54 = vor.u32 %v8010_v57, %v7109_v63  ;;  %v8082_v56 = vld [vmem:[%s12073_s5 + $0xb6c] sm:$0xf] }
 0x385   : > { %4798 = vmatpush.bf16.msrb.mxu2 %v7092_v27  ;;  %v7157_v27 = vld [vmem:[%s12073_s5 + $0x998] sm:$0xf0]  ;;  %v8078_v1 = vld [vmem:[%s12073_s5 + $0xb4c] sm:$0xf] }
 0x386   : > { %4812 = vmatpush.bf16.msrb.mxu3 %v7220_v6  ;;  %4771 = vmatmul.bf16.vlgmr.msrb.gmra.mxu0 %v11044_v25  ;;  %v7475_v6 = vld [vmem:[%s12073_s5 + $0xc08] sm:$0xf]  ;;  %v3604_v22 = vpop.f32.mrf.mxu2  ;;  %v7160_v23 = vor.u32 %v8022_v46, %v7157_v27  ;;  %v7541_v47 = vld [vmem:[%s12073_s5 + $0xc98] sm:$0xf0]  ;;  %v8072_v46 = vld [vmem:[%s12073_s5 + $0xb14] sm:$0xf0] }
 0x387   : > { %4819 = vmatpush.bf16.msra.mxu0 %v7460_v29  ;;  %v7604_v29 = vor.u32 %v8136_v4, %v7603_v0  ;;  %v3605_v24 = vadd.f32 %v3604_v22, %v2658_v7  ;;  %v7347_v4 = vld [vmem:[%s12073_s5 + $0xb08] sm:$0xf]  ;;  %v8006_v27 = vld [vmem:[%s12073_s5 + $0x90c] sm:$0xf]  ;;  %v7544_v2 = vor.u32 %v8118_v26, %v7541_v47  ;;  %v7413_v7 = vld [vmem:[%s12073_s5 + $0xb98] sm:$0xf0] }
 0x388   : > { %4799 = vmatmul.bf16.vlgmr.msrb.gmra.mxu2 %v11147_v30  ;;  %4837 = vmatpush.bf16.msra.mxu1 %v7524_v28  ;;  %v3618_v28 = vpop.f32.mrf.mxu3  ;;  %v8146_v22 = vld [vmem:[%s12073_s5 + $0xd6c] sm:$0xf]  ;;  %v7381_v8 = vld [vmem:[%s12073_s5 + $0xb58] sm:$0xf0] }
 0x389   : > { %4851 = vmatpush.bf16.msra.mxu2 %v7652_v12  ;;  %4813 = vmatmul.bf16.vlgmr.msrb.gmra.mxu3 %v11054_v39  ;;  %v8104_v12 = vld [vmem:[%s12073_s5 + $0xc14] sm:$0xf0]  ;;  %v7493_v57 = vld [vmem:[%s12073_s5 + $0xc38] sm:$0xf0]  ;;  %v7384_v47 = vor.u32 %v8078_v1, %v7381_v8 }
 0x38a   : > { %4861 = vmatpush.bf16.msra.mxu3 %v7208_v34  ;;  %v8018_v34 = vld [vmem:[%s12073_s5 + $0x96c] sm:$0xf]  ;;  %v7476_v16 = vor.u32 %v8104_v12, %v7475_v6 }
 0x38b   : > { %4820 = vmatpush.bf16.msra.mxu0 %v7444_v31  ;;  %v11567_v31 = vadd.f32 %v3618_v28, %v3605_v24  ;;  %v7144_v55 = vor.u32 %v8018_v34, %v7141_v61  ;;  %v8086_v6 = vld [vmem:[%s12073_s5 + $0xb8c] sm:$0xf]  ;;  %v7348_v34 = vor.u32 %v8072_v46, %v7347_v4  ;;  %v7397_v28 = vld [vmem:[%s12073_s5 + $0xb78] sm:$0xf0] }
 0x38c   : > { %4838 = vmatpush.bf16.msra.mxu1 %v7508_v52  ;;  %v8114_v12 = vld [vmem:[%s12073_s5 + $0xc6c] sm:$0xf]  ;;  %v7416_v62 = vor.u32 %v8086_v6, %v7413_v7  ;;  %v7400_v20 = vor.u32 %v8082_v56, %v7397_v28  ;;  %v7365_v46 = vld [vmem:[%s12073_s5 + $0xb38] sm:$0xf0] }
 0x38d   : > { %4852 = vmatpush.bf16.msra.mxu2 %v7636_v32  ;;  %v7396_v32 = vor.u32 %v8084_v3, %v7395_v18  ;;  %v3644_v18 = vpop.f32.mrf.mxu1  ;;  %v7525_v3 = vld [vmem:[%s12073_s5 + $0xc78] sm:$0xf0]  ;;  %v8074_v4 = vld [vmem:[%s12073_s5 + $0xb2c] sm:$0xf] }
 0x38e   : > { %4862 = vmatpush.bf16.msra.mxu3 %v7192_v44  ;;  %v8014_v44 = vld [vmem:[%s12073_s5 + $0x94c] sm:$0xf]  ;;  %v3658_v38 = vpop.f32.mrf.mxu2  ;;  %v7477_v7 = vld [vmem:[%s12073_s5 + $0xc18] sm:$0xf0] }
 0x38f   : > { %4821 = vmatpush.bf16.msra.mxu0 %v7428_v58  ;;  %v7128_v52 = vor.u32 %v8014_v44, %v7125_v14  ;;  %v8090_v58 = vld [vmem:[%s12073_s5 + $0xbac] sm:$0xf]  ;;  %v7637_v44 = vld [vmem:[%s12073_s5 + $0xd58] sm:$0xf0] }
 0x390   : > { %4839 = vmatpush.bf16.msra.mxu1 %v7492_v40  ;;  %v7093_v40 = vld [vmem:[%s12073_s5 + $0x918] sm:$0xf0]  ;;  %v8046_v28 = vld [vmem:[%s12073_s5 + $0xa4c] sm:$0xf] }
 0x391   : > { %4853 = vmatpush.bf16.msra.mxu2 %v7620_v60  ;;  %v7429_v60 = vld [vmem:[%s12073_s5 + $0xbb8] sm:$0xf0]  ;;  %v7096_v61 = vor.u32 %v8006_v27, %v7093_v40 }
 0x392   : > { %4863 = vmatpush.bf16.msra.mxu3 %v7176_v50  ;;  %v7364_v50 = vor.u32 %v8076_v10, %v7363_v13  ;;  %v7432_v0 = vor.u32 %v8090_v58, %v7429_v60  ;;  %v7301_v13 = vld [vmem:[%s12073_s5 + $0xab8] sm:$0xf0]  ;;  %v8106_v10 = vld [vmem:[%s12073_s5 + $0xc2c] sm:$0xf] }
 0x393   : > { %4822 = vmatpush.bf16.msra.mxu0 %v7412_v51  ;;  %v8066_v51 = vld [vmem:[%s12073_s5 + $0xaec] sm:$0xf]  ;;  %v7621_v60 = vld [vmem:[%s12073_s5 + $0xd38] sm:$0xf0] }
 0x394   : > { %4840 = vmatpush.bf16.msra.mxu1 %v7476_v16  ;;  %v7528_v16 = vor.u32 %v8114_v12, %v7525_v3  ;;  %v8138_v58 = vld [vmem:[%s12073_s5 + $0xd2c] sm:$0xf]  ;;  %v7368_v12 = vor.u32 %v8074_v4, %v7365_v46 }
 0x395   : > { %4854 = vmatpush.bf16.msra.mxu2 %v7604_v29  ;;  %v7333_v29 = vld [vmem:[%s12073_s5 + $0xaf8] sm:$0xf0]  ;;  %v3646_v27 = vpop.f32.mrf.mxu1  ;;  %v7624_v40 = vor.u32 %v8138_v58, %v7621_v60  ;;  %v5021_v60 = vld [vmem:[%s12074_s6 + $0x70] sm:$0xff]  ;;  %v5016_v4 = vld [vmem:[%s12074_s6 + $0x48] sm:$0xff] }
 0x396   : > { %4864 = vmatpush.bf16.msra.mxu3 %v7160_v23  ;;  %v7653_v23 = vld [vmem:[%s12073_s5 + $0xd78] sm:$0xf0]  ;;  %v7336_v41 = vor.u32 %v8066_v51, %v7333_v29  ;;  %v8134_v51 = vld [vmem:[%s12073_s5 + $0xd0c] sm:$0xf] }
 0x397   : > { %4823 = vmatpush.bf16.msra.mxu0 %v7396_v32  ;;  %4841 = vmatmul.bf16.vlgmr.msra.gmra.mxu1 %v11044_v25  ;;  %v8062_v32 = vld [vmem:[%s12073_s5 + $0xacc] sm:$0xf]  ;;  %v7656_v17 = vor.u32 %v8146_v22, %v7653_v23  ;;  %v7605_v29 = vld [vmem:[%s12073_s5 + $0xd18] sm:$0xf0] }
 0x398   : > { %4889 = vmatpush.bf16.msrb.mxu1 %v7464_v33  ;;  %7659 = vmatmul.msk.bf16.vlgmr.msra.gmra.mxu2 %vm341_vm3, %v11273_v19  ;;  %v7317_v33 = vld [vmem:[%s12073_s5 + $0xad8] sm:$0xf0]  ;;  %v8070_v22 = vld [vmem:[%s12073_s5 + $0xb0c] sm:$0xf] }
 0x399   : > { %4903 = vmatpush.bf16.msrb.mxu2 %v7592_v53  ;;  %v3630_v53 = vpop.f32.mrf.mxu0  ;;  %v7320_v14 = vor.u32 %v8062_v32, %v7317_v33  ;;  %v7349_v23 = vld [vmem:[%s12073_s5 + $0xb18] sm:$0xf0] }
 0x39a   : > { %4865 = vmatpush.bf16.msra.mxu3 %v7144_v55  ;;  %v3631_v24 = vadd.f32 %v3630_v53, %v11505_v48  ;;  %v8110_v48 = vld [vmem:[%s12073_s5 + $0xc4c] sm:$0xf]  ;;  %v7509_v55 = vld [vmem:[%s12073_s5 + $0xc58] sm:$0xf0] }
 0x39b   : > { %4824 = vmatpush.bf16.msra.mxu0 %v7380_v49  ;;  %v7512_v49 = vor.u32 %v8110_v48, %v7509_v55  ;;  %v7237_v33 = vld [vmem:[%s12073_s5 + $0xa38] sm:$0xf0] }
 0x39c   : > { %4890 = vmatpush.bf16.msrb.mxu1 %v7448_v9  ;;  %v3645_v15 = vadd.f32 %v3644_v18, %v3631_v24  ;;  %v8058_v9 = vld [vmem:[%s12073_s5 + $0xaac] sm:$0xf] }
 0x39d   : > { %4904 = vmatpush.bf16.msrb.mxu2 %v7576_v42  ;;  %v8142_v42 = vld [vmem:[%s12073_s5 + $0xd4c] sm:$0xf] }
 0x39e   : > { %4866 = vmatpush.bf16.msra.mxu3 %v7128_v52  ;;  %v11681_v11 = vadd.f32 %v3658_v38, %v3645_v15  ;;  %v7640_v52 = vor.u32 %v8142_v42, %v7637_v44  ;;  %v7608_v38 = vor.u32 %v8134_v51, %v7605_v29  ;;  %v5011_v29 = vld [vmem:[%s12074_s6 + $0x20] sm:$0xff] }
 0x39f   : > { %4825 = vmatpush.bf16.msra.mxu0 %v7364_v50 }
 0x3a0   : > { %4891 = vmatpush.bf16.msrb.mxu1 %v7432_v0  ;;  %v7304_v0 = vor.u32 %v8058_v9, %v7301_v13  ;;  %v5022_v9 = vld [vmem:[%s12074_s6 + $0x78] sm:$0xff] }
 0x3a1   : > { %4905 = vmatpush.bf16.msrb.mxu2 %v7560_v45  ;;  %v3672_v45 = vpop.f32.mrf.mxu3  ;;  %v3632_v26 = vpop.f32.mrf.mxu0 }
 0x3a2   : > { %4867 = vmatpush.bf16.msra.mxu3 %v7112_v54  ;;  %v3673_v63 = vadd.f32 %v3672_v45, %v10934_v43  ;;  %v3633_v50 = vadd.f32 %v3632_v26, %v11567_v31  ;;  %v3660_v54 = vpop.f32.mrf.mxu2  ;;  %v8054_v43 = vld [vmem:[%s12073_s5 + $0xa8c] sm:$0xf]  ;;  %v7285_v31 = vld [vmem:[%s12073_s5 + $0xa98] sm:$0xf0] }
 0x3a3   : > { %4826 = vmatpush.bf16.msra.mxu0 %v7348_v34  ;;  %v7288_v3 = vor.u32 %v8054_v43, %v7285_v31  ;;  %v8050_v34 = vld [vmem:[%s12073_s5 + $0xa6c] sm:$0xf]  ;;  %v5018_v26 = vld [vmem:[%s12074_s6 + $0x58] sm:$0xff]  ;;  %v5013_v31 = vld [vmem:[%s12074_s6 + $0x30] sm:$0xff] }
 0x3a4   : > { %4892 = vmatpush.bf16.msrb.mxu1 %v7416_v62  ;;  %v3647_v6 = vadd.f32 %v3646_v27, %v3633_v50  ;;  %v7269_v62 = vld [vmem:[%s12073_s5 + $0xa78] sm:$0xf0]  ;;  %v3700_v15 = vpop.f32.mrf.mxu1  ;;  %v5015_v27 = vld [vmem:[%s12074_s6 + $0x40] sm:$0xff] }
 0x3a5   : > { %4906 = vmatpush.bf16.msrb.mxu2 %v7544_v2  ;;  %v8102_v2 = vld [vmem:[%s12073_s5 + $0xc0c] sm:$0xf]  ;;  %v7272_v56 = vor.u32 %v8050_v34, %v7269_v62 }
 0x3a6   : > { %4868 = vmatpush.bf16.msra.mxu3 %v7096_v61  ;;  %4827 = vmatmul.bf16.vlgmr.msra.gmra.mxu0 %v11031_v36  ;;  %v11735_v18 = vadd.f32 %v3660_v54, %v3647_v6  ;;  %v7480_v53 = vor.u32 %v8102_v2, %v7477_v7  ;;  %v5014_v54 = vld [vmem:[%s12074_s6 + $0x38] sm:$0xff] }
 0x3a7   : > { %4875 = vmatpush.bf16.msrb.mxu0 %v7336_v41  ;;  %v7352_v41 = vor.u32 %v8070_v22, %v7349_v23  ;;  %v5038_v22 = vld [vmem:[%s12074_s6 + $0xf8] sm:$0xff] }
 0x3a8   : > { %4893 = vmatpush.bf16.msrb.mxu1 %v7400_v20 }
 0x3a9   : > { %4907 = vmatpush.bf16.msrb.mxu2 %v7528_v16  ;;  %4869 = vmatmul.bf16.vlgmr.msra.gmra.mxu3 %v11147_v30  ;;  %v7496_v30 = vor.u32 %v8106_v10, %v7493_v57  ;;  %v3674_v24 = vpop.f32.mrf.mxu3  ;;  %v7253_v16 = vld [vmem:[%s12073_s5 + $0xa58] sm:$0xf0] }
 0x3aa   : > { %4921 = vmatpush.bf16.msrb.mxu3 %v7656_v17  ;;  %v3675_v61 = vadd.f32 %v3674_v24, %v10995_v5  ;;  %v7256_v32 = vor.u32 %v8046_v28, %v7253_v16  ;;  %v8042_v5 = vld [vmem:[%s12073_s5 + $0xa2c] sm:$0xf]  ;;  %v7221_v17 = vld [vmem:[%s12073_s5 + $0xa18] sm:$0xf0] }
 0x3ab   : > { %4876 = vmatpush.bf16.msrb.mxu0 %v7320_v14  ;;  %v7240_v48 = vor.u32 %v8042_v5, %v7237_v33  ;;  %v3714_v20 = vpop.f32.mrf.mxu2  ;;  %v5036_v24 = vld [vmem:[%s12074_s6 + $0xe8] sm:$0xff] }
 0x3ac   : > { %4894 = vmatpush.bf16.msrb.mxu1 %v7384_v47  ;;  %v3702_v13 = vpop.f32.mrf.mxu1 }
 0x3ad   : > { %4908 = vmatpush.bf16.msrb.mxu2 %v7512_v49 }
 0x3ae   : > { %4922 = vmatpush.bf16.msrb.mxu3 %v7640_v52 }
 0x3af   : > { %4877 = vmatpush.bf16.msrb.mxu0 %v7304_v0  ;;  %v5017_v0 = vld [vmem:[%s12074_s6 + $0x50] sm:$0xff] }
 0x3b0   : > { %4895 = vmatpush.bf16.msrb.mxu1 %v7368_v12 }
 0x3b1   : > { %4909 = vmatpush.bf16.msrb.mxu2 %v7496_v30  ;;  %v3728_v14 = vpop.f32.mrf.mxu3 }
 0x3b2   : > { %4923 = vmatpush.bf16.msrb.mxu3 %v7624_v40  ;;  %v5012_v40 = vld [vmem:[%s12074_s6 + $0x28] sm:$0xff] }
 0x3b3   : > { %4878 = vmatpush.bf16.msrb.mxu0 %v7288_v3  ;;  %v3686_v55 = vpop.f32.mrf.mxu0  ;;  %v3716_v52 = vpop.f32.mrf.mxu2  ;;  %v5010_v3 = vld [vmem:[%s12074_s6 + $0x18] sm:$0xff] }
 0x3b4   : > { %4896 = vmatpush.bf16.msrb.mxu1 %v7352_v41  ;;  %v3687_v44 = vadd.f32 %v3686_v55, %v3673_v63  ;;  %v5019_v63 = vld [vmem:[%s12074_s6 + $0x60] sm:$0xff]  ;;  %v5008_v41 = vld [vmem:[%s12074_s6 + $0x8] sm:$0xff] }
 0x3b5   : > { %4910 = vmatpush.bf16.msrb.mxu2 %v7480_v53  ;;  %v5037_v53 = vld [vmem:[%s12074_s6 + $0xf0] sm:$0xff] }
 0x3b6   : > { %4924 = vmatpush.bf16.msrb.mxu3 %v7608_v38  ;;  %v5009_v38 = vld [vmem:[%s12074_s6 + $0x10] sm:$0xff] }
 0x3b7   : > { %4879 = vmatpush.bf16.msrb.mxu0 %v7272_v56  ;;  %4897 = vmatmul.bf16.vlgmr.msrb.gmra.mxu1 %v11031_v36  ;;  %v3701_v36 = vadd.f32 %v3700_v15, %v3687_v44  ;;  %v5035_v56 = vld [vmem:[%s12074_s6 + $0xe0] sm:$0xff] }
 0x3b8   : > { %4911 = vmatmul.bf16.vlgmr.msrb.gmra.mxu2 %v11044_v25  ;;  %v8038_v25 = vld [vmem:[%s12073_s5 + $0xa0c] sm:$0xf]  ;;  %5091 = vmatpush.msra.mxu1 %v5038_v22  ;;  %v5054_v22 = vld [vmem:[%s12074_s6 + $0x178] sm:$0xff] }
 0x3b9   : > { %7660 = vmatmul.msk.bf16.vlgmr.msrb.gmra.mxu3 %vm341_vm3, %v11273_v19  ;;  %v7224_v42 = vor.u32 %v8038_v25, %v7221_v17  ;;  %v3715_v19 = vadd.f32 %v3714_v20, %v3701_v36  ;;  %v3730_v57 = vpop.f32.mrf.mxu3  ;;  %5111 = vmatpush.msra.mxu2 %v5054_v22  ;;  %v5040_v22 = vld [vmem:[%s12074_s6 + $0x108] sm:$0xff] }
 0x3ba   : > { %5092 = vmatpush.msra.mxu1 %v5037_v53 }
 0x3bb   : > { %4880 = vmatpush.bf16.msrb.mxu0 %v7256_v32  ;;  %v11772_v1 = vadd.f32 %v3728_v14, %v3715_v19  ;;  %v3688_v8 = vpop.f32.mrf.mxu0  ;;  %v5007_v32 = vld [vmem:[%s12074_s6] sm:$0xff]  ;;  %v5034_v19 = vld [vmem:[%s12074_s6 + $0xd8] sm:$0xff] }
 0x3bc   : > { %v3689_v49 = vadd.f32 %v3688_v8, %v3675_v61  ;;  %5093 = vmatpush.msra.mxu1 %v5036_v24 }
 0x3be   : > { %v3703_v10 = vadd.f32 %v3702_v13, %v3689_v49  ;;  %5094 = vmatpush.msra.mxu1 %v5035_v56  ;;  %v5032_v13 = vld [vmem:[%s12074_s6 + $0xc8] sm:$0xff]  ;;  %v5023_v56 = vld [vmem:[%s12074_s6 + $0x80] sm:$0xff] }
 0x3bf   : > { %4881 = vmatpush.bf16.msrb.mxu0 %v7240_v48 }
 0x3c0   : > { %v3717_v45 = vadd.f32 %v3716_v52, %v3703_v10  ;;  %5095 = vmatpush.msra.mxu1 %v5034_v19  ;;  %v5049_v19 = vld [vmem:[%s12074_s6 + $0x150] sm:$0xff] }
 0x3c2   : > { %v11778_v58 = vadd.f32 %v3730_v57, %v3717_v45  ;;  %v5031_v45 = vld [vmem:[%s12074_s6 + $0xc0] sm:$0xff] }
 0x3c3   : > { %4882 = vmatpush.bf16.msrb.mxu0 %v7224_v42 }
 0x3c4   : > { %v4674_v50 = vpop.f32.mrf.mxu1 }
 0x3c6   : > { %4883 = vmatmul.bf16.vlgmr.msrb.gmra.mxu0 %v11054_v39  ;;  %v5020_v39 = vld [vmem:[%s12074_s6 + $0x68] sm:$0xff] }
 0x3c7   : > { %5071 = vmatpush.msra.mxu0 %v5022_v9 }
 0x3c9   : > { %5072 = vmatpush.msra.mxu0 %v5021_v60 }
 0x3cb   : > { %5073 = vmatpush.msra.mxu0 %v5020_v39  ;;  %v4688_v30 = vpop.f32.mrf.mxu2 }
 0x3cc   : > { %v4702_v2 = vpop.f32.mrf.mxu3  ;;  %v4676_v6 = vpop.f32.mrf.mxu1 }
 0x3cd   : > { %5074 = vmatpush.msra.mxu0 %v5019_v63 }
 0x3cf   : > { %5075 = vmatpush.msra.mxu0 %v5018_v26  ;;  %v5030_v26 = vld [vmem:[%s12074_s6 + $0xb8] sm:$0xff] }
 0x3d1   : > { %5076 = vmatpush.msra.mxu0 %v5017_v0  ;;  %v5029_v0 = vld [vmem:[%s12074_s6 + $0xb0] sm:$0xff] }
 0x3d3   : > { %v4660_v47 = vpop.f32.mrf.mxu0  ;;  %5077 = vmatpush.msra.mxu0 %v5016_v4  ;;  %v4690_v23 = vpop.f32.mrf.mxu2 }
 0x3d4   : > { %v4675_v43 = vadd.f32 %v4674_v50, %v4660_v47  ;;  %v4704_v28 = vpop.f32.mrf.mxu3 }
 0x3d5   : > { %5078 = vmatpush.msra.mxu0 %v5015_v27 }
 0x3d6   : > { %v4689_v7 = vadd.f32 %v4688_v30, %v4675_v43  ;;  %v5028_v43 = vld [vmem:[%s12074_s6 + $0xa8] sm:$0xff] }
 0x3d7   : > { %5079 = vmatpush.msra.mxu0 %v5014_v54 }
 0x3d8   : > { %v4703_v62 = vadd.f32 %v4702_v2, %v4689_v7  ;;  %v5026_v7 = vld [vmem:[%s12074_s6 + $0x98] sm:$0xff] }
 0x3d9   : > { %5080 = vmatpush.msra.mxu0 %v5013_v31 }
 0x3db   : > { %v4662_v46 = vpop.f32.mrf.mxu0  ;;  %5081 = vmatpush.msra.mxu0 %v5012_v40 }
 0x3dc   : > { %v4677_v51 = vadd.f32 %v4676_v6, %v4662_v46  ;;  %v5027_v6 = vld [vmem:[%s12074_s6 + $0xa0] sm:$0xff] }
 0x3dd   : > { %5082 = vmatpush.msra.mxu0 %v5011_v29 }
 0x3de   : > { %v4691_v34 = vadd.f32 %v4690_v23, %v4677_v51  ;;  %v5053_v23 = vld [vmem:[%s12074_s6 + $0x170] sm:$0xff] }
 0x3df   : > { %5083 = vmatpush.msra.mxu0 %v5010_v3  ;;  %v5025_v3 = vld [vmem:[%s12074_s6 + $0x90] sm:$0xff]  ;;  %5112 = vmatpush.msra.mxu2 %v5053_v23 }
 0x3e0   : > { %v4705_v16 = vadd.f32 %v4704_v28, %v4691_v34  ;;  %v5051_v28 = vld [vmem:[%s12074_s6 + $0x160] sm:$0xff] }
 0x3e1   : > { %5084 = vmatpush.msra.mxu0 %v5009_v38  ;;  %v5052_v38 = vld [vmem:[%s12074_s6 + $0x168] sm:$0xff] }
 0x3e2   : > { %5113 = vmatpush.msra.mxu2 %v5052_v38 }
 0x3e3   : > { %v4716_v12 = vpop.f32.mrf.mxu0  ;;  %5085 = vmatpush.msra.mxu0 %v5008_v41 }
 0x3e4   : > { %v4717_v61 = vadd.f32 %v4716_v12, %v4703_v62  ;;  %v4730_v5 = vpop.f32.mrf.mxu1  ;;  %v5024_v62 = vld [vmem:[%s12074_s6 + $0x88] sm:$0xff]  ;;  %5114 = vmatpush.msra.mxu2 %v5051_v28  ;;  %v5067_v28 = vld [vmem:[%s12074_s6 + $0x1e0] sm:$0xff] }
 0x3e5   : > { %5086 = vmatpush.msra.mxu0 %v5007_v32 }
 0x3e6   : > { %v11838_v48 = vadd.f32 %v4717_v61, %v11249_v59 }
 0x3e8   : > { %v4967_v15 = vmul.f32 %v11838_v48, %v11838_v48 }
 0x3eb   : > { %v4718_v33 = vpop.f32.mrf.mxu0  ;;  %v4744_v44 = vpop.f32.mrf.mxu2 }
 0x3ec   : > { %v4719_v25 = vadd.f32 %v4718_v33, %v4705_v16  ;;  %v4732_v8 = vpop.f32.mrf.mxu1  ;;  %v4758_v57 = vpop.f32.mrf.mxu3  ;;  %v4745_v60 = vadd.f32 %v4744_v44, %v4730_v5 }
 0x3ee   : > { %v11841_v17 = vadd.f32 %v4719_v25, %v11313_v35  ;;  %v5033_v35 = vld [vmem:[%s12074_s6 + $0xd0] sm:$0xff]  ;;  %v4759_v27 = vadd.f32 %v4758_v57, %v4745_v60 }
 0x3ef   : > { %5096 = vmatpush.msra.mxu1 %v5033_v35 }
 0x3f0   : > { %v4939_v55 = vadd.f32 %v11841_v17, %v11838_v48  ;;  %v4971_v42 = vmul.f32 %v11841_v17, %v11841_v17 }
 0x3f1   : > { %5097 = vmatpush.msra.mxu1 %v5032_v13 }
 0x3f2   : > { %v4940_v20 = vrot.slane %v4939_v55, 4  ;;  %v4975_v36 = vadd.f32 %v4971_v42, %v4967_v15 }
 0x3f3   : > { %5098 = vmatpush.msra.mxu1 %v5031_v45  ;;  %v4746_v47 = vpop.f32.mrf.mxu2 }
 0x3f4   : > { %v4941_v14 = vadd.f32 %v4940_v20, %v4939_v55  ;;  %v4976_v59 = vrot.slane %v4975_v36, 4  ;;  %v4786_v46 = vpop.f32.mrf.mxu1  ;;  %v4747_v31 = vadd.f32 %v4746_v47, %v4732_v8  ;;  %v4760_v51 = vpop.f32.mrf.mxu3 }
 0x3f5   : > { %5099 = vmatpush.msra.mxu1 %v5030_v26 }
 0x3f6   : > { %v4942_v49 = vrot.slane %v4941_v14, 2  ;;  %v4977_v9 = vadd.f32 %v4976_v59, %v4975_v36  ;;  %v4761_v29 = vadd.f32 %v4760_v51, %v4747_v31  ;;  %v5050_v59 = vld [vmem:[%s12074_s6 + $0x158] sm:$0xff]  ;;  %v5069_v51 = vld [vmem:[%s12074_s6 + $0x1f0] sm:$0xff] }
 0x3f7   : > { %5100 = vmatpush.msra.mxu1 %v5029_v0  ;;  %5115 = vmatpush.msra.mxu2 %v5050_v59  ;;  %v5045_v0 = vld [vmem:[%s12074_s6 + $0x130] sm:$0xff] }
 0x3f8   : > { %v4943_v10 = vadd.f32 %v4942_v49, %v4941_v14  ;;  %v4978_v52 = vrot.slane %v4977_v9, 2 }
 0x3f9   : > { %5101 = vmatpush.msra.mxu1 %v5028_v43  ;;  %5116 = vmatpush.msra.mxu2 %v5049_v19  ;;  %v5042_v43 = vld [vmem:[%s12074_s6 + $0x118] sm:$0xff] }
 0x3fa   : > { %v4944_v39 = vrot.slane %v4943_v10, 1  ;;  %v4979_v63 = vadd.f32 %v4978_v52, %v4977_v9  ;;  %v5048_v9 = vld [vmem:[%s12074_s6 + $0x148] sm:$0xff]  ;;  %v5062_v19 = vld [vmem:[%s12074_s6 + $0x1b8] sm:$0xff] }
 0x3fb   : > { %5102 = vmatpush.msra.mxu1 %v5027_v6  ;;  %5117 = vmatpush.msra.mxu2 %v5048_v9  ;;  %v5041_v6 = vld [vmem:[%s12074_s6 + $0x110] sm:$0xff] }
 0x3fc   : > { %v4980_v50 = vrot.slane %v4979_v63, 1  ;;  %v4945_v30 = vadd.f32 %v4944_v39, %v4943_v10  ;;  %v4788_v24 = vpop.f32.mrf.mxu1  ;;  %v5047_v10 = vld [vmem:[%s12074_s6 + $0x140] sm:$0xff]  ;;  %v5046_v39 = vld [vmem:[%s12074_s6 + $0x138] sm:$0xff] }
 0x3fd   : > { %5103 = vmatpush.msra.mxu1 %v5026_v7  ;;  %5118 = vmatpush.msra.mxu2 %v5047_v10  ;;  %v5070_v7 = vld [vmem:[%s12074_s6 + $0x1f8] sm:$0xff] }
 0x3fe   : > { %v4981_v54 = vadd.f32 %v4980_v50, %v4979_v63  ;;  %5131 = vmatpush.msra.mxu3 %v5070_v7 }
 0x3ff   : > { %5104 = vmatpush.msra.mxu1 %v5025_v3  ;;  %5119 = vmatpush.msra.mxu2 %v5046_v39 }
 0x400   : > { %v5003_v40 = vsel %vm965_vm4, %v4945_v30, %v4981_v54  ;;  %v5043_v30 = vld [vmem:[%s12074_s6 + $0x120] sm:$0xff]  ;;  %5132 = vmatpush.msra.mxu3 %v5069_v51 }
 0x401   : > { %5087 = vmatmul.f32.vlgmr.msra.gmra.mxu0 %v5003_v40  ;;  %5105 = vmatpush.msra.mxu1 %v5024_v62 }
 0x402   : > { %5120 = vmatpush.msra.mxu2 %v5045_v0 }
 0x403   : > { %v4772_v4 = vpop.f32.mrf.mxu0  ;;  %5106 = vmatpush.msra.mxu1 %v5023_v56  ;;  %v5068_v56 = vld [vmem:[%s12074_s6 + $0x1e8] sm:$0xff] }
 0x404   : > { %v4773_v2 = vadd.f32 %v4772_v4, %v4759_v27  ;;  %v5044_v4 = vld [vmem:[%s12074_s6 + $0x128] sm:$0xff]  ;;  %5133 = vmatpush.msra.mxu3 %v5068_v56 }
 0x405   : > { %5121 = vmatpush.msra.mxu2 %v5044_v4 }
 0x406   : > { %v4787_v12 = vadd.f32 %v4786_v46, %v4773_v2  ;;  %5134 = vmatpush.msra.mxu3 %v5067_v28 }
 0x407   : > { %5122 = vmatpush.msra.mxu2 %v5043_v30 }
 0x408   : > { %v11893_v61 = vadd.f32 %v4787_v12, %v11454_v21 }
 0x409   : > { %5123 = vmatpush.msra.mxu2 %v5042_v43  ;;  %v5056_v43 = vld [vmem:[%s12074_s6 + $0x188] sm:$0xff] }
 0x40a   : > { %v4968_v21 = vmul.f32 %v11893_v61, %v11893_v61 }
 0x40b   : > { %v4774_v53 = vpop.f32.mrf.mxu0  ;;  %v4800_v16 = vpop.f32.mrf.mxu2  ;;  %5124 = vmatpush.msra.mxu2 %v5041_v6 }
 0x40c   : > { %v4775_v34 = vadd.f32 %v4774_v53, %v4761_v29  ;;  %v4814_v35 = vpop.f32.mrf.mxu3 }
 0x40d   : > { %v4815_v52 = vadd.f32 %v4814_v35, %v4800_v16  ;;  %5125 = vmatpush.msra.mxu2 %v5040_v22 }
 0x40e   : > { %v4789_v41 = vadd.f32 %v4788_v24, %v4775_v34  ;;  %v5039_v34 = vld [vmem:[%s12074_s6 + $0x100] sm:$0xff] }
 0x40f   : > { %5126 = vmatpush.msra.mxu2 %v5039_v34 }
 0x410   : > { %v11902_v32 = vadd.f32 %v4789_v41, %v11516_v37 }
 0x412   : > { %v4946_v5 = vadd.f32 %v11902_v32, %v11893_v61  ;;  %v4972_v33 = vmul.f32 %v11902_v32, %v11902_v32 }
 0x413   : > { %v4802_v36 = vpop.f32.mrf.mxu2 }
 0x414   : > { %v4947_v25 = vrot.slane %v4946_v5, 4  ;;  %v4982_v15 = vadd.f32 %v4972_v33, %v4968_v21  ;;  %v4842_v45 = vpop.f32.mrf.mxu1  ;;  %v4816_v46 = vpop.f32.mrf.mxu3  ;;  %v5066_v21 = vld [vmem:[%s12074_s6 + $0x1d8] sm:$0xff] }
 0x415   : > { %v4817_v54 = vadd.f32 %v4816_v46, %v4802_v36  ;;  %5135 = vmatpush.msra.mxu3 %v5066_v21  ;;  %v5057_v46 = vld [vmem:[%s12074_s6 + $0x190] sm:$0xff] }
 0x416   : > { %v4948_v55 = vadd.f32 %v4947_v25, %v4946_v5  ;;  %v4983_v42 = vrot.slane %v4982_v15, 4  ;;  %v5065_v25 = vld [vmem:[%s12074_s6 + $0x1d0] sm:$0xff] }
 0x417   : > { %5136 = vmatpush.msra.mxu3 %v5065_v25 }
 0x418   : > { %v4949_v44 = vrot.slane %v4948_v55, 2  ;;  %v4984_v20 = vadd.f32 %v4983_v42, %v4982_v15  ;;  %v5064_v42 = vld [vmem:[%s12074_s6 + $0x1c8] sm:$0xff] }
 0x419   : > { %5137 = vmatpush.msra.mxu3 %v5064_v42 }
 0x41a   : > { %v4950_v37 = vadd.f32 %v4949_v44, %v4948_v55  ;;  %v4985_v14 = vrot.slane %v4984_v20, 2 }
 0x41b   : > { %v4856_v26 = vpop.f32.mrf.mxu2 }
 0x41c   : > { %v4951_v8 = vrot.slane %v4950_v37, 1  ;;  %v4986_v49 = vadd.f32 %v4985_v14, %v4984_v20  ;;  %v4844_v29 = vpop.f32.mrf.mxu1 }
 0x41e   : > { %v4987_v13 = vrot.slane %v4986_v49, 1  ;;  %v4952_v57 = vadd.f32 %v4951_v8, %v4950_v37  ;;  %v5063_v37 = vld [vmem:[%s12074_s6 + $0x1c0] sm:$0xff] }
 0x41f   : > { %5138 = vmatpush.msra.mxu3 %v5063_v37  ;;  %v5182_v37 = vld [vmem:[%s12075_s7 + $0x30] sm:$0xff] }
 0x420   : > { %v4988_v60 = vadd.f32 %v4987_v13, %v4986_v49  ;;  %v5061_v13 = vld [vmem:[%s12074_s6 + $0x1b0] sm:$0xff]  ;;  %5241 = vmatpush.msrb.mxu2 %v5182_v37 }
 0x421   : > { %5139 = vmatpush.msra.mxu3 %v5062_v19  ;;  %v5179_v19 = vld [vmem:[%s12075_s7 + $0x18] sm:$0xff] }
 0x422   : > { %v5004_v50 = vsel %vm965_vm4, %v4952_v57, %v4988_v60  ;;  %v5060_v60 = vld [vmem:[%s12074_s6 + $0x1a8] sm:$0xff] }
 0x423   : > { %v4828_v63 = vpop.f32.mrf.mxu0  ;;  %5107 = vmatmul.f32.vlgmr.msra.gmra.mxu1 %v5004_v50  ;;  %v4858_v12 = vpop.f32.mrf.mxu2  ;;  %5140 = vmatpush.msra.mxu3 %v5061_v13  ;;  %v5058_v50 = vld [vmem:[%s12074_s6 + $0x198] sm:$0xff]  ;;  %v5177_v13 = vld [vmem:[%s12075_s7 + $0x8] sm:$0xff] }
 0x424   : > { %v4829_v47 = vadd.f32 %v4828_v63, %v4815_v52 }
 0x425   : > { %5141 = vmatpush.msra.mxu3 %v5060_v60 }
 0x426   : > { %v4843_v27 = vadd.f32 %v4842_v45, %v4829_v47 }
 0x428   : > { %v4857_v2 = vadd.f32 %v4856_v26, %v4843_v27  ;;  %v5059_v26 = vld [vmem:[%s12074_s6 + $0x1a0] sm:$0xff] }
 0x429   : > { %5142 = vmatpush.msra.mxu3 %v5059_v26 }
 0x42a   : > { %v11951_v23 = vadd.f32 %v4857_v2, %v11681_v11 }
 0x42b   : > { %v4830_v31 = vpop.f32.mrf.mxu0  ;;  %5143 = vmatpush.msra.mxu3 %v5058_v50 }
 0x42c   : > { %v4831_v40 = vadd.f32 %v4830_v31, %v4817_v54  ;;  %v4870_v62 = vpop.f32.mrf.mxu3  ;;  %v4969_v24 = vmul.f32 %v11951_v23, %v11951_v23 }
 0x42d   : > { %5144 = vmatpush.msra.mxu3 %v5057_v46 }
 0x42e   : > { %v4845_v3 = vadd.f32 %v4844_v29, %v4831_v40  ;;  %v5055_v40 = vld [vmem:[%s12074_s6 + $0x180] sm:$0xff] }
 0x42f   : > { %5145 = vmatpush.msra.mxu3 %v5056_v43 }
 0x430   : > { %v4859_v53 = vadd.f32 %v4858_v12, %v4845_v3 }
 0x431   : > { %5146 = vmatpush.msra.mxu3 %v5055_v40 }
 0x432   : > { %v11957_v38 = vadd.f32 %v4859_v53, %v11735_v18 }
 0x434   : > { %v4953_v41 = vadd.f32 %v11957_v38, %v11951_v23  ;;  %v4973_v11 = vmul.f32 %v11957_v38, %v11957_v38  ;;  %v4872_v36 = vpop.f32.mrf.mxu3  ;;  %v4898_v35 = vpop.f32.mrf.mxu1 }
 0x436   : > { %v4954_v18 = vrot.slane %v4953_v41, 4  ;;  %v4989_v16 = vadd.f32 %v4973_v11, %v4969_v24 }
 0x438   : > { %v4955_v5 = vadd.f32 %v4954_v18, %v4953_v41  ;;  %v4990_v33 = vrot.slane %v4989_v16, 4 }
 0x43a   : > { %v4956_v15 = vrot.slane %v4955_v5, 2  ;;  %v4991_v55 = vadd.f32 %v4990_v33, %v4989_v16 }
 0x43b   : > { %v4912_v10 = vpop.f32.mrf.mxu2 }
 0x43c   : > { %v4957_v44 = vadd.f32 %v4956_v15, %v4955_v5  ;;  %v4992_v20 = vrot.slane %v4991_v55, 2  ;;  %v4926_v39 = vpop.f32.mrf.mxu3  ;;  %v4900_v27 = vpop.f32.mrf.mxu1 }
 0x43e   : > { %v4958_v14 = vrot.slane %v4957_v44, 1  ;;  %v4993_v59 = vadd.f32 %v4992_v20, %v4991_v55 }
 0x440   : > { %v4994_v49 = vrot.slane %v4993_v59, 1  ;;  %v4959_v52 = vadd.f32 %v4958_v14, %v4957_v44  ;;  %v5183_v14 = vld [vmem:[%s12075_s7 + $0x38] sm:$0xff] }
 0x441   : > { %5261 = vmatpush.msrb.mxu3 %v5183_v14 }
 0x442   : > { %v4995_v45 = vadd.f32 %v4994_v49, %v4993_v59  ;;  %v5178_v59 = vld [vmem:[%s12075_s7 + $0x10] sm:$0xff] }
 0x443   : > { %v4884_v8 = vpop.f32.mrf.mxu0  ;;  %v4914_v31 = vpop.f32.mrf.mxu2  ;;  %5242 = vmatpush.msrb.mxu2 %v5178_v59  ;;  %5262 = vmatpush.msrb.mxu3 %v5179_v19 }
 0x444   : > { %v4885_v9 = vadd.f32 %v4884_v8, %v4870_v62  ;;  %v5005_v63 = vsel %vm965_vm4, %v4959_v52, %v4995_v45  ;;  %v4928_v6 = vpop.f32.mrf.mxu3  ;;  %v5181_v8 = vld [vmem:[%s12075_s7 + $0x28] sm:$0xff] }
 0x445   : > { %5127 = vmatmul.f32.vlgmr.msra.gmra.mxu2 %v5005_v63  ;;  %5221 = vmatpush.msrb.mxu1 %v5181_v8 }
 0x446   : > { %v4899_v57 = vadd.f32 %v4898_v35, %v4885_v9  ;;  %v5180_v35 = vld [vmem:[%s12075_s7 + $0x20] sm:$0xff] }
 0x447   : > { %5201 = vmatpush.msrb.mxu0 %v5180_v35  ;;  %v5176_v9 = vld [vmem:[%s12075_s7] sm:$0xff]  ;;  %5222 = vmatpush.msrb.mxu1 %v5177_v13 }
 0x448   : > { %v4913_v47 = vadd.f32 %v4912_v10, %v4899_v57 }
 0x449   : > { %5202 = vmatpush.msrb.mxu0 %v5176_v9 }
 0x44a   : > { %v4927_v30 = vadd.f32 %v4926_v39, %v4913_v47 }
 0x44b   : > { %v4886_v0 = vpop.f32.mrf.mxu0 }
 0x44c   : > { %v4887_v4 = vadd.f32 %v4886_v0, %v4872_v36  ;;  %v12009_v7 = vadd.f32 %v4927_v30, %v11772_v1 }
 0x44e   : > { %v4901_v54 = vadd.f32 %v4900_v27, %v4887_v4  ;;  %v4970_v12 = vmul.f32 %v12009_v7, %v12009_v7 }
 0x450   : > { %v4915_v2 = vadd.f32 %v4914_v31, %v4901_v54 }
 0x452   : > { %v4929_v51 = vadd.f32 %v4928_v6, %v4915_v2 }
 0x454   : > { %v12012_v29 = vadd.f32 %v4929_v51, %v11778_v58  ;;  %v5267_v51 = vld [vmem:[%s12076_s8] sm:$0xf] }
 0x456   : > { %v4960_v3 = vadd.f32 %v12012_v29, %v12009_v7  ;;  %v4974_v22 = vmul.f32 %v12012_v29, %v12012_v29 }
 0x458   : > { %v4961_v53 = vrot.slane %v4960_v3, 4  ;;  %v4996_v34 = vadd.f32 %v4974_v22, %v4970_v12 }
 0x45a   : > { %v4962_v62 = vadd.f32 %v4961_v53, %v4960_v3  ;;  %v4997_v24 = vrot.slane %v4996_v34, 4 }
 0x45c   : > { %v4963_v1 = vrot.slane %v4962_v62, 2  ;;  %v4998_v41 = vadd.f32 %v4997_v24, %v4996_v34 }
 0x45e   : > { %v4964_v11 = vadd.f32 %v4963_v1, %v4962_v62  ;;  %v4999_v56 = vrot.slane %v4998_v41, 2 }
 0x460   : > { %v4965_v28 = vrot.slane %v4964_v11, 1  ;;  %v5000_v58 = vadd.f32 %v4999_v56, %v4998_v41 }
 0x462   : > { %v5001_v18 = vrot.slane %v5000_v58, 1  ;;  %v4966_v16 = vadd.f32 %v4965_v28, %v4964_v11 }
 0x464   : > { %v5002_v21 = vadd.f32 %v5001_v18, %v5000_v58 }
 0x466   : > { %v5006_v5 = vsel %vm965_vm4, %v4966_v16, %v5002_v21 }
 0x467   : > { %5147 = vmatmul.f32.vlgmr.msra.gmra.mxu3 %v5006_v5 }
 0x47e   : > { %v5088_v25 = vpop.f32.mrf.mxu0 }
 0x4a0   : > { %v5108_v33 = vpop.f32.mrf.mxu1 }
 0x4a1   : > { %v5109_v55 = vadd.f32 %v5108_v33, %v5088_v25 }
 0x4c8   : > { %v5128_v15 = vpop.f32.mrf.mxu2 }
 0x4c9   : > { %v5129_v42 = vadd.f32 %v5128_v15, %v5109_v55 }
 0x4ea   : > { %v5148_v44 = vpop.f32.mrf.mxu3 }
 0x4eb   : > { %v5149_v20 = vadd.f32 %v5148_v44, %v5129_v42 }
 0x4ed   : > { %v5151_v36 = vmul.f32 0.001953125, %v5149_v20 }
 0x4ef   : > { %v5152_v49 = vmul.f32 %v5151_v36, %v5151_v36 }
 0x4f1   : > { %v5154_v10 = vrot.slane %v5152_v49, 7 }
 0x4f3   : > { %v5156_v52 = vsub.f32 %v5151_v36, %v5154_v10 }
 0x4f5   : > { %v5157_v45 = vadd.f32 1e-05, %v5156_v52 }
 0x4f7   : > { %8160 = vrsqrt.f32 %v5157_v45  ;;  %vm5164_vm14 = vweird.f32 %v5157_v45 }
 0x4fd   : > { %v8161_v57 = vpop.eup %8160 }
 0x4fe   : > { %v5159_v60 = vmul.f32 %v8161_v57, %v5157_v45  ;;  %vm5165_vm13 = vweird.f32 %v8161_v57 }
 0x4ff   : > { %vm5166_vm15 = vmor %vm5164_vm14, %vm5165_vm13 }
 0x500   : > { %v5160_v39 = vmul.f32 %v8161_v57, %v5159_v60 }
 0x502   : > { %v5161_v63 = vmul.f32 0.5, %v5160_v39 }
 0x504   : > { %v5162_v26 = vsub.f32 1.5, %v5161_v63 }
 0x506   : > { %v5163_v47 = vmul.f32 %v8161_v57, %v5162_v26 }
 0x508   : > { %v5167_v50 = vsel %vm5166_vm15, %v8161_v57, %v5163_v47 }
 0x509   : > { %v5169_v0 = vrot.slane %v5167_v50, 1 }
 0x50b   : > { %v5171_v4 = vmul.f32 %v5169_v0, %v5151_v36 }
 0x50d   : > { %v5173_v46 = vrot.slane %v5171_v4, 7 }
 0x50f   : > { %v5175_v27 = vsel %vm965_vm4, %v5169_v0, %v5173_v46 }
 0x510   : > { %7661 = vmatmul.msk.f32.vlgmr.msrb.gmra.mxu0 %vm1147_vm8, %v5175_v27  ;;  %7662 = vmatmul.msk.f32.vlgmr.msrb.gmra.mxu1 %vm1147_vm8, %v5175_v27 }
 0x511   : > { %7663 = vmatmul.msk.f32.vlgmr.msrb.gmra.mxu2 %vm1147_vm8, %v5175_v27  ;;  %7664 = vmatmul.msk.f32.vlgmr.msrb.gmra.mxu3 %vm1147_vm8, %v5175_v27 }
 0x58d   : > { %v5204_v30 = vpop.f32.mrf.mxu0  ;;  %v5224_v54 = vpop.f32.mrf.mxu1 }
 0x58e   : > { %5272 = vst [vmem:[#allocation1] sm:$0xff] %v5204_v30  ;;  %v5280_v2 = vperm.slane %v5204_v30, 0  ;;  %v5281_v40 = vperm.slane %v5224_v54, 0 }
 0x58f   : > { %5273 = vst [vmem:[#allocation1 + $0x9] sm:$0xff] %v5224_v54 }
 0x590   : > { %v5284_v53 = vmul.f32 %v5280_v2, %v11838_v48  ;;  %v5285_v34 = vmul.f32 %v5281_v40, %v11893_v61  ;;  %v5288_v28 = vmul.f32 %v5280_v2, %v11841_v17  ;;  %v5289_v58 = vmul.f32 %v5281_v40, %v11902_v32 }
 0x594   : > { %v5244_v43 = vpop.f32.mrf.mxu2  ;;  %v5264_v31 = vpop.f32.mrf.mxu3 }
 0x595   : > { %5274 = vst [vmem:[#allocation1 + $0x12] sm:$0xff] %v5244_v43  ;;  %v5282_v6 = vperm.slane %v5244_v43, 0  ;;  %v5283_v12 = vperm.slane %v5264_v31, 0 }
 0x596   : > { %5275 = vst [vmem:[#allocation1 + $0x1b] sm:$0xff] %v5264_v31 }
 0x597   : > { %v5286_v62 = vmul.f32 %v5282_v6, %v11951_v23  ;;  %v5287_v24 = vmul.f32 %v5283_v12, %v12009_v7  ;;  %v5290_v18 = vmul.f32 %v5282_v6, %v11957_v38  ;;  %v5291_v61 = vmul.f32 %v5283_v12, %v12012_v29 }
 0x59d   : > { %v5277_v3 = vld [vmem:[#allocation1 + $0x1] ss:$9 sm:$0xff] }
 0x59e   : > { %v5279_v22 = vsub.f32 %v5267_v51, %v5277_v3 }
 0x5a0   : > { %v5293_v1 = vperm.slane %v5279_v22, 0  ;;  %v5294_v41 = vperm.slane %v5279_v22, 1  ;;  %v5295_v11 = vperm.slane %v5279_v22, 2  ;;  %v5296_v56 = vperm.slane %v5279_v22, 3 }
 0x5a2   : > { %v5301_v16 = vadd.f32 %v5293_v1, %v5284_v53  ;;  %v5302_v21 = vadd.f32 %v5294_v41, %v5285_v34  ;;  %v5303_v48 = vadd.f32 %v5295_v11, %v5286_v62  ;;  %v5304_v5 = vadd.f32 %v5296_v56, %v5287_v24 }
 0x5a3   : > { %v5305_v23 = vadd.f32 %v5293_v1, %v5288_v28  ;;  %v5306_v7 = vadd.f32 %v5294_v41, %v5289_v58  ;;  %v5307_v33 = vadd.f32 %v5295_v11, %v5290_v18  ;;  %v5308_v55 = vadd.f32 %v5296_v56, %v5291_v61 }
 0x5a4   : > { %v5309_v25 = vmax.f32 %v5301_v16, 0.0  ;;  %v5310_v15 = vmax.f32 %v5302_v21, 0.0  ;;  %v5311_v17 = vmax.f32 %v5303_v48, 0.0  ;;  %v5312_v32 = vmax.f32 %v5304_v5, 0.0 }
 0x5a5   : > { %v5313_v42 = vmax.f32 %v5305_v23, 0.0  ;;  %v5314_v38 = vmax.f32 %v5306_v7, 0.0  ;;  %v5315_v44 = vmax.f32 %v5307_v33, 0.0  ;;  %v5316_v20 = vmax.f32 %v5308_v55, 0.0 }
 0x5a6   : > { %5317 = vst [vmem:[%s332_s21] sm:$0xff] %v5309_v25 }
 0x5a7   : > { %5318 = vst [vmem:[%s332_s21 + $0x8] sm:$0xff] %v5310_v15 }
 0x5a8   : > { %5319 = vst [vmem:[%s332_s21 + $0x10] sm:$0xff] %v5311_v17 }
 0x5a9   : > { %5320 = vst [vmem:[%s332_s21 + $0x18] sm:$0xff] %v5312_v32 }
 0x5aa   : > { %5321 = vst [vmem:[%s332_s21 + $0x20] sm:$0xff] %v5313_v42 }
 0x5ab   : > { %5322 = vst [vmem:[%s332_s21 + $0x28] sm:$0xff] %v5314_v38 }
 0x5ac   : > { %5323 = vst [vmem:[%s332_s21 + $0x30] sm:$0xff] %v5315_v44 }
 0x5ad   : > { %5324 = vst [vmem:[%s332_s21 + $0x38] sm:$0xff] %v5316_v20 }
 0x5ae PF: > { %s19_s30 = sadd.s32 1, %s8178_s30  }
 0x5af   : > { %p16_p4 = scmp.ge.s32.totalorder %s19_s30, 4  }
 0x5b1   :  { %18 = sbr.rel (!%p16_p4) target bundleno = 1 (0x1), region = 93 }

</bundles_post_ra>
